<compile_context>
chip_gen: v5e
topology: v5e:2x2
jax: 0.10.0
libtpu: 0.0.40
codegen_flags: <defaults>
</compile_context>

<pallas_src>
import functools
import math

import jax
import jax.numpy as jnp
import numpy as np
from jax import lax
from jax.experimental import pallas as pl
from jax.experimental.pallas import tpu as pltpu


# --------------------------------------------------------------------------
# host-side parameter padding / fusion helpers
# --------------------------------------------------------------------------
def _round_up(n, m):
    return ((n + m - 1) // m) * m


def _pad_last(a, new):
    pad = new - a.shape[-1]
    if pad == 0:
        return a
    return jnp.pad(a, [(0, 0)] * (a.ndim - 1) + [(0, pad)])


def _pad_first(a, new):
    pad = new - a.shape[0]
    if pad == 0:
        return a
    return jnp.pad(a, [(0, pad)] + [(0, 0)] * (a.ndim - 1))


def _pad_gate_last(a, Hp):
    """Last dim is 4*H in PyTorch gate order [i|f|g|o]; zero-pad each gate to Hp."""
    parts = jnp.split(a, 4, axis=-1)
    return jnp.concatenate([_pad_last(p, Hp) for p in parts], axis=-1)


# --------------------------------------------------------------------------
# kernel
# --------------------------------------------------------------------------
def pointer_network_kernel(
    # ---- inputs (one batch tile) ----
    x_ref,            # [B*S, 2]    f32   (batch-major flattened coordinates)
    gumbel_ref,       # [S, B, S]   f32   (decode step, batch, seq)
    w_emb_ref,        # [2, Hp]     bf16
    enc_wih_ref,      # [Hp, 4Hp]   bf16
    enc_whh_ref,      # [Hp, 4Hp]   bf16
    enc_b_ref,        # [1, 4Hp]    f32
    dec_w_ref,        # [2Hp, 4Hp]  bf16  (stacked [W_ih ; W_hh])
    dec_b_ref,        # [1, 4Hp]    f32
    g_wq_ref,         # [Hp, Hp]    bf16
    g_bq_ref,         # [1, Hp]     f32
    p_wq_ref,         # [Hp, Hp]    bf16
    p_bq_ref,         # [1, Hp]     f32
    wref_ref,         # [Hp, 2Hp]   bf16  (fused [W_ref_glimpse | W_ref_pointer])
    bref_ref,         # [1, 2Hp]    f32
    g_v_ref,          # [1, Hp]     f32
    p_v_ref,          # [1, Hp]     f32
    dec_start_ref,    # [1, Hp]     f32
    # ---- outputs ----
    logp_out_ref,     # [B, S] f32
    chosen_out_ref,   # [B, S] i32
    *, B, S, Hp, n_glimpses, tanh_C,
):
    f32 = jnp.float32
    bf16 = jnp.bfloat16

    # ---------------- embedding: one batched matmul -------------------------
    x2 = x_ref[...].astype(bf16)                                        # [B*S, 2]
    emb2 = jnp.dot(x2, w_emb_ref[...], preferred_element_type=f32)      # [B*S, Hp]
    emb = emb2.reshape(B, S, Hp)                                        # batch-major

    # ------- encoder input projection, hoisted out of the recurrence --------
    gx2 = jnp.dot(emb2.astype(bf16), enc_wih_ref[...],
                  preferred_element_type=f32) + enc_b_ref[...]          # [B*S, 4Hp]
    gx = gx2.reshape(B, S, 4 * Hp)

    # ---------------- encoder LSTM (only h @ W_hh inside the loop) ----------
    enc_whh = enc_whh_ref[...]
    h = jnp.zeros((B, Hp), f32)
    c = jnp.zeros((B, Hp), f32)
    hs = []
    for s in range(S):                                                  # static unroll
        gates = gx[:, s, :] + jnp.dot(h.astype(bf16), enc_whh,
                                      preferred_element_type=f32)       # [B, 4Hp]
        i_g = jax.nn.sigmoid(gates[:, 0:Hp])
        f_g = jax.nn.sigmoid(gates[:, Hp:2 * Hp])
        g_g = jnp.tanh(gates[:, 2 * Hp:3 * Hp])
        o_g = jax.nn.sigmoid(gates[:, 3 * Hp:4 * Hp])
        c = f_g * c + i_g * g_g
        h = o_g * jnp.tanh(c)
        hs.append(h)
    enc_out2 = jnp.stack(hs, axis=1).reshape(B * S, Hp)                 # [B*S, Hp]

    # -------- fused glimpse / pointer ref projections: one matmul -----------
    egep = jnp.dot(enc_out2.astype(bf16), wref_ref[...],
                   preferred_element_type=f32) + bref_ref[...]          # [B*S, 2Hp]
    eg = egep[:, 0:Hp].reshape(B, S, Hp)
    ep = egep[:, Hp:2 * Hp].reshape(B, S, Hp)

    # -------- hoisted broadcasts (JAX does not CSE broadcast_in_dim) --------
    dec_b = jnp.broadcast_to(dec_b_ref[...], (B, 4 * Hp))
    g_bq = jnp.broadcast_to(g_bq_ref[...], (B, Hp))
    p_bq = jnp.broadcast_to(p_bq_ref[...], (B, Hp))
    g_v = jnp.broadcast_to(g_v_ref[...][:, None, :], (B, S, Hp))
    p_v = jnp.broadcast_to(p_v_ref[...][:, None, :], (B, S, Hp))
    dinp0 = jnp.broadcast_to(dec_start_ref[...], (B, Hp))

    lane_iota = lax.broadcasted_iota(jnp.int32, (B, S), 1)
    neg_big = jnp.float32(-100000.0)

    # ---------------------------- decoding loop -----------------------------
    def decode_step(idx, carry):
        h, c, dinp, mask, logp_acc, chosen_acc = carry

        # decoder LSTM: single fused gate matmul on [input ; h]
        xin = jnp.concatenate([dinp, h], axis=-1).astype(bf16)          # [B, 2Hp]
        gates = jnp.dot(xin, dec_w_ref[...],
                        preferred_element_type=f32) + dec_b
        i_g = jax.nn.sigmoid(gates[:, 0:Hp])
        f_g = jax.nn.sigmoid(gates[:, Hp:2 * Hp])
        g_g = jnp.tanh(gates[:, 2 * Hp:3 * Hp])
        o_g = jax.nn.sigmoid(gates[:, 3 * Hp:4 * Hp])
        c_new = f_g * c + i_g * g_g
        h_new = o_g * jnp.tanh(c_new)

        # ---- glimpse attention (no tanh exploration) ----
        query = h_new
        for _ in range(n_glimpses):
            q = jnp.dot(query.astype(bf16), g_wq_ref[...],
                        preferred_element_type=f32) + g_bq              # [B, Hp]
            u = jnp.tanh(q[:, None, :] + eg)                            # [B, S, Hp]
            logits = jnp.sum(u * g_v, axis=-1)                          # [B, S]
            masked = jnp.where(mask > 0.0, neg_big, logits)
            p = jax.nn.softmax(masked, axis=-1)                         # [B, S]
            query = jnp.sum(p[:, :, None] * eg, axis=1)                 # [B, Hp]

        # ---- pointer attention (tanh exploration: C * tanh(logits)) ----
        q = jnp.dot(query.astype(bf16), p_wq_ref[...],
                    preferred_element_type=f32) + p_bq
        u = jnp.tanh(q[:, None, :] + ep)
        logits = tanh_C * jnp.tanh(jnp.sum(u * p_v, axis=-1))           # [B, S]
        masked = jnp.where(mask > 0.0, neg_big, logits)

        # log-softmax over the (lane-dense) sequence axis
        mmax = jnp.max(masked, axis=-1, keepdims=True)                  # [B, 1]
        lse = mmax + jnp.log(jnp.sum(jnp.exp(masked - mmax),
                                     axis=-1, keepdims=True))
        logp = masked - lse                                             # [B, S]

        # Gumbel-max sampling == Categorical(softmax(masked)).sample();
        # visited positions forced to -inf so a city can never be revisited.
        scores = jnp.where(mask > 0.0, -jnp.inf, masked + gumbel_ref[idx])
        smax = jnp.max(scores, axis=-1, keepdims=True)                  # [B, 1]
        chosen = jnp.min(jnp.where(scores >= smax, lane_iota, S),
                         axis=-1, keepdims=True)                        # [B, 1] i32
        onehot = (lane_iota == chosen).astype(f32)                      # [B, S]

        chosen_logp = jnp.sum(onehot * logp, axis=-1, keepdims=True)    # [B, 1]
        mask_new = jnp.maximum(mask, onehot)
        dinp_new = jnp.sum(onehot[:, :, None] * emb, axis=1)            # [B, Hp]

        step_hot = (lane_iota == idx)                                   # [B, S] bool
        logp_acc = logp_acc + jnp.where(step_hot, chosen_logp, 0.0)
        chosen_acc = chosen_acc + step_hot.astype(jnp.int32) * chosen

        return h_new, c_new, dinp_new, mask_new, logp_acc, chosen_acc

    carry0 = (h, c, dinp0,
              jnp.zeros((B, S), f32),          # visited mask
              jnp.zeros((B, S), f32),          # log-prob accumulator
              jnp.zeros((B, S), jnp.int32))    # chosen-index accumulator
    _, _, _, _, logp_acc, chosen_acc = lax.fori_loop(0, S, decode_step, carry0)

    # single lane-dense store of both outputs (no per-step masked stores)
    logp_out_ref[...] = logp_acc
    chosen_out_ref[...] = chosen_acc


# --------------------------------------------------------------------------
# wrapper
# --------------------------------------------------------------------------
def pointer_network_forward(x, params, gumbel, *, n_glimpses, tanh_C):
    """x: [B, S, 2] f32; gumbel: [S, B, S] f32 (per decode step)."""
    B, S, _ = x.shape
    H = params["w_emb"].shape[1]
    Hp = _round_up(H, 128)                     # lane-align hidden/gate blocks
    bf16 = jnp.bfloat16

    # ---- pad / fuse / cast parameters (zero padding keeps math identical) --
    w_emb = _pad_last(params["w_emb"], Hp).astype(bf16)
    enc_wih = _pad_gate_last(_pad_first(params["enc_wih_t"], Hp), Hp).astype(bf16)
    enc_whh = _pad_gate_last(_pad_first(params["enc_whh_t"], Hp), Hp).astype(bf16)
    enc_b = _pad_gate_last(params["enc_b"], Hp)
    dec_w = jnp.concatenate(
        [_pad_gate_last(_pad_first(params["dec_wih_t"], Hp), Hp),
         _pad_gate_last(_pad_first(params["dec_whh_t"], Hp), Hp)], axis=0).astype(bf16)
    dec_b = _pad_gate_last(params["dec_b"], Hp)
    g_wq = _pad_last(_pad_first(params["g_wq_t"], Hp), Hp).astype(bf16)
    g_bq = _pad_last(params["g_bq"], Hp)
    p_wq = _pad_last(_pad_first(params["p_wq_t"], Hp), Hp).astype(bf16)
    p_bq = _pad_last(params["p_bq"], Hp)
    wref = jnp.concatenate(
        [_pad_last(_pad_first(params["g_wref_t"], Hp), Hp),
         _pad_last(_pad_first(params["p_wref_t"], Hp), Hp)], axis=1).astype(bf16)
    bref = jnp.concatenate(
        [_pad_last(params["g_bref"], Hp), _pad_last(params["p_bref"], Hp)], axis=1)
    g_v = _pad_last(params["g_v"], Hp)
    p_v = _pad_last(params["p_v"], Hp)
    dec_start = _pad_last(params["dec_start"], Hp)

    # ---- batch-tile grid (size 1 here; shards batch across v7x's 2 cores) --
    B_TILE = B
    nb = B // B_TILE

    x2d = x.reshape(B * S, 2).astype(jnp.float32)
    gumbel = gumbel.astype(jnp.float32)

    weight_inputs = (w_emb, enc_wih, enc_whh, enc_b, dec_w, dec_b,
                     g_wq, g_bq, p_wq, p_bq, wref, bref, g_v, p_v, dec_start)
    inputs = (x2d, gumbel) + weight_inputs

    in_specs = (
        [pl.BlockSpec((B_TILE * S, 2), lambda b: (b, 0)),
         pl.BlockSpec((S, B_TILE, S), lambda b: (0, b, 0))]
        + [pl.BlockSpec(w.shape, lambda b: (0, 0)) for w in weight_inputs]
    )
    out_specs = (pl.BlockSpec((B_TILE, S), lambda b: (b, 0)),
                 pl.BlockSpec((B_TILE, S), lambda b: (b, 0)))

    kernel = functools.partial(pointer_network_kernel, B=B_TILE, S=S, Hp=Hp,
                               n_glimpses=n_glimpses, tanh_C=float(tanh_C))

    logp, chosen = pl.pallas_call(
        kernel,
        grid=(nb,),
        in_specs=in_specs,
        out_specs=out_specs,
        out_shape=(jax.ShapeDtypeStruct((B, S), jnp.float32),
                   jax.ShapeDtypeStruct((B, S), jnp.int32)),
        compiler_params=pltpu.CompilerParams(
            dimension_semantics=("parallel",),
            vmem_limit_bytes=32 * 1024 * 1024),
    )(*inputs)

    return logp, chosen                          # already [batch, seq]


# --------------------------------------------------------------------------
# example / self-test
# --------------------------------------------------------------------------
if __name__ == "__main__":
    B, S, H = 2, 8, 32          # batch, seq_len, embedding_size == hidden_size
    n_glimpses = 1
    tanh_exploration = 10.0

    key = jax.random.PRNGKey(0)
    keys = jax.random.split(key, 24)

    def unif(k, shape, scale):
        return jax.random.uniform(k, shape, jnp.float32, -scale, scale)

    s_h = 1.0 / math.sqrt(H)
    params = dict(
        # GraphEmbedding(2, H)
        w_emb=unif(keys[0], (2, H), s_h),
        # encoder LSTM (PyTorch weight_ih [4H, E], weight_hh [4H, H]; stored transposed)
        enc_wih_t=unif(keys[1], (H, 4 * H), s_h),
        enc_whh_t=unif(keys[2], (H, 4 * H), s_h),
        enc_b=unif(keys[3], (1, 4 * H), s_h) + unif(keys[4], (1, 4 * H), s_h),
        # decoder LSTM
        dec_wih_t=unif(keys[5], (H, 4 * H), s_h),
        dec_whh_t=unif(keys[6], (H, 4 * H), s_h),
        dec_b=unif(keys[7], (1, 4 * H), s_h) + unif(keys[8], (1, 4 * H), s_h),
        # glimpse attention
        g_wq_t=unif(keys[9], (H, H), s_h),
        g_bq=unif(keys[10], (1, H), s_h),
        g_wref_t=unif(keys[11], (H, H), s_h),
        g_bref=unif(keys[12], (1, H), s_h),
        g_v=unif(keys[13], (1, H), s_h),
        # pointer attention
        p_wq_t=unif(keys[14], (H, H), s_h),
        p_bq=unif(keys[15], (1, H), s_h),
        p_wref_t=unif(keys[16], (H, H), s_h),
        p_bref=unif(keys[17], (1, H), s_h),
        p_v=unif(keys[18], (1, H), s_h),
        # decoder_start_input
        dec_start=unif(keys[19], (1, H), s_h),
    )

    x = jax.random.uniform(keys[20], (B, S, 2), jnp.float32)          # [B, S, 2]
    gumbel = jax.random.gumbel(keys[21], (S, B, S), jnp.float32)      # per decode step

    logp, chosen = pointer_network_forward(
        x, params, gumbel, n_glimpses=n_glimpses, tanh_C=tanh_exploration)
    jax.block_until_ready((logp, chosen))

    # sanity: masking guarantees each city is visited exactly once per batch row
    ch = np.asarray(chosen)
    lp = np.asarray(logp)
    assert ch.shape == (B, S) and lp.shape == (B, S)
    for b in range(B):
        assert sorted(ch[b].tolist()) == list(range(S)), ch[b]
    assert np.all(np.isfinite(lp)) and np.all(lp <= 1e-3)

    print("KERNEL_OK")
</pallas_src>

<mosaic_0001>
module attributes {stable_mosaic.version = 11 : i64} {
  func.func @pointer_network_kernel(%arg0: i32, %arg1: memref<16x2xf32, #tpu.memory_space<vmem>>, %arg2: memref<8x2x8xf32, #tpu.memory_space<vmem>>, %arg3: memref<2x128xbf16, #tpu.memory_space<vmem>>, %arg4: memref<128x512xbf16, #tpu.memory_space<vmem>>, %arg5: memref<128x512xbf16, #tpu.memory_space<vmem>>, %arg6: memref<1x512xf32, #tpu.memory_space<vmem>>, %arg7: memref<256x512xbf16, #tpu.memory_space<vmem>>, %arg8: memref<1x512xf32, #tpu.memory_space<vmem>>, %arg9: memref<128x128xbf16, #tpu.memory_space<vmem>>, %arg10: memref<1x128xf32, #tpu.memory_space<vmem>>, %arg11: memref<128x128xbf16, #tpu.memory_space<vmem>>, %arg12: memref<1x128xf32, #tpu.memory_space<vmem>>, %arg13: memref<128x256xbf16, #tpu.memory_space<vmem>>, %arg14: memref<1x256xf32, #tpu.memory_space<vmem>>, %arg15: memref<1x128xf32, #tpu.memory_space<vmem>>, %arg16: memref<1x128xf32, #tpu.memory_space<vmem>>, %arg17: memref<1x128xf32, #tpu.memory_space<vmem>>, %arg18: memref<2x8xf32, #tpu.memory_space<vmem>>, %arg19: memref<2x8xi32, #tpu.memory_space<vmem>>) attributes {dimension_semantics = [#tpu.dimension_semantics<parallel>], iteration_bounds = array<i64: 1>, scalar_prefetch = 0 : i64, scratch_operands = 0 : i64, tpu.core_type = #tpu.core_type<tc>, window_params = [{transform_indices = @transform_0, window_bounds = array<i64: 16, 2>}, {transform_indices = @transform_1, window_bounds = array<i64: 8, 2, 8>}, {pipeline_mode = #tpu.pipeline_mode<synchronous>, transform_indices = @transform_2, window_bounds = array<i64: 2, 128>}, {pipeline_mode = #tpu.pipeline_mode<synchronous>, transform_indices = @transform_3, window_bounds = array<i64: 128, 512>}, {pipeline_mode = #tpu.pipeline_mode<synchronous>, transform_indices = @transform_4, window_bounds = array<i64: 128, 512>}, {pipeline_mode = #tpu.pipeline_mode<synchronous>, transform_indices = @transform_5, window_bounds = array<i64: 1, 512>}, {pipeline_mode = #tpu.pipeline_mode<synchronous>, transform_indices = @transform_6, window_bounds = array<i64: 256, 512>}, {pipeline_mode = #tpu.pipeline_mode<synchronous>, transform_indices = @transform_7, window_bounds = array<i64: 1, 512>}, {pipeline_mode = #tpu.pipeline_mode<synchronous>, transform_indices = @transform_8, window_bounds = array<i64: 128, 128>}, {pipeline_mode = #tpu.pipeline_mode<synchronous>, transform_indices = @transform_9, window_bounds = array<i64: 1, 128>}, {pipeline_mode = #tpu.pipeline_mode<synchronous>, transform_indices = @transform_10, window_bounds = array<i64: 128, 128>}, {pipeline_mode = #tpu.pipeline_mode<synchronous>, transform_indices = @transform_11, window_bounds = array<i64: 1, 128>}, {pipeline_mode = #tpu.pipeline_mode<synchronous>, transform_indices = @transform_12, window_bounds = array<i64: 128, 256>}, {pipeline_mode = #tpu.pipeline_mode<synchronous>, transform_indices = @transform_13, window_bounds = array<i64: 1, 256>}, {pipeline_mode = #tpu.pipeline_mode<synchronous>, transform_indices = @transform_14, window_bounds = array<i64: 1, 128>}, {pipeline_mode = #tpu.pipeline_mode<synchronous>, transform_indices = @transform_15, window_bounds = array<i64: 1, 128>}, {pipeline_mode = #tpu.pipeline_mode<synchronous>, transform_indices = @transform_16, window_bounds = array<i64: 1, 128>}, {transform_indices = @transform_17, window_bounds = array<i64: 2, 8>}, {transform_indices = @transform_18, window_bounds = array<i64: 2, 8>}]} {
    %c0 = arith.constant 0 : index
    %c0_0 = arith.constant 0 : index
    %0 = vector.load %arg1[%c0, %c0_0] : memref<16x2xf32, #tpu.memory_space<vmem>>, vector<16x2xf32>
    %1 = arith.truncf %0 : vector<16x2xf32> to vector<16x2xbf16>
    %c0_1 = arith.constant 0 : index
    %c0_2 = arith.constant 0 : index
    %2 = vector.load %arg3[%c0_1, %c0_2] : memref<2x128xbf16, #tpu.memory_space<vmem>>, vector<2x128xbf16>
    %cst = arith.constant dense<0.000000e+00> : vector<16x128xf32>
    %3 = tpu.matmul %1, %2, %cst {dimension_numbers = #tpu.dot_dimension_numbers<[1], [0], [0], [1], [0, 0, 1, 1], [], []>} : vector<16x2xbf16>, vector<2x128xbf16>, vector<16x128xf32> -> vector<16x128xf32>
    %4 = vector.shape_cast %3 : vector<16x128xf32> to vector<2x8x128xf32>
    %5 = arith.truncf %3 : vector<16x128xf32> to vector<16x128xbf16>
    %c0_3 = arith.constant 0 : index
    %c0_4 = arith.constant 0 : index
    %6 = vector.load %arg4[%c0_3, %c0_4] : memref<128x512xbf16, #tpu.memory_space<vmem>>, vector<128x512xbf16>
    %cst_5 = arith.constant dense<0.000000e+00> : vector<16x512xf32>
    %7 = tpu.matmul %5, %6, %cst_5 {dimension_numbers = #tpu.dot_dimension_numbers<[1], [0], [0], [1], [0, 0, 1, 1], [], []>} : vector<16x128xbf16>, vector<128x512xbf16>, vector<16x512xf32> -> vector<16x512xf32>
    %c0_6 = arith.constant 0 : index
    %c0_7 = arith.constant 0 : index
    %8 = vector.load %arg6[%c0_6, %c0_7] : memref<1x512xf32, #tpu.memory_space<vmem>>, vector<1x512xf32>
    %9 = vector.broadcast %8 : vector<1x512xf32> to vector<16x512xf32>
    %10 = arith.addf %7, %9 : vector<16x512xf32>
    %11 = vector.shape_cast %10 : vector<16x512xf32> to vector<2x8x512xf32>
    %c0_8 = arith.constant 0 : index
    %c0_9 = arith.constant 0 : index
    %12 = vector.load %arg5[%c0_8, %c0_9] : memref<128x512xbf16, #tpu.memory_space<vmem>>, vector<128x512xbf16>
    %cst_10 = arith.constant 0.000000e+00 : f32
    %13 = vector.broadcast %cst_10 : f32 to vector<2x128xf32>
    %cst_11 = arith.constant 0.000000e+00 : f32
    %14 = vector.broadcast %cst_11 : f32 to vector<2x128xf32>
    %15 = vector.extract_strided_slice %11 {offsets = [0, 0, 0], sizes = [2, 1, 512], strides = [1, 1, 1]} : vector<2x8x512xf32> to vector<2x1x512xf32>
    %16 = vector.shape_cast %15 : vector<2x1x512xf32> to vector<2x512xf32>
    %17 = arith.truncf %13 : vector<2x128xf32> to vector<2x128xbf16>
    %cst_12 = arith.constant dense<0.000000e+00> : vector<2x512xf32>
    %18 = tpu.matmul %17, %12, %cst_12 {dimension_numbers = #tpu.dot_dimension_numbers<[1], [0], [0], [1], [0, 0, 1, 1], [], []>} : vector<2x128xbf16>, vector<128x512xbf16>, vector<2x512xf32> -> vector<2x512xf32>
    %19 = arith.addf %16, %18 : vector<2x512xf32>
    %20 = vector.extract_strided_slice %19 {offsets = [0, 0], sizes = [2, 128], strides = [1, 1]} : vector<2x512xf32> to vector<2x128xf32>
    %21 = arith.negf %20 : vector<2x128xf32>
    %22 = math.exp %21 : vector<2x128xf32>
    %cst_13 = arith.constant 1.000000e+00 : f32
    %23 = vector.broadcast %cst_13 : f32 to vector<2x128xf32>
    %24 = arith.addf %23, %22 : vector<2x128xf32>
    %25 = arith.divf %23, %24 : vector<2x128xf32>
    %26 = vector.extract_strided_slice %19 {offsets = [0, 128], sizes = [2, 128], strides = [1, 1]} : vector<2x512xf32> to vector<2x128xf32>
    %27 = arith.negf %26 : vector<2x128xf32>
    %28 = math.exp %27 : vector<2x128xf32>
    %cst_14 = arith.constant 1.000000e+00 : f32
    %29 = vector.broadcast %cst_14 : f32 to vector<2x128xf32>
    %30 = arith.addf %29, %28 : vector<2x128xf32>
    %31 = arith.divf %29, %30 : vector<2x128xf32>
    %32 = vector.extract_strided_slice %19 {offsets = [0, 256], sizes = [2, 128], strides = [1, 1]} : vector<2x512xf32> to vector<2x128xf32>
    %33 = math.tanh %32 : vector<2x128xf32>
    %34 = vector.extract_strided_slice %19 {offsets = [0, 384], sizes = [2, 128], strides = [1, 1]} : vector<2x512xf32> to vector<2x128xf32>
    %35 = arith.negf %34 : vector<2x128xf32>
    %36 = math.exp %35 : vector<2x128xf32>
    %cst_15 = arith.constant 1.000000e+00 : f32
    %37 = vector.broadcast %cst_15 : f32 to vector<2x128xf32>
    %38 = arith.addf %37, %36 : vector<2x128xf32>
    %39 = arith.divf %37, %38 : vector<2x128xf32>
    %40 = arith.mulf %31, %14 : vector<2x128xf32>
    %41 = arith.mulf %25, %33 : vector<2x128xf32>
    %42 = arith.addf %40, %41 : vector<2x128xf32>
    %43 = math.tanh %42 : vector<2x128xf32>
    %44 = arith.mulf %39, %43 : vector<2x128xf32>
    %45 = vector.extract_strided_slice %11 {offsets = [0, 1, 0], sizes = [2, 1, 512], strides = [1, 1, 1]} : vector<2x8x512xf32> to vector<2x1x512xf32>
    %46 = vector.shape_cast %45 : vector<2x1x512xf32> to vector<2x512xf32>
    %47 = arith.truncf %44 : vector<2x128xf32> to vector<2x128xbf16>
    %cst_16 = arith.constant dense<0.000000e+00> : vector<2x512xf32>
    %48 = tpu.matmul %47, %12, %cst_16 {dimension_numbers = #tpu.dot_dimension_numbers<[1], [0], [0], [1], [0, 0, 1, 1], [], []>} : vector<2x128xbf16>, vector<128x512xbf16>, vector<2x512xf32> -> vector<2x512xf32>
    %49 = arith.addf %46, %48 : vector<2x512xf32>
    %50 = vector.extract_strided_slice %49 {offsets = [0, 0], sizes = [2, 128], strides = [1, 1]} : vector<2x512xf32> to vector<2x128xf32>
    %51 = arith.negf %50 : vector<2x128xf32>
    %52 = math.exp %51 : vector<2x128xf32>
    %cst_17 = arith.constant 1.000000e+00 : f32
    %53 = vector.broadcast %cst_17 : f32 to vector<2x128xf32>
    %54 = arith.addf %53, %52 : vector<2x128xf32>
    %55 = arith.divf %53, %54 : vector<2x128xf32>
    %56 = vector.extract_strided_slice %49 {offsets = [0, 128], sizes = [2, 128], strides = [1, 1]} : vector<2x512xf32> to vector<2x128xf32>
    %57 = arith.negf %56 : vector<2x128xf32>
    %58 = math.exp %57 : vector<2x128xf32>
    %cst_18 = arith.constant 1.000000e+00 : f32
    %59 = vector.broadcast %cst_18 : f32 to vector<2x128xf32>
    %60 = arith.addf %59, %58 : vector<2x128xf32>
    %61 = arith.divf %59, %60 : vector<2x128xf32>
    %62 = vector.extract_strided_slice %49 {offsets = [0, 256], sizes = [2, 128], strides = [1, 1]} : vector<2x512xf32> to vector<2x128xf32>
    %63 = math.tanh %62 : vector<2x128xf32>
    %64 = vector.extract_strided_slice %49 {offsets = [0, 384], sizes = [2, 128], strides = [1, 1]} : vector<2x512xf32> to vector<2x128xf32>
    %65 = arith.negf %64 : vector<2x128xf32>
    %66 = math.exp %65 : vector<2x128xf32>
    %cst_19 = arith.constant 1.000000e+00 : f32
    %67 = vector.broadcast %cst_19 : f32 to vector<2x128xf32>
    %68 = arith.addf %67, %66 : vector<2x128xf32>
    %69 = arith.divf %67, %68 : vector<2x128xf32>
    %70 = arith.mulf %61, %42 : vector<2x128xf32>
    %71 = arith.mulf %55, %63 : vector<2x128xf32>
    %72 = arith.addf %70, %71 : vector<2x128xf32>
    %73 = math.tanh %72 : vector<2x128xf32>
    %74 = arith.mulf %69, %73 : vector<2x128xf32>
    %75 = vector.extract_strided_slice %11 {offsets = [0, 2, 0], sizes = [2, 1, 512], strides = [1, 1, 1]} : vector<2x8x512xf32> to vector<2x1x512xf32>
    %76 = vector.shape_cast %75 : vector<2x1x512xf32> to vector<2x512xf32>
    %77 = arith.truncf %74 : vector<2x128xf32> to vector<2x128xbf16>
    %cst_20 = arith.constant dense<0.000000e+00> : vector<2x512xf32>
    %78 = tpu.matmul %77, %12, %cst_20 {dimension_numbers = #tpu.dot_dimension_numbers<[1], [0], [0], [1], [0, 0, 1, 1], [], []>} : vector<2x128xbf16>, vector<128x512xbf16>, vector<2x512xf32> -> vector<2x512xf32>
    %79 = arith.addf %76, %78 : vector<2x512xf32>
    %80 = vector.extract_strided_slice %79 {offsets = [0, 0], sizes = [2, 128], strides = [1, 1]} : vector<2x512xf32> to vector<2x128xf32>
    %81 = arith.negf %80 : vector<2x128xf32>
    %82 = math.exp %81 : vector<2x128xf32>
    %cst_21 = arith.constant 1.000000e+00 : f32
    %83 = vector.broadcast %cst_21 : f32 to vector<2x128xf32>
    %84 = arith.addf %83, %82 : vector<2x128xf32>
    %85 = arith.divf %83, %84 : vector<2x128xf32>
    %86 = vector.extract_strided_slice %79 {offsets = [0, 128], sizes = [2, 128], strides = [1, 1]} : vector<2x512xf32> to vector<2x128xf32>
    %87 = arith.negf %86 : vector<2x128xf32>
    %88 = math.exp %87 : vector<2x128xf32>
    %cst_22 = arith.constant 1.000000e+00 : f32
    %89 = vector.broadcast %cst_22 : f32 to vector<2x128xf32>
    %90 = arith.addf %89, %88 : vector<2x128xf32>
    %91 = arith.divf %89, %90 : vector<2x128xf32>
    %92 = vector.extract_strided_slice %79 {offsets = [0, 256], sizes = [2, 128], strides = [1, 1]} : vector<2x512xf32> to vector<2x128xf32>
    %93 = math.tanh %92 : vector<2x128xf32>
    %94 = vector.extract_strided_slice %79 {offsets = [0, 384], sizes = [2, 128], strides = [1, 1]} : vector<2x512xf32> to vector<2x128xf32>
    %95 = arith.negf %94 : vector<2x128xf32>
    %96 = math.exp %95 : vector<2x128xf32>
    %cst_23 = arith.constant 1.000000e+00 : f32
    %97 = vector.broadcast %cst_23 : f32 to vector<2x128xf32>
    %98 = arith.addf %97, %96 : vector<2x128xf32>
    %99 = arith.divf %97, %98 : vector<2x128xf32>
    %100 = arith.mulf %91, %72 : vector<2x128xf32>
    %101 = arith.mulf %85, %93 : vector<2x128xf32>
    %102 = arith.addf %100, %101 : vector<2x128xf32>
    %103 = math.tanh %102 : vector<2x128xf32>
    %104 = arith.mulf %99, %103 : vector<2x128xf32>
    %105 = vector.extract_strided_slice %11 {offsets = [0, 3, 0], sizes = [2, 1, 512], strides = [1, 1, 1]} : vector<2x8x512xf32> to vector<2x1x512xf32>
    %106 = vector.shape_cast %105 : vector<2x1x512xf32> to vector<2x512xf32>
    %107 = arith.truncf %104 : vector<2x128xf32> to vector<2x128xbf16>
    %cst_24 = arith.constant dense<0.000000e+00> : vector<2x512xf32>
    %108 = tpu.matmul %107, %12, %cst_24 {dimension_numbers = #tpu.dot_dimension_numbers<[1], [0], [0], [1], [0, 0, 1, 1], [], []>} : vector<2x128xbf16>, vector<128x512xbf16>, vector<2x512xf32> -> vector<2x512xf32>
    %109 = arith.addf %106, %108 : vector<2x512xf32>
    %110 = vector.extract_strided_slice %109 {offsets = [0, 0], sizes = [2, 128], strides = [1, 1]} : vector<2x512xf32> to vector<2x128xf32>
    %111 = arith.negf %110 : vector<2x128xf32>
    %112 = math.exp %111 : vector<2x128xf32>
    %cst_25 = arith.constant 1.000000e+00 : f32
    %113 = vector.broadcast %cst_25 : f32 to vector<2x128xf32>
    %114 = arith.addf %113, %112 : vector<2x128xf32>
    %115 = arith.divf %113, %114 : vector<2x128xf32>
    %116 = vector.extract_strided_slice %109 {offsets = [0, 128], sizes = [2, 128], strides = [1, 1]} : vector<2x512xf32> to vector<2x128xf32>
    %117 = arith.negf %116 : vector<2x128xf32>
    %118 = math.exp %117 : vector<2x128xf32>
    %cst_26 = arith.constant 1.000000e+00 : f32
    %119 = vector.broadcast %cst_26 : f32 to vector<2x128xf32>
    %120 = arith.addf %119, %118 : vector<2x128xf32>
    %121 = arith.divf %119, %120 : vector<2x128xf32>
    %122 = vector.extract_strided_slice %109 {offsets = [0, 256], sizes = [2, 128], strides = [1, 1]} : vector<2x512xf32> to vector<2x128xf32>
    %123 = math.tanh %122 : vector<2x128xf32>
    %124 = vector.extract_strided_slice %109 {offsets = [0, 384], sizes = [2, 128], strides = [1, 1]} : vector<2x512xf32> to vector<2x128xf32>
    %125 = arith.negf %124 : vector<2x128xf32>
    %126 = math.exp %125 : vector<2x128xf32>
    %cst_27 = arith.constant 1.000000e+00 : f32
    %127 = vector.broadcast %cst_27 : f32 to vector<2x128xf32>
    %128 = arith.addf %127, %126 : vector<2x128xf32>
    %129 = arith.divf %127, %128 : vector<2x128xf32>
    %130 = arith.mulf %121, %102 : vector<2x128xf32>
    %131 = arith.mulf %115, %123 : vector<2x128xf32>
    %132 = arith.addf %130, %131 : vector<2x128xf32>
    %133 = math.tanh %132 : vector<2x128xf32>
    %134 = arith.mulf %129, %133 : vector<2x128xf32>
    %135 = vector.extract_strided_slice %11 {offsets = [0, 4, 0], sizes = [2, 1, 512], strides = [1, 1, 1]} : vector<2x8x512xf32> to vector<2x1x512xf32>
    %136 = vector.shape_cast %135 : vector<2x1x512xf32> to vector<2x512xf32>
    %137 = arith.truncf %134 : vector<2x128xf32> to vector<2x128xbf16>
    %cst_28 = arith.constant dense<0.000000e+00> : vector<2x512xf32>
    %138 = tpu.matmul %137, %12, %cst_28 {dimension_numbers = #tpu.dot_dimension_numbers<[1], [0], [0], [1], [0, 0, 1, 1], [], []>} : vector<2x128xbf16>, vector<128x512xbf16>, vector<2x512xf32> -> vector<2x512xf32>
    %139 = arith.addf %136, %138 : vector<2x512xf32>
    %140 = vector.extract_strided_slice %139 {offsets = [0, 0], sizes = [2, 128], strides = [1, 1]} : vector<2x512xf32> to vector<2x128xf32>
    %141 = arith.negf %140 : vector<2x128xf32>
    %142 = math.exp %141 : vector<2x128xf32>
    %cst_29 = arith.constant 1.000000e+00 : f32
    %143 = vector.broadcast %cst_29 : f32 to vector<2x128xf32>
    %144 = arith.addf %143, %142 : vector<2x128xf32>
    %145 = arith.divf %143, %144 : vector<2x128xf32>
    %146 = vector.extract_strided_slice %139 {offsets = [0, 128], sizes = [2, 128], strides = [1, 1]} : vector<2x512xf32> to vector<2x128xf32>
    %147 = arith.negf %146 : vector<2x128xf32>
    %148 = math.exp %147 : vector<2x128xf32>
    %cst_30 = arith.constant 1.000000e+00 : f32
    %149 = vector.broadcast %cst_30 : f32 to vector<2x128xf32>
    %150 = arith.addf %149, %148 : vector<2x128xf32>
    %151 = arith.divf %149, %150 : vector<2x128xf32>
    %152 = vector.extract_strided_slice %139 {offsets = [0, 256], sizes = [2, 128], strides = [1, 1]} : vector<2x512xf32> to vector<2x128xf32>
    %153 = math.tanh %152 : vector<2x128xf32>
    %154 = vector.extract_strided_slice %139 {offsets = [0, 384], sizes = [2, 128], strides = [1, 1]} : vector<2x512xf32> to vector<2x128xf32>
    %155 = arith.negf %154 : vector<2x128xf32>
    %156 = math.exp %155 : vector<2x128xf32>
    %cst_31 = arith.constant 1.000000e+00 : f32
    %157 = vector.broadcast %cst_31 : f32 to vector<2x128xf32>
    %158 = arith.addf %157, %156 : vector<2x128xf32>
    %159 = arith.divf %157, %158 : vector<2x128xf32>
    %160 = arith.mulf %151, %132 : vector<2x128xf32>
    %161 = arith.mulf %145, %153 : vector<2x128xf32>
    %162 = arith.addf %160, %161 : vector<2x128xf32>
    %163 = math.tanh %162 : vector<2x128xf32>
    %164 = arith.mulf %159, %163 : vector<2x128xf32>
    %165 = vector.extract_strided_slice %11 {offsets = [0, 5, 0], sizes = [2, 1, 512], strides = [1, 1, 1]} : vector<2x8x512xf32> to vector<2x1x512xf32>
    %166 = vector.shape_cast %165 : vector<2x1x512xf32> to vector<2x512xf32>
    %167 = arith.truncf %164 : vector<2x128xf32> to vector<2x128xbf16>
    %cst_32 = arith.constant dense<0.000000e+00> : vector<2x512xf32>
    %168 = tpu.matmul %167, %12, %cst_32 {dimension_numbers = #tpu.dot_dimension_numbers<[1], [0], [0], [1], [0, 0, 1, 1], [], []>} : vector<2x128xbf16>, vector<128x512xbf16>, vector<2x512xf32> -> vector<2x512xf32>
    %169 = arith.addf %166, %168 : vector<2x512xf32>
    %170 = vector.extract_strided_slice %169 {offsets = [0, 0], sizes = [2, 128], strides = [1, 1]} : vector<2x512xf32> to vector<2x128xf32>
    %171 = arith.negf %170 : vector<2x128xf32>
    %172 = math.exp %171 : vector<2x128xf32>
    %cst_33 = arith.constant 1.000000e+00 : f32
    %173 = vector.broadcast %cst_33 : f32 to vector<2x128xf32>
    %174 = arith.addf %173, %172 : vector<2x128xf32>
    %175 = arith.divf %173, %174 : vector<2x128xf32>
    %176 = vector.extract_strided_slice %169 {offsets = [0, 128], sizes = [2, 128], strides = [1, 1]} : vector<2x512xf32> to vector<2x128xf32>
    %177 = arith.negf %176 : vector<2x128xf32>
    %178 = math.exp %177 : vector<2x128xf32>
    %cst_34 = arith.constant 1.000000e+00 : f32
    %179 = vector.broadcast %cst_34 : f32 to vector<2x128xf32>
    %180 = arith.addf %179, %178 : vector<2x128xf32>
    %181 = arith.divf %179, %180 : vector<2x128xf32>
    %182 = vector.extract_strided_slice %169 {offsets = [0, 256], sizes = [2, 128], strides = [1, 1]} : vector<2x512xf32> to vector<2x128xf32>
    %183 = math.tanh %182 : vector<2x128xf32>
    %184 = vector.extract_strided_slice %169 {offsets = [0, 384], sizes = [2, 128], strides = [1, 1]} : vector<2x512xf32> to vector<2x128xf32>
    %185 = arith.negf %184 : vector<2x128xf32>
    %186 = math.exp %185 : vector<2x128xf32>
    %cst_35 = arith.constant 1.000000e+00 : f32
    %187 = vector.broadcast %cst_35 : f32 to vector<2x128xf32>
    %188 = arith.addf %187, %186 : vector<2x128xf32>
    %189 = arith.divf %187, %188 : vector<2x128xf32>
    %190 = arith.mulf %181, %162 : vector<2x128xf32>
    %191 = arith.mulf %175, %183 : vector<2x128xf32>
    %192 = arith.addf %190, %191 : vector<2x128xf32>
    %193 = math.tanh %192 : vector<2x128xf32>
    %194 = arith.mulf %189, %193 : vector<2x128xf32>
    %195 = vector.extract_strided_slice %11 {offsets = [0, 6, 0], sizes = [2, 1, 512], strides = [1, 1, 1]} : vector<2x8x512xf32> to vector<2x1x512xf32>
    %196 = vector.shape_cast %195 : vector<2x1x512xf32> to vector<2x512xf32>
    %197 = arith.truncf %194 : vector<2x128xf32> to vector<2x128xbf16>
    %cst_36 = arith.constant dense<0.000000e+00> : vector<2x512xf32>
    %198 = tpu.matmul %197, %12, %cst_36 {dimension_numbers = #tpu.dot_dimension_numbers<[1], [0], [0], [1], [0, 0, 1, 1], [], []>} : vector<2x128xbf16>, vector<128x512xbf16>, vector<2x512xf32> -> vector<2x512xf32>
    %199 = arith.addf %196, %198 : vector<2x512xf32>
    %200 = vector.extract_strided_slice %199 {offsets = [0, 0], sizes = [2, 128], strides = [1, 1]} : vector<2x512xf32> to vector<2x128xf32>
    %201 = arith.negf %200 : vector<2x128xf32>
    %202 = math.exp %201 : vector<2x128xf32>
    %cst_37 = arith.constant 1.000000e+00 : f32
    %203 = vector.broadcast %cst_37 : f32 to vector<2x128xf32>
    %204 = arith.addf %203, %202 : vector<2x128xf32>
    %205 = arith.divf %203, %204 : vector<2x128xf32>
    %206 = vector.extract_strided_slice %199 {offsets = [0, 128], sizes = [2, 128], strides = [1, 1]} : vector<2x512xf32> to vector<2x128xf32>
    %207 = arith.negf %206 : vector<2x128xf32>
    %208 = math.exp %207 : vector<2x128xf32>
    %cst_38 = arith.constant 1.000000e+00 : f32
    %209 = vector.broadcast %cst_38 : f32 to vector<2x128xf32>
    %210 = arith.addf %209, %208 : vector<2x128xf32>
    %211 = arith.divf %209, %210 : vector<2x128xf32>
    %212 = vector.extract_strided_slice %199 {offsets = [0, 256], sizes = [2, 128], strides = [1, 1]} : vector<2x512xf32> to vector<2x128xf32>
    %213 = math.tanh %212 : vector<2x128xf32>
    %214 = vector.extract_strided_slice %199 {offsets = [0, 384], sizes = [2, 128], strides = [1, 1]} : vector<2x512xf32> to vector<2x128xf32>
    %215 = arith.negf %214 : vector<2x128xf32>
    %216 = math.exp %215 : vector<2x128xf32>
    %cst_39 = arith.constant 1.000000e+00 : f32
    %217 = vector.broadcast %cst_39 : f32 to vector<2x128xf32>
    %218 = arith.addf %217, %216 : vector<2x128xf32>
    %219 = arith.divf %217, %218 : vector<2x128xf32>
    %220 = arith.mulf %211, %192 : vector<2x128xf32>
    %221 = arith.mulf %205, %213 : vector<2x128xf32>
    %222 = arith.addf %220, %221 : vector<2x128xf32>
    %223 = math.tanh %222 : vector<2x128xf32>
    %224 = arith.mulf %219, %223 : vector<2x128xf32>
    %225 = vector.extract_strided_slice %11 {offsets = [0, 7, 0], sizes = [2, 1, 512], strides = [1, 1, 1]} : vector<2x8x512xf32> to vector<2x1x512xf32>
    %226 = vector.shape_cast %225 : vector<2x1x512xf32> to vector<2x512xf32>
    %227 = arith.truncf %224 : vector<2x128xf32> to vector<2x128xbf16>
    %cst_40 = arith.constant dense<0.000000e+00> : vector<2x512xf32>
    %228 = tpu.matmul %227, %12, %cst_40 {dimension_numbers = #tpu.dot_dimension_numbers<[1], [0], [0], [1], [0, 0, 1, 1], [], []>} : vector<2x128xbf16>, vector<128x512xbf16>, vector<2x512xf32> -> vector<2x512xf32>
    %229 = arith.addf %226, %228 : vector<2x512xf32>
    %230 = vector.extract_strided_slice %229 {offsets = [0, 0], sizes = [2, 128], strides = [1, 1]} : vector<2x512xf32> to vector<2x128xf32>
    %231 = arith.negf %230 : vector<2x128xf32>
    %232 = math.exp %231 : vector<2x128xf32>
    %cst_41 = arith.constant 1.000000e+00 : f32
    %233 = vector.broadcast %cst_41 : f32 to vector<2x128xf32>
    %234 = arith.addf %233, %232 : vector<2x128xf32>
    %235 = arith.divf %233, %234 : vector<2x128xf32>
    %236 = vector.extract_strided_slice %229 {offsets = [0, 128], sizes = [2, 128], strides = [1, 1]} : vector<2x512xf32> to vector<2x128xf32>
    %237 = arith.negf %236 : vector<2x128xf32>
    %238 = math.exp %237 : vector<2x128xf32>
    %cst_42 = arith.constant 1.000000e+00 : f32
    %239 = vector.broadcast %cst_42 : f32 to vector<2x128xf32>
    %240 = arith.addf %239, %238 : vector<2x128xf32>
    %241 = arith.divf %239, %240 : vector<2x128xf32>
    %242 = vector.extract_strided_slice %229 {offsets = [0, 256], sizes = [2, 128], strides = [1, 1]} : vector<2x512xf32> to vector<2x128xf32>
    %243 = math.tanh %242 : vector<2x128xf32>
    %244 = vector.extract_strided_slice %229 {offsets = [0, 384], sizes = [2, 128], strides = [1, 1]} : vector<2x512xf32> to vector<2x128xf32>
    %245 = arith.negf %244 : vector<2x128xf32>
    %246 = math.exp %245 : vector<2x128xf32>
    %cst_43 = arith.constant 1.000000e+00 : f32
    %247 = vector.broadcast %cst_43 : f32 to vector<2x128xf32>
    %248 = arith.addf %247, %246 : vector<2x128xf32>
    %249 = arith.divf %247, %248 : vector<2x128xf32>
    %250 = arith.mulf %241, %222 : vector<2x128xf32>
    %251 = arith.mulf %235, %243 : vector<2x128xf32>
    %252 = arith.addf %250, %251 : vector<2x128xf32>
    %253 = math.tanh %252 : vector<2x128xf32>
    %254 = arith.mulf %249, %253 : vector<2x128xf32>
    %255 = vector.shape_cast %44 : vector<2x128xf32> to vector<2x1x128xf32>
    %256 = vector.shape_cast %74 : vector<2x128xf32> to vector<2x1x128xf32>
    %257 = vector.shape_cast %104 : vector<2x128xf32> to vector<2x1x128xf32>
    %258 = vector.shape_cast %134 : vector<2x128xf32> to vector<2x1x128xf32>
    %259 = vector.shape_cast %164 : vector<2x128xf32> to vector<2x1x128xf32>
    %260 = vector.shape_cast %194 : vector<2x128xf32> to vector<2x1x128xf32>
    %261 = vector.shape_cast %224 : vector<2x128xf32> to vector<2x1x128xf32>
    %262 = vector.shape_cast %254 : vector<2x128xf32> to vector<2x1x128xf32>
    %263 = tpu.concatenate %255, %256, %257, %258, %259, %260, %261, %262 in 1 : vector<2x1x128xf32>, vector<2x1x128xf32>, vector<2x1x128xf32>, vector<2x1x128xf32>, vector<2x1x128xf32>, vector<2x1x128xf32>, vector<2x1x128xf32>, vector<2x1x128xf32> -> vector<2x8x128xf32>
    %264 = vector.shape_cast %263 : vector<2x8x128xf32> to vector<16x128xf32>
    %265 = arith.truncf %264 : vector<16x128xf32> to vector<16x128xbf16>
    %c0_44 = arith.constant 0 : index
    %c0_45 = arith.constant 0 : index
    %266 = vector.load %arg13[%c0_44, %c0_45] : memref<128x256xbf16, #tpu.memory_space<vmem>>, vector<128x256xbf16>
    %cst_46 = arith.constant dense<0.000000e+00> : vector<16x256xf32>
    %267 = tpu.matmul %265, %266, %cst_46 {dimension_numbers = #tpu.dot_dimension_numbers<[1], [0], [0], [1], [0, 0, 1, 1], [], []>} : vector<16x128xbf16>, vector<128x256xbf16>, vector<16x256xf32> -> vector<16x256xf32>
    %c0_47 = arith.constant 0 : index
    %c0_48 = arith.constant 0 : index
    %268 = vector.load %arg14[%c0_47, %c0_48] : memref<1x256xf32, #tpu.memory_space<vmem>>, vector<1x256xf32>
    %269 = vector.broadcast %268 : vector<1x256xf32> to vector<16x256xf32>
    %270 = arith.addf %267, %269 : vector<16x256xf32>
    %271 = vector.extract_strided_slice %270 {offsets = [0, 0], sizes = [16, 128], strides = [1, 1]} : vector<16x256xf32> to vector<16x128xf32>
    %272 = vector.shape_cast %271 : vector<16x128xf32> to vector<2x8x128xf32>
    %273 = vector.extract_strided_slice %270 {offsets = [0, 128], sizes = [16, 128], strides = [1, 1]} : vector<16x256xf32> to vector<16x128xf32>
    %274 = vector.shape_cast %273 : vector<16x128xf32> to vector<2x8x128xf32>
    %c0_49 = arith.constant 0 : index
    %c0_50 = arith.constant 0 : index
    %275 = vector.load %arg8[%c0_49, %c0_50] : memref<1x512xf32, #tpu.memory_space<vmem>>, vector<1x512xf32>
    %276 = vector.shape_cast %275 : vector<1x512xf32> to vector<1x512xf32>
    %277 = vector.broadcast %276 : vector<1x512xf32> to vector<2x512xf32>
    %c0_51 = arith.constant 0 : index
    %c0_52 = arith.constant 0 : index
    %278 = vector.load %arg10[%c0_51, %c0_52] : memref<1x128xf32, #tpu.memory_space<vmem>>, vector<1x128xf32>
    %279 = vector.shape_cast %278 : vector<1x128xf32> to vector<1x128xf32>
    %280 = vector.broadcast %279 : vector<1x128xf32> to vector<2x128xf32>
    %c0_53 = arith.constant 0 : index
    %c0_54 = arith.constant 0 : index
    %281 = vector.load %arg12[%c0_53, %c0_54] : memref<1x128xf32, #tpu.memory_space<vmem>>, vector<1x128xf32>
    %282 = vector.shape_cast %281 : vector<1x128xf32> to vector<1x128xf32>
    %283 = vector.broadcast %282 : vector<1x128xf32> to vector<2x128xf32>
    %c0_55 = arith.constant 0 : index
    %c0_56 = arith.constant 0 : index
    %284 = vector.load %arg15[%c0_55, %c0_56] : memref<1x128xf32, #tpu.memory_space<vmem>>, vector<1x128xf32>
    %285 = vector.shape_cast %284 : vector<1x128xf32> to vector<1x1x128xf32>
    %286 = vector.shape_cast %285 : vector<1x1x128xf32> to vector<1x1x128xf32>
    %287 = vector.broadcast %286 : vector<1x1x128xf32> to vector<2x8x128xf32>
    %c0_57 = arith.constant 0 : index
    %c0_58 = arith.constant 0 : index
    %288 = vector.load %arg16[%c0_57, %c0_58] : memref<1x128xf32, #tpu.memory_space<vmem>>, vector<1x128xf32>
    %289 = vector.shape_cast %288 : vector<1x128xf32> to vector<1x1x128xf32>
    %290 = vector.shape_cast %289 : vector<1x1x128xf32> to vector<1x1x128xf32>
    %291 = vector.broadcast %290 : vector<1x1x128xf32> to vector<2x8x128xf32>
    %c0_59 = arith.constant 0 : index
    %c0_60 = arith.constant 0 : index
    %292 = vector.load %arg17[%c0_59, %c0_60] : memref<1x128xf32, #tpu.memory_space<vmem>>, vector<1x128xf32>
    %293 = vector.shape_cast %292 : vector<1x128xf32> to vector<1x128xf32>
    %294 = vector.broadcast %293 : vector<1x128xf32> to vector<2x128xf32>
    %295 = tpu.iota {dimensions = array<i32: 1>} : vector<2x8xi32>
    %cst_61 = arith.constant 0.000000e+00 : f32
    %296 = vector.broadcast %cst_61 : f32 to vector<2x8xf32>
    %cst_62 = arith.constant 0.000000e+00 : f32
    %297 = vector.broadcast %cst_62 : f32 to vector<2x8xf32>
    %c0_i32 = arith.constant 0 : i32
    %298 = vector.broadcast %c0_i32 : i32 to vector<2x8xi32>
    %cst_63 = arith.constant -1.000000e+05 : f32
    %c0_i32_64 = arith.constant 0 : i32
    %c8_i32 = arith.constant 8 : i32
    %299 = arith.addi %c0_i32_64, %c8_i32 : i32
    %c1_i32 = arith.constant 1 : i32
    %300:6 = scf.for %arg20 = %c0_i32_64 to %299 step %c1_i32 iter_args(%arg21 = %254, %arg22 = %252, %arg23 = %294, %arg24 = %296, %arg25 = %297, %arg26 = %298) -> (vector<2x128xf32>, vector<2x128xf32>, vector<2x128xf32>, vector<2x8xf32>, vector<2x8xf32>, vector<2x8xi32>)  : i32 {
      %303 = tpu.concatenate %arg23, %arg21 in 1 : vector<2x128xf32>, vector<2x128xf32> -> vector<2x256xf32>
      %304 = arith.truncf %303 : vector<2x256xf32> to vector<2x256xbf16>
      %c0_70 = arith.constant 0 : index
      %c0_71 = arith.constant 0 : index
      %305 = vector.load %arg7[%c0_70, %c0_71] : memref<256x512xbf16, #tpu.memory_space<vmem>>, vector<256x512xbf16>
      %cst_72 = arith.constant dense<0.000000e+00> : vector<2x512xf32>
      %306 = tpu.matmul %304, %305, %cst_72 {dimension_numbers = #tpu.dot_dimension_numbers<[1], [0], [0], [1], [0, 0, 1, 1], [], []>} : vector<2x256xbf16>, vector<256x512xbf16>, vector<2x512xf32> -> vector<2x512xf32>
      %307 = arith.addf %306, %277 : vector<2x512xf32>
      %308 = vector.extract_strided_slice %307 {offsets = [0, 0], sizes = [2, 128], strides = [1, 1]} : vector<2x512xf32> to vector<2x128xf32>
      %309 = arith.negf %308 : vector<2x128xf32>
      %310 = math.exp %309 : vector<2x128xf32>
      %cst_73 = arith.constant 1.000000e+00 : f32
      %311 = vector.broadcast %cst_73 : f32 to vector<2x128xf32>
      %312 = arith.addf %311, %310 : vector<2x128xf32>
      %313 = arith.divf %311, %312 : vector<2x128xf32>
      %314 = vector.extract_strided_slice %307 {offsets = [0, 128], sizes = [2, 128], strides = [1, 1]} : vector<2x512xf32> to vector<2x128xf32>
      %315 = arith.negf %314 : vector<2x128xf32>
      %316 = math.exp %315 : vector<2x128xf32>
      %cst_74 = arith.constant 1.000000e+00 : f32
      %317 = vector.broadcast %cst_74 : f32 to vector<2x128xf32>
      %318 = arith.addf %317, %316 : vector<2x128xf32>
      %319 = arith.divf %317, %318 : vector<2x128xf32>
      %320 = vector.extract_strided_slice %307 {offsets = [0, 256], sizes = [2, 128], strides = [1, 1]} : vector<2x512xf32> to vector<2x128xf32>
      %321 = math.tanh %320 : vector<2x128xf32>
      %322 = vector.extract_strided_slice %307 {offsets = [0, 384], sizes = [2, 128], strides = [1, 1]} : vector<2x512xf32> to vector<2x128xf32>
      %323 = arith.negf %322 : vector<2x128xf32>
      %324 = math.exp %323 : vector<2x128xf32>
      %cst_75 = arith.constant 1.000000e+00 : f32
      %325 = vector.broadcast %cst_75 : f32 to vector<2x128xf32>
      %326 = arith.addf %325, %324 : vector<2x128xf32>
      %327 = arith.divf %325, %326 : vector<2x128xf32>
      %328 = arith.mulf %319, %arg22 : vector<2x128xf32>
      %329 = arith.mulf %313, %321 : vector<2x128xf32>
      %330 = arith.addf %328, %329 : vector<2x128xf32>
      %331 = math.tanh %330 : vector<2x128xf32>
      %332 = arith.mulf %327, %331 : vector<2x128xf32>
      %333 = arith.truncf %332 : vector<2x128xf32> to vector<2x128xbf16>
      %c0_76 = arith.constant 0 : index
      %c0_77 = arith.constant 0 : index
      %334 = vector.load %arg9[%c0_76, %c0_77] : memref<128x128xbf16, #tpu.memory_space<vmem>>, vector<128x128xbf16>
      %cst_78 = arith.constant dense<0.000000e+00> : vector<2x128xf32>
      %335 = tpu.matmul %333, %334, %cst_78 {dimension_numbers = #tpu.dot_dimension_numbers<[1], [0], [0], [1], [0, 0, 1, 1], [], []>} : vector<2x128xbf16>, vector<128x128xbf16>, vector<2x128xf32> -> vector<2x128xf32>
      %336 = arith.addf %335, %280 : vector<2x128xf32>
      %337 = vector.shape_cast %336 : vector<2x128xf32> to vector<2x1x128xf32>
      %338 = vector.broadcast %337 : vector<2x1x128xf32> to vector<2x8x128xf32>
      %339 = arith.addf %338, %272 : vector<2x8x128xf32>
      %340 = math.tanh %339 : vector<2x8x128xf32>
      %341 = arith.mulf %340, %287 : vector<2x8x128xf32>
      %cst_79 = arith.constant dense<0.000000e+00> : vector<2x8xf32>
      %342 = vector.multi_reduction <add>, %341, %cst_79 [2] : vector<2x8x128xf32> to vector<2x8xf32>
      %cst_80 = arith.constant 0.000000e+00 : f32
      %343 = vector.broadcast %cst_80 : f32 to vector<2x8xf32>
      %344 = arith.cmpf ogt, %arg24, %343 : vector<2x8xf32>
      %345 = vector.broadcast %cst_63 : f32 to vector<2x8xf32>
      %346 = arith.select %344, %345, %342 : vector<2x8xi1>, vector<2x8xf32>
      %cst_81 = arith.constant dense<0xFF800000> : vector<2xf32>
      %347 = vector.multi_reduction <maximumf>, %346, %cst_81 [1] : vector<2x8xf32> to vector<2xf32>
      %cst_82 = arith.constant 0xFF800000 : f32
      %348 = vector.broadcast %cst_82 : f32 to vector<2xf32>
      %349 = arith.maximumf %348, %347 : vector<2xf32>
      %350 = vector.shape_cast %349 : vector<2xf32> to vector<2x1xf32>
      %351 = vector.broadcast %350 : vector<2x1xf32> to vector<2x8xf32>
      %352 = arith.subf %346, %351 : vector<2x8xf32>
      %353 = math.exp %352 : vector<2x8xf32>
      %cst_83 = arith.constant dense<0.000000e+00> : vector<2xf32>
      %354 = vector.multi_reduction <add>, %353, %cst_83 [1] : vector<2x8xf32> to vector<2xf32>
      %355 = vector.shape_cast %354 : vector<2xf32> to vector<2x1xf32>
      %356 = vector.broadcast %355 : vector<2x1xf32> to vector<2x8xf32>
      %357 = arith.divf %353, %356 : vector<2x8xf32>
      %358 = vector.shape_cast %357 : vector<2x8xf32> to vector<2x8x1xf32>
      %359 = vector.broadcast %358 : vector<2x8x1xf32> to vector<2x8x128xf32>
      %360 = arith.mulf %359, %272 : vector<2x8x128xf32>
      %cst_84 = arith.constant dense<0.000000e+00> : vector<2x128xf32>
      %361 = vector.multi_reduction <add>, %360, %cst_84 [1] : vector<2x8x128xf32> to vector<2x128xf32>
      %362 = arith.truncf %361 : vector<2x128xf32> to vector<2x128xbf16>
      %c0_85 = arith.constant 0 : index
      %c0_86 = arith.constant 0 : index
      %363 = vector.load %arg11[%c0_85, %c0_86] : memref<128x128xbf16, #tpu.memory_space<vmem>>, vector<128x128xbf16>
      %cst_87 = arith.constant dense<0.000000e+00> : vector<2x128xf32>
      %364 = tpu.matmul %362, %363, %cst_87 {dimension_numbers = #tpu.dot_dimension_numbers<[1], [0], [0], [1], [0, 0, 1, 1], [], []>} : vector<2x128xbf16>, vector<128x128xbf16>, vector<2x128xf32> -> vector<2x128xf32>
      %365 = arith.addf %364, %283 : vector<2x128xf32>
      %366 = vector.shape_cast %365 : vector<2x128xf32> to vector<2x1x128xf32>
      %367 = vector.broadcast %366 : vector<2x1x128xf32> to vector<2x8x128xf32>
      %368 = arith.addf %367, %274 : vector<2x8x128xf32>
      %369 = math.tanh %368 : vector<2x8x128xf32>
      %370 = arith.mulf %369, %291 : vector<2x8x128xf32>
      %cst_88 = arith.constant dense<0.000000e+00> : vector<2x8xf32>
      %371 = vector.multi_reduction <add>, %370, %cst_88 [2] : vector<2x8x128xf32> to vector<2x8xf32>
      %372 = math.tanh %371 : vector<2x8xf32>
      %cst_89 = arith.constant 1.000000e+01 : f32
      %373 = vector.broadcast %cst_89 : f32 to vector<2x8xf32>
      %374 = arith.mulf %373, %372 : vector<2x8xf32>
      %cst_90 = arith.constant 0.000000e+00 : f32
      %375 = vector.broadcast %cst_90 : f32 to vector<2x8xf32>
      %376 = arith.cmpf ogt, %arg24, %375 : vector<2x8xf32>
      %377 = vector.broadcast %cst_63 : f32 to vector<2x8xf32>
      %378 = arith.select %376, %377, %374 : vector<2x8xi1>, vector<2x8xf32>
      %cst_91 = arith.constant dense<0xFF800000> : vector<2xf32>
      %379 = vector.multi_reduction <maximumf>, %378, %cst_91 [1] : vector<2x8xf32> to vector<2xf32>
      %380 = vector.shape_cast %379 : vector<2xf32> to vector<2x1xf32>
      %381 = vector.broadcast %380 : vector<2x1xf32> to vector<2x8xf32>
      %382 = arith.subf %378, %381 : vector<2x8xf32>
      %383 = math.exp %382 : vector<2x8xf32>
      %cst_92 = arith.constant dense<0.000000e+00> : vector<2xf32>
      %384 = vector.multi_reduction <add>, %383, %cst_92 [1] : vector<2x8xf32> to vector<2xf32>
      %385 = vector.shape_cast %384 : vector<2xf32> to vector<2x1xf32>
      %386 = math.log %385 : vector<2x1xf32>
      %387 = arith.addf %380, %386 : vector<2x1xf32>
      %388 = vector.broadcast %387 : vector<2x1xf32> to vector<2x8xf32>
      %389 = arith.subf %378, %388 : vector<2x8xf32>
      %cst_93 = arith.constant 0.000000e+00 : f32
      %390 = vector.broadcast %cst_93 : f32 to vector<2x8xf32>
      %391 = arith.cmpf ogt, %arg24, %390 : vector<2x8xf32>
      %392 = arith.index_cast %arg20 : i32 to index
      %c0_94 = arith.constant 0 : index
      %c0_95 = arith.constant 0 : index
      %393 = vector.load %arg2[%392, %c0_94, %c0_95] : memref<8x2x8xf32, #tpu.memory_space<vmem>>, vector<1x2x8xf32>
      %394 = vector.shape_cast %393 : vector<1x2x8xf32> to vector<2x8xf32>
      %395 = arith.addf %378, %394 : vector<2x8xf32>
      %cst_96 = arith.constant 0xFF800000 : f32
      %396 = vector.broadcast %cst_96 : f32 to vector<2x8xf32>
      %397 = arith.select %391, %396, %395 : vector<2x8xi1>, vector<2x8xf32>
      %cst_97 = arith.constant dense<0xFF800000> : vector<2xf32>
      %398 = vector.multi_reduction <maximumf>, %397, %cst_97 [1] : vector<2x8xf32> to vector<2xf32>
      %399 = vector.shape_cast %398 : vector<2xf32> to vector<2x1xf32>
      %400 = vector.broadcast %399 : vector<2x1xf32> to vector<2x8xf32>
      %401 = arith.cmpf oge, %397, %400 : vector<2x8xf32>
      %c8_i32_98 = arith.constant 8 : i32
      %402 = vector.broadcast %c8_i32_98 : i32 to vector<2x8xi32>
      %403 = arith.select %401, %295, %402 : vector<2x8xi1>, vector<2x8xi32>
      %cst_99 = arith.constant dense<2147483647> : vector<2xi32>
      %404 = vector.multi_reduction <minsi>, %403, %cst_99 [1] : vector<2x8xi32> to vector<2xi32>
      %405 = vector.shape_cast %404 : vector<2xi32> to vector<2x1xi32>
      %406 = vector.broadcast %405 : vector<2x1xi32> to vector<2x8xi32>
      %407 = arith.cmpi eq, %295, %406 : vector<2x8xi32>
      %408 = arith.extui %407 : vector<2x8xi1> to vector<2x8xi32>
      %409 = arith.sitofp %408 : vector<2x8xi32> to vector<2x8xf32>
      %410 = arith.mulf %409, %389 : vector<2x8xf32>
      %cst_100 = arith.constant dense<0.000000e+00> : vector<2xf32>
      %411 = vector.multi_reduction <add>, %410, %cst_100 [1] : vector<2x8xf32> to vector<2xf32>
      %412 = vector.shape_cast %411 : vector<2xf32> to vector<2x1xf32>
      %413 = arith.maximumf %arg24, %409 : vector<2x8xf32>
      %414 = vector.shape_cast %409 : vector<2x8xf32> to vector<2x8x1xf32>
      %415 = vector.broadcast %414 : vector<2x8x1xf32> to vector<2x8x128xf32>
      %416 = arith.mulf %415, %4 : vector<2x8x128xf32>
      %cst_101 = arith.constant dense<0.000000e+00> : vector<2x128xf32>
      %417 = vector.multi_reduction <add>, %416, %cst_101 [1] : vector<2x8x128xf32> to vector<2x128xf32>
      %418 = vector.broadcast %arg20 : i32 to vector<2x8xi32>
      %419 = arith.cmpi eq, %295, %418 : vector<2x8xi32>
      %cst_102 = arith.constant 0.000000e+00 : f32
      %420 = vector.shape_cast %412 : vector<2x1xf32> to vector<2x1xf32>
      %421 = vector.broadcast %420 : vector<2x1xf32> to vector<2x8xf32>
      %422 = vector.broadcast %cst_102 : f32 to vector<2x8xf32>
      %423 = arith.select %419, %421, %422 : vector<2x8xi1>, vector<2x8xf32>
      %424 = arith.addf %arg25, %423 : vector<2x8xf32>
      %425 = arith.extui %419 : vector<2x8xi1> to vector<2x8xi32>
      %426 = vector.broadcast %405 : vector<2x1xi32> to vector<2x8xi32>
      %427 = arith.muli %425, %426 : vector<2x8xi32>
      %428 = arith.addi %arg26, %427 : vector<2x8xi32>
      scf.yield %332, %330, %417, %413, %424, %428 : vector<2x128xf32>, vector<2x128xf32>, vector<2x128xf32>, vector<2x8xf32>, vector<2x8xf32>, vector<2x8xi32>
    }
    %c8_i32_65 = arith.constant 8 : i32
    %c0_66 = arith.constant 0 : index
    %c0_67 = arith.constant 0 : index
    %301 = vector.load %arg18[%c0_66, %c0_67] : memref<2x8xf32, #tpu.memory_space<vmem>>, vector<2x8xf32>
    tpu.vector_store %arg18[%c0_66, %c0_67], %300#4 {strides = array<i32>} : memref<2x8xf32, #tpu.memory_space<vmem>>, vector<2x8xf32>,
    %c0_68 = arith.constant 0 : index
    %c0_69 = arith.constant 0 : index
    %302 = vector.load %arg19[%c0_68, %c0_69] : memref<2x8xi32, #tpu.memory_space<vmem>>, vector<2x8xi32>
    tpu.vector_store %arg19[%c0_68, %c0_69], %300#5 {strides = array<i32>} : memref<2x8xi32, #tpu.memory_space<vmem>>, vector<2x8xi32>,
    return
  }
  func.func @transform_0(%arg0: i32) -> (i32, i32) {
    %c0_i32 = arith.constant 0 : i32
    %c0_i32_0 = arith.constant 0 : i32
    return %arg0, %c0_i32 : i32, i32
  }
  func.func @transform_1(%arg0: i32) -> (i32, i32, i32) {
    %c0_i32 = arith.constant 0 : i32
    %c0_i32_0 = arith.constant 0 : i32
    %c0_i32_1 = arith.constant 0 : i32
    return %c0_i32, %arg0, %c0_i32_0 : i32, i32, i32
  }
  func.func @transform_2(%arg0: i32) -> (i32, i32) {
    %c0_i32 = arith.constant 0 : i32
    %c0_i32_0 = arith.constant 0 : i32
    %c0_i32_1 = arith.constant 0 : i32
    return %c0_i32, %c0_i32_0 : i32, i32
  }
  func.func @transform_3(%arg0: i32) -> (i32, i32) {
    %c0_i32 = arith.constant 0 : i32
    %c0_i32_0 = arith.constant 0 : i32
    %c0_i32_1 = arith.constant 0 : i32
    return %c0_i32, %c0_i32_0 : i32, i32
  }
  func.func @transform_4(%arg0: i32) -> (i32, i32) {
    %c0_i32 = arith.constant 0 : i32
    %c0_i32_0 = arith.constant 0 : i32
    %c0_i32_1 = arith.constant 0 : i32
    return %c0_i32, %c0_i32_0 : i32, i32
  }
  func.func @transform_5(%arg0: i32) -> (i32, i32) {
    %c0_i32 = arith.constant 0 : i32
    %c0_i32_0 = arith.constant 0 : i32
    %c0_i32_1 = arith.constant 0 : i32
    return %c0_i32, %c0_i32_0 : i32, i32
  }
  func.func @transform_6(%arg0: i32) -> (i32, i32) {
    %c0_i32 = arith.constant 0 : i32
    %c0_i32_0 = arith.constant 0 : i32
    %c0_i32_1 = arith.constant 0 : i32
    return %c0_i32, %c0_i32_0 : i32, i32
  }
  func.func @transform_7(%arg0: i32) -> (i32, i32) {
    %c0_i32 = arith.constant 0 : i32
    %c0_i32_0 = arith.constant 0 : i32
    %c0_i32_1 = arith.constant 0 : i32
    return %c0_i32, %c0_i32_0 : i32, i32
  }
  func.func @transform_8(%arg0: i32) -> (i32, i32) {
    %c0_i32 = arith.constant 0 : i32
    %c0_i32_0 = arith.constant 0 : i32
    %c0_i32_1 = arith.constant 0 : i32
    return %c0_i32, %c0_i32_0 : i32, i32
  }
  func.func @transform_9(%arg0: i32) -> (i32, i32) {
    %c0_i32 = arith.constant 0 : i32
    %c0_i32_0 = arith.constant 0 : i32
    %c0_i32_1 = arith.constant 0 : i32
    return %c0_i32, %c0_i32_0 : i32, i32
  }
  func.func @transform_10(%arg0: i32) -> (i32, i32) {
    %c0_i32 = arith.constant 0 : i32
    %c0_i32_0 = arith.constant 0 : i32
    %c0_i32_1 = arith.constant 0 : i32
    return %c0_i32, %c0_i32_0 : i32, i32
  }
  func.func @transform_11(%arg0: i32) -> (i32, i32) {
    %c0_i32 = arith.constant 0 : i32
    %c0_i32_0 = arith.constant 0 : i32
    %c0_i32_1 = arith.constant 0 : i32
    return %c0_i32, %c0_i32_0 : i32, i32
  }
  func.func @transform_12(%arg0: i32) -> (i32, i32) {
    %c0_i32 = arith.constant 0 : i32
    %c0_i32_0 = arith.constant 0 : i32
    %c0_i32_1 = arith.constant 0 : i32
    return %c0_i32, %c0_i32_0 : i32, i32
  }
  func.func @transform_13(%arg0: i32) -> (i32, i32) {
    %c0_i32 = arith.constant 0 : i32
    %c0_i32_0 = arith.constant 0 : i32
    %c0_i32_1 = arith.constant 0 : i32
    return %c0_i32, %c0_i32_0 : i32, i32
  }
  func.func @transform_14(%arg0: i32) -> (i32, i32) {
    %c0_i32 = arith.constant 0 : i32
    %c0_i32_0 = arith.constant 0 : i32
    %c0_i32_1 = arith.constant 0 : i32
    return %c0_i32, %c0_i32_0 : i32, i32
  }
  func.func @transform_15(%arg0: i32) -> (i32, i32) {
    %c0_i32 = arith.constant 0 : i32
    %c0_i32_0 = arith.constant 0 : i32
    %c0_i32_1 = arith.constant 0 : i32
    return %c0_i32, %c0_i32_0 : i32, i32
  }
  func.func @transform_16(%arg0: i32) -> (i32, i32) {
    %c0_i32 = arith.constant 0 : i32
    %c0_i32_0 = arith.constant 0 : i32
    %c0_i32_1 = arith.constant 0 : i32
    return %c0_i32, %c0_i32_0 : i32, i32
  }
  func.func @transform_17(%arg0: i32) -> (i32, i32) {
    %c0_i32 = arith.constant 0 : i32
    %c0_i32_0 = arith.constant 0 : i32
    return %arg0, %c0_i32 : i32, i32
  }
  func.func @transform_18(%arg0: i32) -> (i32, i32) {
    %c0_i32 = arith.constant 0 : i32
    %c0_i32_0 = arith.constant 0 : i32
    return %arg0, %c0_i32 : i32, i32
  }
}

</mosaic_0001>

<bundles_post_ra>
// kernel: tpu_custom_call.1
= control target key start
LH: loop header
LB: loop body
LE: loop exit
PB: predicated region body
PF: predicated region fallthrough
CT: control target
= control target key end

     0   :  { %s6779_s0 = inlined_call_operand.vmem [shape: f32[16,2], index: 0, kind: input, shape index: {}]   ;;  %s6780_s1 = inlined_call_operand.vmem [shape: f32[8,2,8], index: 1, kind: input, shape index: {}]   ;;  %s6781_s2 = inlined_call_operand.hbm [shape: bf16[2,128], index: 2, kind: input, shape index: {}]   ;;  %s6782_s3 = inlined_call_operand.hbm [shape: bf16[128,512], index: 3, kind: input, shape index: {}]   ;;  %s6783_s4 = inlined_call_operand.hbm [shape: bf16[128,512], index: 4, kind: input, shape index: {}]   ;;  %s6784_s5 = inlined_call_operand.vmem [shape: f32[1,512], index: 5, kind: input, shape index: {}]   ;;  %s6785_s6 = inlined_call_operand.hbm [shape: bf16[256,512], index: 6, kind: input, shape index: {}]   ;;  %s6786_s7 = inlined_call_operand.vmem [shape: f32[1,512], index: 7, kind: input, shape index: {}]   ;;  %s6787_s8 = inlined_call_operand.hbm [shape: bf16[128,128], index: 8, kind: input, shape index: {}]   ;;  %s6788_s9 = inlined_call_operand.hbm [shape: f32[1,128], index: 9, kind: input, shape index: {}]   ;;  %s6789_s10 = inlined_call_operand.hbm [shape: bf16[128,128], index: 10, kind: input, shape index: {}]   ;;  %s6790_s11 = inlined_call_operand.vmem [shape: f32[1,128], index: 11, kind: input, shape index: {}]   ;;  %s6791_s12 = inlined_call_operand.hbm [shape: bf16[128,256], index: 12, kind: input, shape index: {}]   ;;  %s6792_s13 = inlined_call_operand.vmem [shape: f32[1,256], index: 13, kind: input, shape index: {}]   ;;  %s6793_s14 = inlined_call_operand.vmem [shape: f32[1,128], index: 14, kind: input, shape index: {}]   ;;  %s6794_s15 = inlined_call_operand.vmem [shape: f32[1,128], index: 15, kind: input, shape index: {}]   ;;  %s6795_s16 = inlined_call_operand.vmem [shape: f32[1,128], index: 16, kind: input, shape index: {}]   ;;  %s6796_s17 = inlined_call_operand.hbm [shape: f32[2,8], index: 17, kind: output, shape index: {0}]   ;;  %s6797_s18 = inlined_call_operand.hbm [shape: s32[2,8], index: 18, kind: output, shape index: {1}]  }
   0x1   :  { %6835 = sst [smem:[#allocation50_spill]] %s6779_s0 }
   0x2   :  { %6836 = sst [smem:[#allocation51_spill]] %s6780_s1 }
   0x3   :  { %6837 = sst [smem:[#allocation52_spill]] %s6781_s2 }
   0x4   :  { %24 = vsyncpa [#allocation3], 0 }
   0x5   :  { %25 = vsyncpa [#allocation6], 0 }
   0x6   :  { %26 = vsyncpa [#allocation9], 0 }
   0x7   :  { %27 = vsyncpa [#allocation12], 0 }
   0x8   :  { %28 = vsyncpa [#allocation15], 0 }
   0x9   :  { %29 = vsyncpa [#allocation4], 0  ;;  %s50_s29 = sshll.u32 %s6782_s3, 4  ;;  %s51_s29 = int_to_ptr.hbm [resolvable:$true] %s50_s29 }
   0xa   :  { %30 = vsyncpa [#allocation18], 0  ;;  %s5138_s30 = smov [#allocation5]   ;;  %s78_s20 = sshll.u32 %s6785_s6, 4  ;;  %s79_s20 = int_to_ptr.hbm [resolvable:$true] %s78_s20 }
   0xb   :  { %s52_s0 = sshll.u32 %s5138_s30, 4  ;;  %s5139_s21 = smov 256   ;;  %s53_s0 = int_to_ptr.vmem [resolvable:$true] %s52_s0 }
   0xc   :  { %s5140_s22 = smov 16   ;;  %s5141_s2 = smov [#allocation8]  }
   0xd   :  { %58 = dma.hbm_to_vmem [thread:$0]  %s51_s29, 4096, %s53_s0, [#allocation6], %s5139_s21, %s5139_s21, %s5140_s22  }
   0xe   :  { %s80_s23 = sshll.u32 %s5141_s2, 4  ;;  %s107_s25 = sshll.u32 %s6788_s9, 4  ;;  %s81_s23 = int_to_ptr.vmem [resolvable:$true] %s80_s23  ;;  %s108_s25 = int_to_ptr.hbm [resolvable:$true] %s107_s25 }
   0xf   :  { %86 = dma.hbm_to_vmem [thread:$0]  %s79_s20, 8192, %s81_s23, [#allocation9], %s5139_s21, %s5139_s21, %s5140_s22  }
  0x10   :  { %s6838_s27 = sld [smem:[#allocation52_spill]]  ;;  %s5142_s30 = smov [#allocation11]  }
  0x11   :  { %s109_s19 = sshll.u32 %s5142_s30, 4  ;;  %s5143_s29 = smov [#allocation2]   ;;  %s110_s19 = int_to_ptr.vmem [resolvable:$true] %s109_s19 }
  0x12   :  { %112 = dma.hbm_to_vmem [thread:$0]  %s108_s25, 16, %s110_s19, [#allocation12]  }
  0x13   :  { %s42_s0 = sshll.u32 %s5143_s29, 4  ;;  %s63_s9 = sshll.u32 %s6783_s4, 4  ;;  %s43_s0 = int_to_ptr.vmem [resolvable:$true] %s42_s0  ;;  %s64_s9 = int_to_ptr.hbm [resolvable:$true] %s63_s9 }
  0x14   :  { %s93_s23 = sshll.u32 %s6787_s8, 4  ;;  %s5144_s3 = smov [#allocation7]   ;;  %s94_s23 = int_to_ptr.hbm [resolvable:$true] %s93_s23 }
  0x15   :  { %s65_s6 = sshll.u32 %s5144_s3, 4  ;;  %s5145_s25 = smov [#allocation10]   ;;  %s66_s6 = int_to_ptr.vmem [resolvable:$true] %s65_s6 }
  0x16   :  { %s40_s28 = sshll.u32 %s6838_s27, 4  ;;  %s95_s26 = sshll.u32 %s5145_s25, 4  ;;  %s41_s28 = int_to_ptr.hbm [resolvable:$true] %s40_s28  ;;  %s96_s26 = int_to_ptr.vmem [resolvable:$true] %s95_s26 }
  0x17   :  { %45 = dma.hbm_to_vmem [thread:$0]  %s41_s28, 16, %s43_s0, [#allocation3]  }
  0x18   :  { %71 = dma.hbm_to_vmem [thread:$0]  %s64_s9, 4096, %s66_s6, [#allocation6], %s5139_s21, %s5139_s21, %s5140_s22  }
  0x19   :  { %s5146_s27 = smov 64   ;;  %s5147_s4 = smov 4  }
  0x1a   :  { %101 = dma.hbm_to_vmem [thread:$0]  %s94_s23, 1024, %s96_s26, [#allocation9], %s5146_s27, %s5146_s27, %s5147_s4  }
  0x1b   :  { %s117_s19 = sshll.u32 %s6789_s10, 4  ;;  %s5148_s8 = smov [#allocation13]   ;;  %s118_s19 = int_to_ptr.hbm [resolvable:$true] %s117_s19 }
  0x1c   :  { %s119_s29 = sshll.u32 %s5148_s8, 4  ;;  %s132_s2 = sshll.u32 %s6791_s12, 4  ;;  %s120_s29 = int_to_ptr.vmem [resolvable:$true] %s119_s29  ;;  %s133_s2 = int_to_ptr.hbm [resolvable:$true] %s132_s2 }
  0x1d   :  { %125 = dma.hbm_to_vmem [thread:$0]  %s118_s19, 1024, %s120_s29, [#allocation12], %s5146_s27, %s5146_s27, %s5147_s4  }
  0x1e   :  { %s5149_s21 = smov [#allocation14]   ;;  %s5150_s9 = smov 128  }
  0x1f   :  { %s134_s22 = sshll.u32 %s5149_s21, 4  ;;  %s5151_s24 = smov 8   ;;  %s135_s22 = int_to_ptr.vmem [resolvable:$true] %s134_s22 }
  0x20   :  { %140 = dma.hbm_to_vmem [thread:$0]  %s133_s2, 2048, %s135_s22, [#allocation15], %s5150_s9, %s5150_s9, %s5151_s24  }
  0x21   :  { %5096 = dma.done.wait [#allocation3], 16  }
  0x22   :  { %5097 = vsyncadd [#allocation3], 4294967280 }
  0x23   :  { %5098 = dma.done.wait [#allocation6], 8192  }
  0x24   :  { %5099 = vsyncadd [#allocation6], 4294959104 }
  0x25   :  { %5100 = dma.done.wait [#allocation9], 9216  }
  0x26   :  { %5101 = vsyncadd [#allocation9], 4294958080 }
  0x27   :  { %5102 = dma.done.wait [#allocation12], 1040  }
  0x28   :  { %5103 = vsyncadd [#allocation12], 4294966256 }
  0x29   :  { %5104 = dma.done.wait [#allocation15], 2048  }
  0x2a   :  { %5105 = vsyncadd [#allocation15], 4294965248  ;;  %vm190_vm0 = vcmask 1040384   ;;  %v5288_v0 = vld [vmem:[%s6786_s7] sm:$0xf]  ;;  %vm186_vm1 = vcmask 15360  }
  0x2b   :  { %6839 = vst [vmem:[#allocation26_spill] sm:$0xff] %v5288_v0  ;;  %v5290_v1 = vld [vmem:[#allocation11] ss:$0 sm:$0xff]  ;;  %v5299_v6 = vld [vmem:[%s6790_s11] ss:$0 sm:$0xff]  ;;  %s6845_s11 = sld [smem:[#allocation50_spill]] }
  0x2c   :  { %6840 = vst [vmem:[#allocation27_spill] sm:$0xff] %v5290_v1  ;;  %v5304_v7 = vld [vmem:[%s6793_s14] ss:$0 sm:$0xff]  ;;  %v3710_v14 = vld [vmem:[#allocation5 + $0xe0] sm:$0xf] }
  0x2d   :  { %6841 = vst [vmem:[#allocation28_spill] sm:$0xff] %v5299_v6  ;;  %v5309_v8 = vld [vmem:[%s6794_s15] ss:$0 sm:$0xff]  ;;  %v4319_v15 = vld [vmem:[#allocation5 + $0xec] sm:$0xf0] }
  0x2e   :  { %6842 = vst [vmem:[#allocation29_spill] sm:$0xff] %v5304_v7  ;;  %v5314_v9 = vld [vmem:[%s6795_s16] ss:$0 sm:$0xff]   ;;  %v3711_v17 = vor.u32 %v4319_v15, %v3710_v14  ;;  %v4317_v18 = vld [vmem:[#allocation5 + $0xe4] sm:$0xf] }
  0x2f   :  { %6843 = vst [vmem:[#allocation30_spill] sm:$0xff] %v5309_v8  ;;  %v185_v10 = vld [vmem:[#allocation2] sm:$0x1]  ;;  %v3712_v19 = vld [vmem:[#allocation5 + $0xf0] sm:$0xf0] }
  0x30   :  { %6844 = vst [vmem:[#allocation31_spill] sm:$0xff] %v5314_v9  ;;  %v192_v12 = vsel %vm190_vm0, %v185_v10, 0  ;;  %v3718_v20 = vld [vmem:[#allocation5 + $0xe8] sm:$0xf]  ;;  %v3715_v21 = vor.u32 %v4317_v18, %v3712_v19  ;;  %v4320_v22 = vld [vmem:[#allocation5 + $0xf4] sm:$0xf0]  ;;  %411 = vmatpush.bf16.msra.mxu1 %v3711_v17 }
  0x31   :  { %v182_v11 = vld [vmem:[%s6845_s11] sm:$0xff]  ;;  %v183_v13 = vld [vmem:[%s6845_s11 + $0x8] sm:$0xff]  ;;  %201 = vmatpush.bf16.msra.mxu0 %v192_v12  ;;  %v3719_v25 = vor.u32 %v4320_v22, %v3718_v20  ;;  %v4315_v28 = vld [vmem:[#allocation5 + $0xcc] sm:$0xf0] }
  0x32   :  { %v184_v16 = vpack.c.bf16 %v183_v13, %v182_v11  ;;  %v4318_v23 = vld [vmem:[#allocation5 + $0xec] sm:$0xf]  ;;  %v3720_v24 = vld [vmem:[#allocation5 + $0xf8] sm:$0xf0]  ;;  %v3694_v27 = vld [vmem:[#allocation5 + $0xc0] sm:$0xf]  ;;  %425 = vmatpush.bf16.msra.mxu2 %v3715_v21 }
  0x33   :  { %v3723_v26 = vor.u32 %v4318_v23, %v3720_v24  ;;  %v4313_v29 = vld [vmem:[#allocation5 + $0xc4] sm:$0xf]  ;;  %v3695_v30 = vor.u32 %v4315_v28, %v3694_v27  ;;  %v3696_v31 = vld [vmem:[#allocation5 + $0xd0] sm:$0xf0]  ;;  %v3702_v32 = vld [vmem:[#allocation5 + $0xc8] sm:$0xf]  ;;  %439 = vmatpush.bf16.msra.mxu3 %v3719_v25 }
  0x34   :  { %3595 = vmatmul.msk.bf16.vlgmr.msra.gmra.mxu0 %vm186_vm1, %v184_v16  ;;  %v4316_v33 = vld [vmem:[#allocation5 + $0xd4] sm:$0xf0]  ;;  %v3699_v34 = vor.u32 %v4313_v29, %v3696_v31  ;;  %v4314_v36 = vld [vmem:[#allocation5 + $0xcc] sm:$0xf]  ;;  %v3704_v37 = vld [vmem:[#allocation5 + $0xd8] sm:$0xf0] }
  0x35   :  { %453 = vmatpush.bf16.msrb.mxu0 %v3723_v26  ;;  %v3703_v35 = vor.u32 %v4316_v33, %v3702_v32  ;;  %v3678_v38 = vld [vmem:[#allocation5 + $0xa0] sm:$0xf]  ;;  %v3707_v39 = vor.u32 %v4314_v36, %v3704_v37  ;;  %v4311_v40 = vld [vmem:[#allocation5 + $0xac] sm:$0xf0]  ;;  %v4309_v41 = vld [vmem:[#allocation5 + $0xa4] sm:$0xf]  ;;  %412 = vmatpush.bf16.msra.mxu1 %v3695_v30 }
  0x36   :  { %v3680_v42 = vld [vmem:[#allocation5 + $0xb0] sm:$0xf0]  ;;  %v3679_v43 = vor.u32 %v4311_v40, %v3678_v38  ;;  %v3686_v44 = vld [vmem:[#allocation5 + $0xa8] sm:$0xf]  ;;  %v4312_v45 = vld [vmem:[#allocation5 + $0xb4] sm:$0xf0]  ;;  %426 = vmatpush.bf16.msra.mxu2 %v3699_v34 }
  0x37   :  { %v4310_v46 = vld [vmem:[#allocation5 + $0xac] sm:$0xf]  ;;  %v3683_v47 = vor.u32 %v4309_v41, %v3680_v42  ;;  %v3688_v48 = vld [vmem:[#allocation5 + $0xb8] sm:$0xf0]  ;;  %v3662_v49 = vld [vmem:[#allocation5 + $0x80] sm:$0xf]  ;;  %440 = vmatpush.bf16.msra.mxu3 %v3703_v35  ;;  %v3687_v51 = vor.u32 %v4312_v45, %v3686_v44 }
  0x38   :  { %v4307_v50 = vld [vmem:[#allocation5 + $0x8c] sm:$0xf0]  ;;  %v3691_v52 = vor.u32 %v4310_v46, %v3688_v48  ;;  %v4305_v53 = vld [vmem:[#allocation5 + $0x84] sm:$0xf]  ;;  %v3664_v54 = vld [vmem:[#allocation5 + $0x90] sm:$0xf0] }
  0x39   :  { %454 = vmatpush.bf16.msrb.mxu0 %v3707_v39  ;;  %v3670_v55 = vld [vmem:[#allocation5 + $0x88] sm:$0xf]  ;;  %v4308_v56 = vld [vmem:[#allocation5 + $0x94] sm:$0xf0]  ;;  %v4306_v57 = vld [vmem:[#allocation5 + $0x8c] sm:$0xf]  ;;  %413 = vmatpush.bf16.msra.mxu1 %v3679_v43  ;;  %v3663_v59 = vor.u32 %v4307_v50, %v3662_v49  ;;  %v3667_v60 = vor.u32 %v4305_v53, %v3664_v54 }
  0x3a   :  { %v3672_v58 = vld [vmem:[#allocation5 + $0x98] sm:$0xf0]  ;;  %427 = vmatpush.bf16.msra.mxu2 %v3683_v47  ;;  %v3646_v61 = vld [vmem:[#allocation5 + $0x60] sm:$0xf]  ;;  %v4303_v62 = vld [vmem:[#allocation5 + $0x6c] sm:$0xf0]  ;;  %v3671_v63 = vor.u32 %v4308_v56, %v3670_v55 }
  0x3b   :  { %441 = vmatpush.bf16.msra.mxu3 %v3687_v51  ;;  %v3675_v10 = vor.u32 %v4306_v57, %v3672_v58  ;;  %v4301_v11 = vld [vmem:[#allocation5 + $0x64] sm:$0xf]  ;;  %v3648_v12 = vld [vmem:[#allocation5 + $0x70] sm:$0xf0]  ;;  %v3654_v13 = vld [vmem:[#allocation5 + $0x68] sm:$0xf]  ;;  %v3647_v17 = vor.u32 %v4303_v62, %v3646_v61 }
  0x3c   :  { %v4304_v14 = vld [vmem:[#allocation5 + $0x74] sm:$0xf0]  ;;  %v4302_v15 = vld [vmem:[#allocation5 + $0x6c] sm:$0xf]  ;;  %v3656_v16 = vld [vmem:[#allocation5 + $0x78] sm:$0xf0]  ;;  %v3651_v18 = vor.u32 %v4301_v11, %v3648_v12 }
  0x3d   :  { %455 = vmatpush.bf16.msrb.mxu0 %v3691_v52  ;;  %414 = vmatpush.bf16.msra.mxu1 %v3663_v59  ;;  %v3630_v19 = vld [vmem:[#allocation5 + $0x40] sm:$0xf]  ;;  %v4299_v20 = vld [vmem:[#allocation5 + $0x4c] sm:$0xf0]  ;;  %v3655_v21 = vor.u32 %v4304_v14, %v3654_v13  ;;  %v3659_v22 = vor.u32 %v4302_v15, %v3656_v16  ;;  %v4297_v23 = vld [vmem:[#allocation5 + $0x44] sm:$0xf] }
  0x3e   :  { %428 = vmatpush.bf16.msra.mxu2 %v3667_v60  ;;  %v3632_v24 = vld [vmem:[#allocation5 + $0x50] sm:$0xf0]  ;;  %v3638_v25 = vld [vmem:[#allocation5 + $0x48] sm:$0xf]  ;;  %v4300_v26 = vld [vmem:[#allocation5 + $0x54] sm:$0xf0]  ;;  %v3631_v29 = vor.u32 %v4299_v20, %v3630_v19 }
  0x3f   :  { %442 = vmatpush.bf16.msra.mxu3 %v3671_v63  ;;  %v4298_v27 = vld [vmem:[#allocation5 + $0x4c] sm:$0xf]  ;;  %v3640_v28 = vld [vmem:[#allocation5 + $0x58] sm:$0xf0]  ;;  %v3635_v30 = vor.u32 %v4297_v23, %v3632_v24  ;;  %v3614_v31 = vld [vmem:[#allocation5 + $0x20] sm:$0xf]  ;;  %v3639_v33 = vor.u32 %v4300_v26, %v3638_v25 }
  0x40   :  { %v4295_v32 = vld [vmem:[#allocation5 + $0x2c] sm:$0xf0]  ;;  %v3643_v34 = vor.u32 %v4298_v27, %v3640_v28  ;;  %v4293_v35 = vld [vmem:[#allocation5 + $0x24] sm:$0xf]  ;;  %v3616_v36 = vld [vmem:[#allocation5 + $0x30] sm:$0xf0] }
  0x41   :  { %456 = vmatpush.bf16.msrb.mxu0 %v3675_v10  ;;  %415 = vmatpush.bf16.msra.mxu1 %v3647_v17  ;;  %v3622_v37 = vld [vmem:[#allocation5 + $0x28] sm:$0xf]  ;;  %v4296_v38 = vld [vmem:[#allocation5 + $0x34] sm:$0xf0]  ;;  %v4294_v39 = vld [vmem:[#allocation5 + $0x2c] sm:$0xf]  ;;  %v3615_v41 = vor.u32 %v4295_v32, %v3614_v31  ;;  %v3619_v44 = vor.u32 %v4293_v35, %v3616_v36 }
  0x42   :  { %429 = vmatpush.bf16.msra.mxu2 %v3651_v18  ;;  %v3624_v40 = vld [vmem:[#allocation5 + $0x38] sm:$0xf0]  ;;  %v3598_v42 = vld [vmem:[#allocation5] sm:$0xf]  ;;  %v4291_v43 = vld [vmem:[#allocation5 + $0xc] sm:$0xf0]  ;;  %v3623_v48 = vor.u32 %v4296_v38, %v3622_v37 }
  0x43   :  { %443 = vmatpush.bf16.msra.mxu3 %v3655_v21  ;;  %v4289_v45 = vld [vmem:[#allocation5 + $0x4] sm:$0xf]  ;;  %v3600_v46 = vld [vmem:[#allocation5 + $0x10] sm:$0xf0]  ;;  %v3606_v47 = vld [vmem:[#allocation5 + $0x8] sm:$0xf]  ;;  %v3627_v49 = vor.u32 %v4294_v39, %v3624_v40  ;;  %v3599_v56 = vor.u32 %v4291_v43, %v3598_v42 }
  0x44   :  { %v4292_v50 = vld [vmem:[#allocation5 + $0x14] sm:$0xf0]  ;;  %v3838_v51 = vld [vmem:[#allocation7 + $0xe0] sm:$0xf]  ;;  %v4351_v52 = vld [vmem:[#allocation7 + $0xec] sm:$0xf0]  ;;  %v3603_v60 = vor.u32 %v4289_v45, %v3600_v46 }
  0x45   :  { %457 = vmatpush.bf16.msrb.mxu0 %v3659_v22  ;;  %416 = vmatpush.bf16.msra.mxu1 %v3631_v29  ;;  %v4290_v53 = vld [vmem:[#allocation5 + $0xc] sm:$0xf]  ;;  %v3608_v54 = vld [vmem:[#allocation5 + $0x18] sm:$0xf0]  ;;  %v4349_v55 = vld [vmem:[#allocation7 + $0xe4] sm:$0xf]  ;;  %v5324_v61 = vor.u32 %v4351_v52, %v3838_v51  ;;  %v3607_v10 = vor.u32 %v4292_v50, %v3606_v47 }
  0x46   :  { %430 = vmatpush.bf16.msra.mxu2 %v3635_v30  ;;  %v3840_v57 = vld [vmem:[#allocation7 + $0xf0] sm:$0xf0]  ;;  %v3846_v58 = vld [vmem:[#allocation7 + $0xe8] sm:$0xf]  ;;  %v4352_v59 = vld [vmem:[#allocation7 + $0xf4] sm:$0xf0]  ;;  %v3611_v11 = vor.u32 %v4290_v53, %v3608_v54 }
  0x47   :  { %444 = vmatpush.bf16.msra.mxu3 %v3639_v33  ;;  %v4350_v62 = vld [vmem:[#allocation7 + $0xec] sm:$0xf]  ;;  %v3848_v63 = vld [vmem:[#allocation7 + $0xf8] sm:$0xf0]  ;;  %v5326_v12 = vor.u32 %v4349_v55, %v3840_v57  ;;  %v5328_v13 = vor.u32 %v4352_v59, %v3846_v58  ;;  %v3822_v15 = vld [vmem:[#allocation7 + $0xc0] sm:$0xf] }
  0x48   :  { %v5330_v14 = vor.u32 %v4350_v62, %v3848_v63  ;;  %v4347_v16 = vld [vmem:[#allocation7 + $0xcc] sm:$0xf0]  ;;  %v4345_v17 = vld [vmem:[#allocation7 + $0xc4] sm:$0xf]  ;;  %v3824_v19 = vld [vmem:[#allocation7 + $0xd0] sm:$0xf0] }
  0x49   :  { %458 = vmatpush.bf16.msrb.mxu0 %v3643_v34  ;;  %417 = vmatpush.bf16.msra.mxu1 %v3615_v41  ;;  %v5336_v18 = vor.u32 %v4347_v16, %v3822_v15  ;;  %v3830_v20 = vld [vmem:[#allocation7 + $0xc8] sm:$0xf]  ;;  %v4348_v21 = vld [vmem:[#allocation7 + $0xd4] sm:$0xf0]  ;;  %v5338_v22 = vor.u32 %v4345_v17, %v3824_v19  ;;  %v4346_v24 = vld [vmem:[#allocation7 + $0xcc] sm:$0xf] }
  0x4a   :  { %431 = vmatpush.bf16.msra.mxu2 %v3619_v44  ;;  %v5340_v23 = vor.u32 %v4348_v21, %v3830_v20  ;;  %v3832_v25 = vld [vmem:[#allocation7 + $0xd8] sm:$0xf0]  ;;  %v3806_v27 = vld [vmem:[#allocation7 + $0xa0] sm:$0xf]  ;;  %v4343_v28 = vld [vmem:[#allocation7 + $0xac] sm:$0xf0] }
  0x4b   :  { %445 = vmatpush.bf16.msra.mxu3 %v3623_v48  ;;  %v5343_v26 = vor.u32 %v4346_v24, %v3832_v25  ;;  %v4341_v29 = vld [vmem:[#allocation7 + $0xa4] sm:$0xf]  ;;  %v5347_v30 = vor.u32 %v4343_v28, %v3806_v27  ;;  %v3808_v31 = vld [vmem:[#allocation7 + $0xb0] sm:$0xf0]  ;;  %v3814_v32 = vld [vmem:[#allocation7 + $0xa8] sm:$0xf] }
  0x4c   :  { %v4344_v33 = vld [vmem:[#allocation7 + $0xb4] sm:$0xf0]  ;;  %v5350_v34 = vor.u32 %v4341_v29, %v3808_v31  ;;  %v4342_v36 = vld [vmem:[#allocation7 + $0xac] sm:$0xf]  ;;  %v3816_v37 = vld [vmem:[#allocation7 + $0xb8] sm:$0xf0] }
  0x4d   :  { %459 = vmatpush.bf16.msrb.mxu0 %v3627_v49  ;;  %418 = vmatpush.bf16.msra.mxu1 %v3599_v56  ;;  %v5352_v35 = vor.u32 %v4344_v33, %v3814_v32  ;;  %v5354_v38 = vor.u32 %v4342_v36, %v3816_v37  ;;  %v3790_v39 = vld [vmem:[#allocation7 + $0x80] sm:$0xf]  ;;  %v4339_v40 = vld [vmem:[#allocation7 + $0x8c] sm:$0xf0]  ;;  %v4337_v41 = vld [vmem:[#allocation7 + $0x84] sm:$0xf] }
  0x4e   :  { %432 = vmatpush.bf16.msra.mxu2 %v3603_v60  ;;  %v5360_v42 = vor.u32 %v4339_v40, %v3790_v39  ;;  %v3792_v43 = vld [vmem:[#allocation7 + $0x90] sm:$0xf0]  ;;  %v3798_v44 = vld [vmem:[#allocation7 + $0x88] sm:$0xf]  ;;  %v4340_v45 = vld [vmem:[#allocation7 + $0x94] sm:$0xf0] }
  0x4f   :  { %446 = vmatpush.bf16.msra.mxu3 %v3607_v10  ;;  %v5362_v46 = vor.u32 %v4337_v41, %v3792_v43  ;;  %v5364_v47 = vor.u32 %v4340_v45, %v3798_v44  ;;  %v4338_v48 = vld [vmem:[#allocation7 + $0x8c] sm:$0xf]  ;;  %v3800_v49 = vld [vmem:[#allocation7 + $0x98] sm:$0xf0]  ;;  %v3774_v51 = vld [vmem:[#allocation7 + $0x60] sm:$0xf] }
  0x50   :  { %v5367_v50 = vor.u32 %v4338_v48, %v3800_v49  ;;  %v4335_v52 = vld [vmem:[#allocation7 + $0x6c] sm:$0xf0]  ;;  %v4333_v53 = vld [vmem:[#allocation7 + $0x64] sm:$0xf]  ;;  %v3776_v55 = vld [vmem:[#allocation7 + $0x70] sm:$0xf0] }
  0x51   :  { %659 = vmatpush.bf16.msrb.mxu1 %v5324_v61  ;;  %460 = vmatpush.bf16.msrb.mxu0 %v3611_v11  ;;  %v5372_v54 = vor.u32 %v4335_v52, %v3774_v51  ;;  %v3782_v56 = vld [vmem:[#allocation7 + $0x68] sm:$0xf]  ;;  %v4336_v57 = vld [vmem:[#allocation7 + $0x74] sm:$0xf0]  ;;  %v5374_v58 = vor.u32 %v4333_v53, %v3776_v55  ;;  %v4334_v60 = vld [vmem:[#allocation7 + $0x6c] sm:$0xf] }
  0x52   :  { %672 = vmatpush.bf16.msrb.mxu2 %v5326_v12  ;;  %v5376_v59 = vor.u32 %v4336_v57, %v3782_v56  ;;  %v3784_v62 = vld [vmem:[#allocation7 + $0x78] sm:$0xf0]  ;;  %v3758_v63 = vld [vmem:[#allocation7 + $0x40] sm:$0xf]  ;;  %v4331_v11 = vld [vmem:[#allocation7 + $0x4c] sm:$0xf0] }
  0x53   :  { %685 = vmatpush.bf16.msrb.mxu3 %v5328_v13  ;;  %v5379_v10 = vor.u32 %v4334_v60, %v3784_v62  ;;  %v4329_v15 = vld [vmem:[#allocation7 + $0x44] sm:$0xf]  ;;  %v3760_v16 = vld [vmem:[#allocation7 + $0x50] sm:$0xf0]  ;;  %v5383_v17 = vor.u32 %v4331_v11, %v3758_v63  ;;  %v3766_v20 = vld [vmem:[#allocation7 + $0x48] sm:$0xf] }
  0x54   :  { %v5385_v19 = vor.u32 %v4329_v15, %v3760_v16  ;;  %v4332_v21 = vld [vmem:[#allocation7 + $0x54] sm:$0xf0]  ;;  %v4330_v24 = vld [vmem:[#allocation7 + $0x4c] sm:$0xf]  ;;  %v3768_v27 = vld [vmem:[#allocation7 + $0x58] sm:$0xf0] }
  0x55   :  { %698 = vmatpush.bf16.msra.mxu0 %v5330_v14  ;;  %660 = vmatpush.bf16.msrb.mxu1 %v5336_v18  ;;  %v5388_v25 = vor.u32 %v4332_v21, %v3766_v20  ;;  %v3742_v28 = vld [vmem:[#allocation7 + $0x20] sm:$0xf]  ;;  %v4327_v29 = vld [vmem:[#allocation7 + $0x2c] sm:$0xf0]  ;;  %v5390_v31 = vor.u32 %v4330_v24, %v3768_v27  ;;  %v4325_v32 = vld [vmem:[#allocation7 + $0x24] sm:$0xf] }
  0x56   :  { %673 = vmatpush.bf16.msrb.mxu2 %v5338_v22  ;;  %v3744_v33 = vld [vmem:[#allocation7 + $0x30] sm:$0xf0]  ;;  %v3750_v36 = vld [vmem:[#allocation7 + $0x28] sm:$0xf]  ;;  %v5393_v37 = vor.u32 %v4327_v29, %v3742_v28  ;;  %v4328_v39 = vld [vmem:[#allocation7 + $0x34] sm:$0xf0] }
  0x57   :  { %686 = vmatpush.bf16.msrb.mxu3 %v5340_v23  ;;  %v4326_v40 = vld [vmem:[#allocation7 + $0x2c] sm:$0xf]  ;;  %v3752_v41 = vld [vmem:[#allocation7 + $0x38] sm:$0xf0]  ;;  %v5397_v43 = vor.u32 %v4325_v32, %v3744_v33  ;;  %v5399_v44 = vor.u32 %v4328_v39, %v3750_v36  ;;  %v3726_v45 = vld [vmem:[#allocation7] sm:$0xf] }
  0x58   :  { %v4323_v48 = vld [vmem:[#allocation7 + $0xc] sm:$0xf0]  ;;  %v4321_v49 = vld [vmem:[#allocation7 + $0x4] sm:$0xf]  ;;  %v5402_v51 = vor.u32 %v4326_v40, %v3752_v41  ;;  %v3728_v52 = vld [vmem:[#allocation7 + $0x10] sm:$0xf0] }
  0x59   :  { %699 = vmatpush.bf16.msra.mxu0 %v5343_v26  ;;  %661 = vmatpush.bf16.msrb.mxu1 %v5347_v30  ;;  %6846 = vst [vmem:[#allocation32_spill] sm:$0xff] %v5399_v44  ;;  %v3734_v53 = vld [vmem:[#allocation7 + $0x8] sm:$0xf]  ;;  %v4324_v55 = vld [vmem:[#allocation7 + $0x14] sm:$0xf0]  ;;  %v5405_v60 = vor.u32 %v4323_v48, %v3726_v45  ;;  %v5409_v62 = vor.u32 %v4321_v49, %v3728_v52  ;;  %v5152_v21 = vmov 0  }
  0x5a   :  { %674 = vmatpush.bf16.msrb.mxu2 %v5350_v34  ;;  %6847 = vst [vmem:[#allocation33_spill] sm:$0xff] %v5402_v51  ;;  %v4322_v56 = vld [vmem:[#allocation7 + $0xc] sm:$0xf]  ;;  %v3736_v57 = vld [vmem:[#allocation7 + $0x18] sm:$0xf0]  ;;  %v5411_v63 = vor.u32 %v4324_v55, %v3734_v53 }
  0x5b   :  { %687 = vmatpush.bf16.msrb.mxu3 %v5352_v35  ;;  %6848 = vst [vmem:[#allocation34_spill] sm:$0xff] %v5405_v60  ;;  %v5414_v11 = vor.u32 %v4322_v56, %v3736_v57  ;;  %v241_v32 = vld [vmem:[%s6784_s5] sm:$0xf] }
  0x5c   :  { %6849 = vst [vmem:[#allocation35_spill] sm:$0xff] %v5409_v62  ;;  %v243_v39 = vperm.slane %v241_v32, 0  ;;  %v246_v40 = vperm.slane %v241_v32, 3  ;;  %v244_v53 = vperm.slane %v241_v32, 1 }
  0x5d   :  { %700 = vmatpush.bf16.msra.mxu0 %v5354_v38  ;;  %662 = vmatpush.bf16.msrb.mxu1 %v5360_v42  ;;  %6850 = vst [vmem:[#allocation36_spill] sm:$0xff] %v5411_v63 }
  0x5e   :  { %675 = vmatpush.bf16.msrb.mxu2 %v5362_v46  ;;  %6851 = vst [vmem:[#allocation37_spill] sm:$0xff] %v5414_v11 }
  0x5f   :  { %688 = vmatpush.bf16.msrb.mxu3 %v5364_v47 }
  0x61   :  { %701 = vmatpush.bf16.msra.mxu0 %v5367_v50  ;;  %663 = vmatpush.bf16.msrb.mxu1 %v5372_v54 }
  0x62   :  { %676 = vmatpush.bf16.msrb.mxu2 %v5374_v58 }
  0x63   :  { %689 = vmatpush.bf16.msrb.mxu3 %v5376_v59 }
  0x65   :  { %702 = vmatpush.bf16.msra.mxu0 %v5379_v10  ;;  %664 = vmatpush.bf16.msrb.mxu1 %v5383_v17 }
  0x66   :  { %677 = vmatpush.bf16.msrb.mxu2 %v5385_v19 }
  0x67   :  { %690 = vmatpush.bf16.msrb.mxu3 %v5388_v25 }
  0x69   :  { %703 = vmatpush.bf16.msra.mxu0 %v5390_v31  ;;  %665 = vmatpush.bf16.msrb.mxu1 %v5393_v37 }
  0x6a   :  { %678 = vmatpush.bf16.msrb.mxu2 %v5397_v43 }
  0x6b   :  { %691 = vmatpush.bf16.msrb.mxu3 %v5399_v44 }
  0x6d   :  { %704 = vmatpush.bf16.msra.mxu0 %v5402_v51  ;;  %666 = vmatpush.bf16.msrb.mxu1 %v5405_v60 }
  0x6e   :  { %679 = vmatpush.bf16.msrb.mxu2 %v5409_v62 }
  0x6f   :  { %692 = vmatpush.bf16.msrb.mxu3 %v5411_v63 }
  0x71   :  { %705 = vmatpush.bf16.msra.mxu0 %v5414_v11 }
  0xb1   :  { %v5420_v15 = vpop.f32.mrf.mxu0 }
  0xb2   :  { %6852 = vst [vmem:[#allocation38_spill] sm:$0xff] %v5420_v15 }
  0xb9   :  { %v5422_v16 = vpop.f32.mrf.mxu0 }
  0xba   :  { %6853 = vst [vmem:[#allocation39_spill] sm:$0xff] %v5422_v16  ;;  %v208_v20 = vpack.c.bf16 %v5422_v16, %v5420_v15 }
  0xbc   :  { %419 = vmatmul.bf16.vlgmr.msra.gmra.mxu1 %v208_v20  ;;  %433 = vmatmul.bf16.vlgmr.msra.gmra.mxu2 %v208_v20 }
  0xbd   :  { %447 = vmatmul.bf16.vlgmr.msra.gmra.mxu3 %v208_v20  ;;  %461 = vmatmul.bf16.vlgmr.msrb.gmra.mxu0 %v208_v20 }
  0xbe   :  { %872 = vmatpush.bf16.msra.mxu1 %v5324_v61  ;;  %885 = vmatpush.bf16.msra.mxu2 %v5326_v12 }
  0xbf   :  { %898 = vmatpush.bf16.msra.mxu3 %v5328_v13  ;;  %911 = vmatpush.bf16.msrb.mxu0 %v5330_v14 }
  0xc2   :  { %873 = vmatpush.bf16.msra.mxu1 %v5336_v18  ;;  %886 = vmatpush.bf16.msra.mxu2 %v5338_v22 }
  0xc3   :  { %899 = vmatpush.bf16.msra.mxu3 %v5340_v23  ;;  %912 = vmatpush.bf16.msrb.mxu0 %v5343_v26 }
  0xc6   :  { %874 = vmatpush.bf16.msra.mxu1 %v5347_v30  ;;  %887 = vmatpush.bf16.msra.mxu2 %v5350_v34 }
  0xc7   :  { %900 = vmatpush.bf16.msra.mxu3 %v5352_v35  ;;  %913 = vmatpush.bf16.msrb.mxu0 %v5354_v38 }
  0xca   :  { %875 = vmatpush.bf16.msra.mxu1 %v5360_v42  ;;  %888 = vmatpush.bf16.msra.mxu2 %v5362_v46 }
  0xcb   :  { %901 = vmatpush.bf16.msra.mxu3 %v5364_v47  ;;  %914 = vmatpush.bf16.msrb.mxu0 %v5367_v50 }
  0xcc   :  { %667 = vmatmul.bf16.vlgmr.msrb.gmra.mxu1 %v5152_v21  ;;  %680 = vmatmul.bf16.vlgmr.msrb.gmra.mxu2 %v5152_v21 }
  0xcd   :  { %693 = vmatmul.bf16.vlgmr.msrb.gmra.mxu3 %v5152_v21  ;;  %706 = vmatmul.bf16.vlgmr.msra.gmra.mxu0 %v5152_v21 }
  0xce   :  { %876 = vmatpush.bf16.msra.mxu1 %v5372_v54  ;;  %889 = vmatpush.bf16.msra.mxu2 %v5374_v58 }
  0xcf   :  { %902 = vmatpush.bf16.msra.mxu3 %v5376_v59  ;;  %915 = vmatpush.bf16.msrb.mxu0 %v5379_v10 }
  0xd2   :  { %877 = vmatpush.bf16.msra.mxu1 %v5383_v17  ;;  %890 = vmatpush.bf16.msra.mxu2 %v5385_v19 }
  0xd3   :  { %903 = vmatpush.bf16.msra.mxu3 %v5388_v25  ;;  %916 = vmatpush.bf16.msrb.mxu0 %v5390_v31 }
  0xd6   :  { %878 = vmatpush.bf16.msra.mxu1 %v5393_v37  ;;  %891 = vmatpush.bf16.msra.mxu2 %v5397_v43 }
  0xd7   :  { %904 = vmatpush.bf16.msra.mxu3 %v5399_v44  ;;  %917 = vmatpush.bf16.msrb.mxu0 %v5402_v51 }
  0xda   :  { %879 = vmatpush.bf16.msra.mxu1 %v5405_v60  ;;  %892 = vmatpush.bf16.msra.mxu2 %v5409_v62 }
  0xdb   :  { %905 = vmatpush.bf16.msra.mxu3 %v5411_v63  ;;  %918 = vmatpush.bf16.msrb.mxu0 %v5414_v11 }
  0xde   :  { %1090 = vmatpush.bf16.msrb.mxu1 %v5324_v61  ;;  %1103 = vmatpush.bf16.msrb.mxu2 %v5326_v12 }
  0xdf   :  { %1116 = vmatpush.bf16.msrb.mxu3 %v5328_v13  ;;  %1129 = vmatpush.bf16.msra.mxu0 %v5330_v14 }
  0xe2   :  { %1091 = vmatpush.bf16.msrb.mxu1 %v5336_v18  ;;  %1104 = vmatpush.bf16.msrb.mxu2 %v5338_v22 }
  0xe3   :  { %1117 = vmatpush.bf16.msrb.mxu3 %v5340_v23  ;;  %1130 = vmatpush.bf16.msra.mxu0 %v5343_v26 }
  0xe6   :  { %1092 = vmatpush.bf16.msrb.mxu1 %v5347_v30  ;;  %1105 = vmatpush.bf16.msrb.mxu2 %v5350_v34 }
  0xe7   :  { %1118 = vmatpush.bf16.msrb.mxu3 %v5352_v35  ;;  %1131 = vmatpush.bf16.msra.mxu0 %v5354_v38 }
  0xea   :  { %1093 = vmatpush.bf16.msrb.mxu1 %v5360_v42  ;;  %1106 = vmatpush.bf16.msrb.mxu2 %v5362_v46 }
  0xeb   :  { %1119 = vmatpush.bf16.msrb.mxu3 %v5364_v47  ;;  %1132 = vmatpush.bf16.msra.mxu0 %v5367_v50 }
  0xee   :  { %1094 = vmatpush.bf16.msrb.mxu1 %v5372_v54  ;;  %1107 = vmatpush.bf16.msrb.mxu2 %v5374_v58 }
  0xef   :  { %1120 = vmatpush.bf16.msrb.mxu3 %v5376_v59  ;;  %1133 = vmatpush.bf16.msra.mxu0 %v5379_v10 }
  0xf2   :  { %1095 = vmatpush.bf16.msrb.mxu1 %v5383_v17  ;;  %1108 = vmatpush.bf16.msrb.mxu2 %v5385_v19 }
  0xf3   :  { %1121 = vmatpush.bf16.msrb.mxu3 %v5388_v25  ;;  %1134 = vmatpush.bf16.msra.mxu0 %v5390_v31 }
  0xf6   :  { %1096 = vmatpush.bf16.msrb.mxu1 %v5393_v37  ;;  %1109 = vmatpush.bf16.msrb.mxu2 %v5397_v43 }
  0xf7   :  { %1122 = vmatpush.bf16.msrb.mxu3 %v5399_v44  ;;  %1135 = vmatpush.bf16.msra.mxu0 %v5402_v51 }
  0xfa   :  { %1097 = vmatpush.bf16.msrb.mxu1 %v5405_v60  ;;  %1110 = vmatpush.bf16.msrb.mxu2 %v5409_v62 }
  0xfb   :  { %1123 = vmatpush.bf16.msrb.mxu3 %v5411_v63  ;;  %1136 = vmatpush.bf16.msra.mxu0 %v5414_v11 }
 0x139   :  { %v420_v24 = vpop.f32.mrf.mxu1 }
 0x13a   :  { %v462_v27 = vpop.f32.mrf.mxu0  ;;  %v5493_v45 = vadd.f32 %v420_v24, %v243_v39 }
 0x13b   :  { %v5495_v49 = vadd.f32 %v462_v27, %v246_v40 }
 0x13c   :  { %6854 = vst [vmem:[#allocation40_spill] sm:$0xff] %v5493_v45 }
 0x13d   :  { %6855 = vst [vmem:[#allocation41_spill] sm:$0xff] %v5495_v49 }
 0x13f   :  { %v434_v28 = vpop.f32.mrf.mxu2 }
 0x140   :  { %v448_v29 = vpop.f32.mrf.mxu3  ;;  %v5505_v15 = vadd.f32 %v434_v28, %v244_v53 }
 0x141   :  { %v422_v33 = vpop.f32.mrf.mxu1 }
 0x142   :  { %v464_v36 = vpop.f32.mrf.mxu0  ;;  %v5497_v55 = vadd.f32 %v422_v33, %v243_v39  ;;  %6858 = vst [vmem:[#allocation44_spill] sm:$0xff] %v5505_v15 }
 0x143   :  { %v5500_v21 = vadd.f32 %v464_v36, %v246_v40 }
 0x144   :  { %6856 = vst [vmem:[#allocation42_spill] sm:$0xff] %v5497_v55 }
 0x145   :  { %6857 = vst [vmem:[#allocation43_spill] sm:$0xff] %v5500_v21 }
 0x147   :  { %v436_v41 = vpop.f32.mrf.mxu2 }
 0x148   :  { %v450_v48 = vpop.f32.mrf.mxu3 }
 0x149   :  { %v668_v52 = vpop.f32.mrf.mxu1 }
 0x14a   :  { %v715_v56 = vrot.slane %v668_v52, 1  ;;  %v727_v57 = vadd.f32 %v668_v52, %v5493_v45  ;;  %v707_v20 = vpop.f32.mrf.mxu0  ;;  %v5507_v52 = vadd.f32 %v436_v41, %v244_v53 }
 0x14b   :  { %v718_v5 = vrot.slane %v707_v20, 1  ;;  %v730_v4 = vadd.f32 %v707_v20, %v5495_v49 }
 0x14c   :  { %v731_v3 = vadd.f32 %v715_v56, %v5497_v55  ;;  %v3852_v24 = vmul.f32 -1.442695, %v727_v57  ;;  %6859 = vst [vmem:[#allocation45_spill] sm:$0xff] %v5507_v52 }
 0x14d   :  { %v734_v2 = vadd.f32 %v718_v5, %v5500_v21  ;;  %v3856_v27 = vmul.f32 -1.442695, %v730_v4 }
 0x14e   :  { %4529 = vpow2.f32 %v3852_v24  ;;  %v3853_v33 = vmul.f32 -1.442695, %v731_v3 }
 0x14f   :  { %4531 = vpow2.f32 %v3856_v27  ;;  %v3857_v39 = vmul.f32 -1.442695, %v734_v2  ;;  %v681_v16 = vpop.f32.mrf.mxu2 }
 0x150   :  { %4533 = vpow2.f32 %v3853_v33  ;;  %v716_v36 = vrot.slane %v681_v16, 1  ;;  %v728_v40 = vadd.f32 %v681_v16, %v5505_v15  ;;  %v694_v20 = vpop.f32.mrf.mxu3  ;;  %v245_v16 = vperm.slane %v241_v32, 2 }
 0x151   :  { %4535 = vpow2.f32 %v3857_v39  ;;  %v670_v56 = vpop.f32.mrf.mxu1 }
 0x152   :  { %v732_v57 = vadd.f32 %v716_v36, %v5507_v52  ;;  %v3854_v5 = vmul.f32 -1.442695, %v728_v40  ;;  %v709_v4 = vpop.f32.mrf.mxu0 }
 0x153   :  { %v5520_v4 = vadd.f32 %v448_v29, %v245_v16 }
 0x154   :  { %v4530_v28 = vpop.eup %4529  ;;  %4537 = vpow2.f32 %v3854_v5  ;;  %v3855_v24 = vmul.f32 -1.442695, %v732_v57  ;;  %v717_v57 = vrot.slane %v694_v20, 1 }
 0x155   :  { %v4532_v3 = vpop.eup %4531  ;;  %v741_v27 = vadd.f32 1.0, %v4530_v28  ;;  %6860 = vst [vmem:[#allocation46_spill] sm:$0xff] %v5520_v4 }
 0x156   :  { %v4534_v2 = vpop.eup %4533  ;;  %4539 = vpow2.f32 %v3855_v24  ;;  %v5513_v8 = vadd.f32 1.0, %v4532_v3  ;;  %v5523_v24 = vadd.f32 %v450_v48, %v245_v16 }
 0x157   :  { %v4536_v41 = vpop.eup %4535  ;;  %v5511_v53 = vadd.f32 1.0, %v4534_v2  ;;  %4541 = vrcp.f32 %v741_v27  ;;  %v683_v33 = vpop.f32.mrf.mxu2  ;;  %v729_v2 = vadd.f32 %v694_v20, %v5520_v4  ;;  %vm748_vm2 = vweird.f32 %v741_v27 }
 0x158   :  { %v696_v39 = vpop.f32.mrf.mxu3  ;;  %v5516_v40 = vadd.f32 1.0, %v4536_v41  ;;  %6861 = vst [vmem:[#allocation47_spill] sm:$0xff] %v5523_v24  ;;  %v733_v29 = vadd.f32 %v717_v57, %v5523_v24  ;;  %v752_v33 = vand.u32 2147483647, %v741_v27  ;;  %v832_v11 = vand.u32 2147483648, %v5513_v8 }
 0x159   :  { %4543 = vrcp.f32 %v5511_v53  ;;  %v754_v39 = vand.u32 2147483648, %v741_v27  ;;  %vm763_vm5 = vweird.f32 %v5511_v53 }
 0x15a   :  { %v4538_v36 = vpop.eup %4537  ;;  %4545 = vrcp.f32 %v5513_v8  ;;  %vm5538_vm3 = vcmp.eq.f32.partialorder %v752_v33, 8.507059e+37  ;;  %v767_v33 = vand.u32 2147483647, %v5511_v53 }
 0x15b   :  { %v5518_v56 = vadd.f32 1.0, %v4538_v36  ;;  %v755_v1 = vor.u32 1.1754944e-38, %v754_v39 }
 0x15c   :  { %v4540_v5 = vpop.eup %4539  ;;  %vm5573_vm11 = vcmp.eq.f32.partialorder %v767_v33, 8.507059e+37 }
 0x15d   :  { %v4542_v28 = vpop.eup %4541  ;;  %v5525_v32 = vadd.f32 1.0, %v4540_v5  ;;  %4547 = vrcp.f32 %v5518_v56  ;;  %vm786_vm7 = vweird.f32 %v5518_v56 }
 0x15e   :  { %v744_v3 = vmul.f32 %v4542_v28, %v741_v27  ;;  %4549 = vrcp.f32 %v5516_v40  ;;  %vm749_vm4 = vweird.f32 %v4542_v28 }
 0x15f   :  { %v5530_v41 = vpop.eup %4543  ;;  %4551 = vrcp.f32 %v5525_v32  ;;  %vm5559_vm8 = vmor %vm748_vm2, %vm749_vm4  ;;  %v807_v55 = vand.u32 2147483648, %v5525_v32  ;;  %vm801_vm14 = vweird.f32 %v5525_v32  ;;  %vm826_vm4 = vweird.f32 %v5513_v8 }
 0x160   :  { %v745_v36 = vsub.f32 1.0, %v744_v3  ;;  %v759_v48 = vmul.f32 %v5530_v41, %v5511_v53  ;;  %v5536_v16 = vpop.eup %4545  ;;  %4553 = vtanh.f32 %v729_v2  ;;  %vm764_vm6 = vweird.f32 %v5530_v41 }
 0x161   :  { %4555 = vtanh.f32 %v733_v29  ;;  %v822_v2 = vmul.f32 %v5536_v16, %v5513_v8  ;;  %vm5569_vm10 = vmor %vm763_vm5, %vm764_vm6 }
 0x162   :  { %v760_v5 = vsub.f32 1.0, %v759_v48  ;;  %v746_v6 = vmul.f32 %v4542_v28, %v745_v36  ;;  %v769_v36 = vand.u32 2147483648, %v5511_v53 }
 0x163   :  { %v4548_v7 = vpop.eup %4547  ;;  %v823_v21 = vsub.f32 1.0, %v822_v2 }
 0x164   :  { %v5542_v57 = vpop.eup %4549  ;;  %v782_v3 = vmul.f32 %v4548_v7, %v5518_v56  ;;  %v747_v0 = vadd.f32 %v4542_v28, %v746_v6  ;;  %v761_v9 = vmul.f32 %v5530_v41, %v760_v5  ;;  %v792_v5 = vand.u32 2147483648, %v5518_v56 }
 0x165   :  { %v4552_v4 = vpop.eup %4551  ;;  %v837_v6 = vmul.f32 %v5542_v57, %v5516_v40  ;;  %vm787_vm9 = vweird.f32 %v4548_v7  ;;  %v770_v63 = vor.u32 1.1754944e-38, %v769_v36  ;;  %v824_v27 = vmul.f32 %v5536_v16, %v823_v21 }
 0x166   :  { %v783_v39 = vsub.f32 1.0, %v782_v3  ;;  %v797_v29 = vmul.f32 %v4552_v4, %v5525_v32  ;;  %v762_v48 = vadd.f32 %v5530_v41, %v761_v9  ;;  %v790_v3 = vand.u32 2147483647, %v5518_v56  ;;  %v4554_v15 = vpop.eup %4553  ;;  %vm788_vm13 = vmor %vm786_vm7, %vm787_vm9 }
 0x167   :  { %v751_v9 = vsel %vm5559_vm8, %v4542_v28, %v747_v0  ;;  %v4556_v45 = vpop.eup %4555  ;;  %vm802_vm12 = vweird.f32 %v4552_v4  ;;  %v838_v24 = vsub.f32 1.0, %v837_v6  ;;  %v793_v2 = vor.u32 1.1754944e-38, %v792_v5 }
 0x168   :  { %v784_v52 = vmul.f32 %v4548_v7, %v783_v39  ;;  %v798_v49 = vsub.f32 1.0, %v797_v29  ;;  %v805_v39 = vand.u32 2147483647, %v5525_v32  ;;  %v766_v0 = vsel %vm5569_vm10, %v5530_v41, %v762_v48  ;;  %vm803_vm1 = vmor %vm801_vm14, %vm802_vm12 }
 0x169   :  { %v756_v53 = vsel %vm5538_vm3, %v755_v1, %v751_v9  ;;  %vm791_vm15 = vcmp.eq.f32.partialorder %v790_v3, 8.507059e+37  ;;  %v808_v41 = vor.u32 1.1754944e-38, %v807_v55  ;;  %v839_v56 = vmul.f32 %v5542_v57, %v838_v24 }
 0x16a   :  { %v799_v29 = vmul.f32 %v4552_v4, %v798_v49  ;;  %v785_v28 = vadd.f32 %v4548_v7, %v784_v52  ;;  %v771_v52 = vsel %vm5573_vm11, %v770_v63, %v766_v0  ;;  %vm806_vm2 = vcmp.eq.f32.partialorder %v805_v39, 8.507059e+37 }
 0x16b   :  { %v853_v36 = vmul.f32 %v4554_v15, %v756_v53  ;;  %v854_v32 = vmul.f32 %v4556_v45, %v771_v52  ;;  %v825_v3 = vadd.f32 %v5536_v16, %v824_v27  ;;  %vm827_vm3 = vweird.f32 %v5536_v16  ;;  %v6872_v52 = vld [vmem:[#allocation36_spill] sm:$0xff] }
 0x16c   :  { %v789_v33 = vsel %vm788_vm13, %v4548_v7, %v785_v28  ;;  %v800_v49 = vadd.f32 %v4552_v4, %v799_v29  ;;  %v830_v15 = vand.u32 2147483647, %v5513_v8  ;;  %vm842_vm5 = vweird.f32 %v5542_v57  ;;  %vm828_vm6 = vmor %vm826_vm4, %vm827_vm3 }
 0x16d   :  { %v794_v48 = vsel %vm791_vm15, %v793_v2, %v789_v33  ;;  %v840_v45 = vadd.f32 %v5542_v57, %v839_v56  ;;  %v847_v55 = vand.u32 2147483648, %v5516_v40  ;;  %vm841_vm7 = vweird.f32 %v5516_v40 }
 0x16e   :  { %v804_v20 = vsel %vm803_vm1, %v4552_v4, %v800_v49  ;;  %v851_v1 = vmul.f32 0.0, %v794_v48  ;;  %v829_v21 = vsel %vm828_vm6, %v5536_v16, %v825_v3  ;;  %v845_v4 = vand.u32 2147483647, %v5516_v40  ;;  %vm843_vm8 = vmor %vm841_vm7, %vm842_vm5  ;;  %v6873_v48 = vld [vmem:[#allocation37_spill] sm:$0xff] }
 0x16f   :  { %v809_v6 = vsel %vm806_vm2, %v808_v41, %v804_v20  ;;  %v833_v9 = vor.u32 1.1754944e-38, %v832_v11  ;;  %vm831_vm9 = vcmp.eq.f32.partialorder %v830_v15, 8.507059e+37  ;;  %v844_v8 = vsel %vm843_vm8, %v5542_v57, %v840_v45  ;;  %v6876_v11 = vld [vmem:[#allocation40_spill] sm:$0xff] }
 0x170   :  { %v852_v5 = vmul.f32 0.0, %v809_v6  ;;  %v5591_v7 = vadd.f32 %v853_v36, %v851_v1  ;;  %v848_v29 = vor.u32 1.1754944e-38, %v847_v55  ;;  %vm846_vm10 = vcmp.eq.f32.partialorder %v845_v4, 8.507059e+37  ;;  %v6874_v36 = vld [vmem:[#allocation42_spill] sm:$0xff]  ;;  %v6877_v55 = vld [vmem:[#allocation41_spill] sm:$0xff] }
 0x171   :  { %v834_v0 = vsel %vm831_vm9, %v833_v9, %v829_v21  ;;  %vm868_vm11 = vcmask 1041409  }
 0x172   :  { %v5596_v63 = vadd.f32 %v854_v32, %v852_v5  ;;  %4557 = vtanh.f32 %v5591_v7  ;;  %v849_v2 = vsel %vm846_vm10, %v848_v29, %v844_v8  ;;  %v6875_v32 = vld [vmem:[#allocation43_spill] sm:$0xff] }
 0x174   :  { %4559 = vtanh.f32 %v5596_v63 }
 0x178   :  { %v4558_v39 = vpop.eup %4557 }
 0x179   :  { %v5609_v28 = vmul.f32 %v4558_v39, %v834_v0  ;;  %v6878_v0 = vld [vmem:[#allocation45_spill] sm:$0xff] }
 0x17a   :  { %v4560_v24 = vpop.eup %4559 }
 0x17b   :  { %6870 = vst [vmem:[#allocation48_spill] sm:$0xff] %v5609_v28  ;;  %v5611_v53 = vmul.f32 %v4560_v24, %v849_v2  ;;  %v861_v16 = vpack.c.bf16 %v5609_v28, %v5609_v28 }
 0x17d   :  { %6871 = vst [vmem:[#allocation49_spill] sm:$0xff] %v5611_v53  ;;  %v862_v40 = vpack.c.bf16 %v5611_v53, %v5611_v53  ;;  %v865_v49 = vunpack.c.l.b16 %v861_v16 }
 0x17f   :  { %v866_v33 = vunpack.c.l.b16 %v862_v40  ;;  %v6879_v40 = vld [vmem:[#allocation44_spill] sm:$0xff] }
 0x181   :  { %v867_v57 = vrot.slane %v866_v33, 7 }
 0x183   :  { %v869_v27 = vsel %vm868_vm11, %v867_v57, %v865_v49 }
 0x184   :  { %v870_v41 = vpack.c.b16 %v869_v27, %v869_v27 }
 0x186   :  { %880 = vmatmul.bf16.vlgmr.msra.gmra.mxu1 %v870_v41  ;;  %893 = vmatmul.bf16.vlgmr.msra.gmra.mxu2 %v870_v41 }
 0x187   :  { %906 = vmatmul.bf16.vlgmr.msra.gmra.mxu3 %v870_v41  ;;  %919 = vmatmul.bf16.vlgmr.msrb.gmra.mxu0 %v870_v41 }
 0x188   :  { %1313 = vmatpush.bf16.msra.mxu1 %v5324_v61  ;;  %1326 = vmatpush.bf16.msra.mxu2 %v5326_v12 }
 0x189   :  { %1339 = vmatpush.bf16.msra.mxu3 %v5328_v13  ;;  %1352 = vmatpush.bf16.msrb.mxu0 %v5330_v14 }
 0x18c   :  { %1314 = vmatpush.bf16.msra.mxu1 %v5336_v18  ;;  %1327 = vmatpush.bf16.msra.mxu2 %v5338_v22 }
 0x18d   :  { %1340 = vmatpush.bf16.msra.mxu3 %v5340_v23  ;;  %1353 = vmatpush.bf16.msrb.mxu0 %v5343_v26 }
 0x190   :  { %1315 = vmatpush.bf16.msra.mxu1 %v5347_v30  ;;  %1328 = vmatpush.bf16.msra.mxu2 %v5350_v34 }
 0x191   :  { %1341 = vmatpush.bf16.msra.mxu3 %v5352_v35  ;;  %1354 = vmatpush.bf16.msrb.mxu0 %v5354_v38 }
 0x194   :  { %1316 = vmatpush.bf16.msra.mxu1 %v5360_v42  ;;  %1329 = vmatpush.bf16.msra.mxu2 %v5362_v46 }
 0x195   :  { %1342 = vmatpush.bf16.msra.mxu3 %v5364_v47  ;;  %1355 = vmatpush.bf16.msrb.mxu0 %v5367_v50 }
 0x198   :  { %1317 = vmatpush.bf16.msra.mxu1 %v5372_v54  ;;  %1330 = vmatpush.bf16.msra.mxu2 %v5374_v58 }
 0x199   :  { %1343 = vmatpush.bf16.msra.mxu3 %v5376_v59  ;;  %1356 = vmatpush.bf16.msrb.mxu0 %v5379_v10 }
 0x19c   :  { %1318 = vmatpush.bf16.msra.mxu1 %v5383_v17  ;;  %1331 = vmatpush.bf16.msra.mxu2 %v5385_v19 }
 0x19d   :  { %1344 = vmatpush.bf16.msra.mxu3 %v5388_v25  ;;  %1357 = vmatpush.bf16.msrb.mxu0 %v5390_v31 }
 0x1a0   :  { %1319 = vmatpush.bf16.msra.mxu1 %v5393_v37  ;;  %1332 = vmatpush.bf16.msra.mxu2 %v5397_v43 }
 0x1a1   :  { %1345 = vmatpush.bf16.msra.mxu3 %v5399_v44  ;;  %1358 = vmatpush.bf16.msrb.mxu0 %v5402_v51 }
 0x1a4   :  { %1320 = vmatpush.bf16.msra.mxu1 %v5405_v60  ;;  %1333 = vmatpush.bf16.msra.mxu2 %v5409_v62 }
 0x1a5   :  { %1346 = vmatpush.bf16.msra.mxu3 %v6872_v52  ;;  %1359 = vmatpush.bf16.msrb.mxu0 %v6873_v48 }
 0x203   :  { %v881_v20 = vpop.f32.mrf.mxu1 }
 0x204   :  { %v928_v1 = vrot.slane %v881_v20, 7  ;;  %v944_v56 = vadd.f32 %v881_v20, %v6874_v36  ;;  %v920_v6 = vpop.f32.mrf.mxu0 }
 0x205   :  { %v931_v5 = vrot.slane %v920_v6, 7  ;;  %v947_v3 = vadd.f32 %v920_v6, %v6875_v32 }
 0x206   :  { %v940_v15 = vadd.f32 %v928_v1, %v6876_v11  ;;  %v3859_v45 = vmul.f32 -1.442695, %v944_v56 }
 0x207   :  { %v943_v21 = vadd.f32 %v931_v5, %v6877_v55  ;;  %v3863_v4 = vmul.f32 -1.442695, %v947_v3 }
 0x208   :  { %v3858_v9 = vmul.f32 -1.442695, %v940_v15  ;;  %4561 = vpow2.f32 %v3859_v45 }
 0x209   :  { %v3862_v8 = vmul.f32 -1.442695, %v943_v21  ;;  %4563 = vpow2.f32 %v3863_v4  ;;  %v894_v39 = vpop.f32.mrf.mxu2 }
 0x20a   :  { %4565 = vpow2.f32 %v3858_v9  ;;  %v929_v29 = vrot.slane %v894_v39, 7  ;;  %v945_v24 = vadd.f32 %v894_v39, %v6878_v0  ;;  %v907_v2 = vpop.f32.mrf.mxu3 }
 0x20b   :  { %4567 = vpow2.f32 %v3862_v8  ;;  %v883_v16 = vpop.f32.mrf.mxu1  ;;  %v930_v8 = vrot.slane %v907_v2, 7 }
 0x20c   :  { %v941_v33 = vadd.f32 %v929_v29, %v6879_v40  ;;  %v3861_v49 = vmul.f32 -1.442695, %v945_v24  ;;  %v922_v57 = vpop.f32.mrf.mxu0 }
 0x20e   :  { %v4562_v27 = vpop.eup %4561  ;;  %v3860_v41 = vmul.f32 -1.442695, %v941_v33  ;;  %4569 = vpow2.f32 %v3861_v49  ;;  %v6880_v33 = vld [vmem:[#allocation47_spill] sm:$0xff] }
 0x20f   :  { %v4564_v20 = vpop.eup %4563  ;;  %v5656_v1 = vadd.f32 1.0, %v4562_v27  ;;  %v946_v49 = vadd.f32 %v907_v2, %v6880_v33  ;;  %v6881_v27 = vld [vmem:[#allocation46_spill] sm:$0xff] }
 0x210   :  { %v4566_v56 = vpop.eup %4565  ;;  %4571 = vpow2.f32 %v3860_v41  ;;  %v5661_v15 = vadd.f32 1.0, %v4564_v20  ;;  %v942_v41 = vadd.f32 %v930_v8, %v6881_v27  ;;  %v1067_v8 = vrot.slane %v5596_v63, 7 }
 0x211   :  { %v4568_v6 = vpop.eup %4567  ;;  %v5658_v5 = vadd.f32 1.0, %v4566_v56  ;;  %4573 = vrcp.f32 %v5656_v1  ;;  %v896_v3 = vpop.f32.mrf.mxu2  ;;  %vm976_vm13 = vweird.f32 %v5656_v1 }
 0x212   :  { %v909_v45 = vpop.f32.mrf.mxu3  ;;  %v5664_v4 = vadd.f32 1.0, %v4568_v6  ;;  %v980_v3 = vand.u32 2147483647, %v5656_v1 }
 0x213   :  { %4575 = vrcp.f32 %v5658_v5  ;;  %v965_v6 = vand.u32 2147483647, %v5658_v5  ;;  %vm961_vm12 = vweird.f32 %v5658_v5  ;;  %v967_v63 = vand.u32 2147483648, %v5658_v5 }
 0x214   :  { %v4570_v21 = vpop.eup %4569  ;;  %4577 = vrcp.f32 %v5661_v15  ;;  %vm5706_vm1 = vcmp.eq.f32.partialorder %v980_v3, 8.507059e+37 }
 0x215   :  { %v5666_v9 = vadd.f32 1.0, %v4570_v21  ;;  %vm5697_vm14 = vcmp.eq.f32.partialorder %v965_v6, 8.507059e+37  ;;  %v1043_v21 = vand.u32 2147483647, %v5664_v4 }
 0x216   :  { %v4572_v39 = vpop.eup %4571 }
 0x217   :  { %v5669_v29 = vpop.eup %4573  ;;  %v5671_v24 = vadd.f32 1.0, %v4572_v39  ;;  %4579 = vrcp.f32 %v5666_v9  ;;  %vm1014_vm3 = vweird.f32 %v5666_v9  ;;  %v1020_v40 = vand.u32 2147483648, %v5666_v9 }
 0x218   :  { %v972_v16 = vmul.f32 %v5669_v29, %v5656_v1  ;;  %4581 = vrcp.f32 %v5664_v4  ;;  %vm977_vm15 = vweird.f32 %v5669_v29  ;;  %v1018_v32 = vand.u32 2147483647, %v5666_v9 }
 0x219   :  { %v5678_v57 = vpop.eup %4575  ;;  %4583 = vrcp.f32 %v5671_v24  ;;  %vm5720_vm4 = vmor %vm976_vm13, %vm977_vm15  ;;  %v1005_v52 = vand.u32 2147483648, %v5671_v24  ;;  %v1003_v60 = vand.u32 2147483647, %v5671_v24  ;;  %vm999_vm9 = vweird.f32 %v5671_v24 }
 0x21a   :  { %v957_v20 = vmul.f32 %v5678_v57, %v5658_v5  ;;  %v973_v56 = vsub.f32 1.0, %v972_v16  ;;  %v5686_v45 = vpop.eup %4577  ;;  %4585 = vtanh.f32 %v946_v49  ;;  %vm962_vm2 = vweird.f32 %v5678_v57 }
 0x21b   :  { %4587 = vtanh.f32 %v942_v41  ;;  %v1050_v41 = vmul.f32 %v5686_v45, %v5661_v15  ;;  %vm5731_vm6 = vmor %vm961_vm12, %vm962_vm2  ;;  %v968_v5 = vor.u32 1.1754944e-38, %v967_v63  ;;  %vm1019_vm10 = vcmp.eq.f32.partialorder %v1018_v32, 8.507059e+37 }
 0x21c   :  { %v958_v39 = vsub.f32 1.0, %v957_v20  ;;  %v974_v2 = vmul.f32 %v5669_v29, %v973_v56  ;;  %vm1004_vm13 = vcmp.eq.f32.partialorder %v1003_v60, 8.507059e+37  ;;  %vm1055_vm15 = vweird.f32 %v5686_v45 }
 0x21d   :  { %v4580_v53 = vpop.eup %4579  ;;  %v1051_v48 = vsub.f32 1.0, %v1050_v41  ;;  %v1021_v41 = vor.u32 1.1754944e-38, %v1020_v40  ;;  %v1058_v60 = vand.u32 2147483647, %v5661_v15 }
 0x21e   :  { %v5693_v16 = vpop.eup %4581  ;;  %v1010_v28 = vmul.f32 %v4580_v53, %v5666_v9  ;;  %v959_v33 = vmul.f32 %v5678_v57, %v958_v39  ;;  %v975_v49 = vadd.f32 %v5669_v29, %v974_v2  ;;  %v982_v39 = vand.u32 2147483648, %v5656_v1 }
 0x21f   :  { %v4584_v20 = vpop.eup %4583  ;;  %v1035_v2 = vmul.f32 %v5693_v16, %v5664_v4  ;;  %vm1015_vm5 = vweird.f32 %v4580_v53  ;;  %v1006_v1 = vor.u32 1.1754944e-38, %v1005_v52  ;;  %v1060_v52 = vand.u32 2147483648, %v5661_v15 }
 0x220   :  { %v995_v6 = vmul.f32 %v4584_v20, %v5671_v24  ;;  %v1011_v27 = vsub.f32 1.0, %v1010_v28  ;;  %v960_v0 = vadd.f32 %v5678_v57, %v959_v33  ;;  %v4586_v28 = vpop.eup %4585  ;;  %v979_v36 = vsel %vm5720_vm4, %v5669_v29, %v975_v49  ;;  %vm1016_vm8 = vmor %vm1014_vm3, %vm1015_vm5 }
 0x221   :  { %v4588_v11 = vpop.eup %4587  ;;  %v983_v62 = vor.u32 1.1754944e-38, %v982_v39  ;;  %vm1000_vm7 = vweird.f32 %v4584_v20  ;;  %v1036_v49 = vsub.f32 1.0, %v1035_v2  ;;  %vm1039_vm3 = vweird.f32 %v5664_v4 }
 0x222   :  { %v996_v55 = vsub.f32 1.0, %v995_v6  ;;  %v1012_v33 = vmul.f32 %v4580_v53, %v1011_v27  ;;  %v964_v27 = vsel %vm5731_vm6, %v5678_v57, %v960_v0  ;;  %vm1001_vm12 = vmor %vm999_vm9, %vm1000_vm7  ;;  %vm1059_vm5 = vcmp.eq.f32.partialorder %v1058_v60, 8.507059e+37 }
 0x223   :  { %v984_v3 = vsel %vm5706_vm1, %v983_v62, %v979_v36  ;;  %v969_v0 = vsel %vm5697_vm14, %v968_v5, %v964_v27  ;;  %v1037_v56 = vmul.f32 %v5693_v16, %v1036_v49  ;;  %v6890_v36 = vrot.slane %v5591_v7, 7 }
 0x224   :  { %v997_v6 = vmul.f32 %v4584_v20, %v996_v55  ;;  %v1013_v29 = vadd.f32 %v4580_v53, %v1012_v33  ;;  %v1052_v55 = vmul.f32 %v5686_v45, %v1051_v48  ;;  %v1073_v63 = vmul.f32 %v4586_v28, %v984_v3 }
 0x225   :  { %vm1040_vm14 = vweird.f32 %v5693_v16  ;;  %vm1054_vm1 = vweird.f32 %v5661_v15  ;;  %v1038_v7 = vadd.f32 %v5693_v16, %v1037_v56  ;;  %vm1044_vm6 = vcmp.eq.f32.partialorder %v1043_v21, 8.507059e+37  ;;  %v6899_v21 = vld [vmem:[#allocation43_spill] sm:$0xff] }
 0x226   :  { %v998_v39 = vadd.f32 %v4584_v20, %v997_v6  ;;  %v1017_v51 = vsel %vm1016_vm8, %v4580_v53, %v1013_v29  ;;  %v1072_v53 = vmul.f32 %v4588_v11, %v969_v0  ;;  %v1053_v48 = vadd.f32 %v5686_v45, %v1052_v55  ;;  %vm1056_vm2 = vmor %vm1054_vm1, %vm1055_vm15  ;;  %v6891_v55 = vld [vmem:[#allocation33_spill] sm:$0xff]  ;;  %v6893_v0 = vld [vmem:[#allocation35_spill] sm:$0xff] }
 0x227   :  { %v1022_v57 = vsel %vm1019_vm10, %v1021_v41, %v1017_v51  ;;  %v1045_v11 = vand.u32 2147483648, %v5664_v4  ;;  %vm1041_vm4 = vmor %vm1039_vm3, %vm1040_vm14 }
 0x228   :  { %v1002_v9 = vsel %vm1001_vm12, %v4584_v20, %v998_v39  ;;  %v1071_v40 = vmul.f32 %v1067_v8, %v1022_v57  ;;  %v1057_v8 = vsel %vm1056_vm2, %v5686_v45, %v1053_v48  ;;  %v1061_v20 = vor.u32 1.1754944e-38, %v1060_v52  ;;  %v6894_v57 = vld [vmem:[#allocation36_spill] sm:$0xff]  ;;  %v6897_v52 = vld [vmem:[#allocation42_spill] sm:$0xff] }
 0x229   :  { %v1007_v62 = vsel %vm1004_vm13, %v1006_v1, %v1002_v9  ;;  %v1042_v2 = vsel %vm1041_vm4, %v5693_v16, %v1038_v7  ;;  %v1046_v15 = vor.u32 1.1754944e-38, %v1045_v11  ;;  %v6892_v1 = vld [vmem:[#allocation34_spill] sm:$0xff]  ;;  %v6895_v9 = vld [vmem:[#allocation37_spill] sm:$0xff] }
 0x22a   :  { %v1070_v24 = vmul.f32 %v6890_v36, %v1007_v62  ;;  %v5750_v32 = vadd.f32 %v1073_v63, %v1071_v40  ;;  %v1062_v33 = vsel %vm1059_vm5, %v1061_v20, %v1057_v8  ;;  %v6898_v7 = vld [vmem:[#allocation41_spill] sm:$0xff] }
 0x22b   :  { %v1047_v29 = vsel %vm1044_vm6, %v1046_v15, %v1042_v2 }
 0x22c   :  { %v5755_v51 = vadd.f32 %v1072_v53, %v1070_v24  ;;  %4589 = vtanh.f32 %v5750_v32  ;;  %v6896_v53 = vld [vmem:[#allocation40_spill] sm:$0xff] }
 0x22e   :  { %4591 = vtanh.f32 %v5755_v51 }
 0x232   :  { %v4590_v28 = vpop.eup %4589 }
 0x233   :  { %v5768_v6 = vmul.f32 %v4590_v28, %v1062_v33 }
 0x234   :  { %v4592_v27 = vpop.eup %4591 }
 0x235   :  { %v5770_v49 = vmul.f32 %v4592_v27, %v1047_v29  ;;  %v1081_v45 = vpack.c.bf16 %v5768_v6, %v5768_v6 }
 0x237   :  { %v1080_v4 = vpack.c.bf16 %v5770_v49, %v5770_v49  ;;  %v1085_v5 = vunpack.c.l.b16 %v1081_v45 }
 0x239   :  { %v1084_v41 = vunpack.c.l.b16 %v1080_v4 }
 0x23b   :  { %v1086_v3 = vrot.slane %v1084_v41, 1  ;;  %v6900_v41 = vld [vmem:[#allocation44_spill] sm:$0xff] }
 0x23d   :  { %v1087_v16 = vsel %vm868_vm11, %v1085_v5, %v1086_v3  ;;  %v6901_v3 = vld [vmem:[#allocation45_spill] sm:$0xff] }
 0x23e   :  { %v1088_v39 = vpack.c.b16 %v1087_v16, %v1087_v16 }
 0x240   :  { %1098 = vmatmul.bf16.vlgmr.msrb.gmra.mxu1 %v1088_v39  ;;  %1111 = vmatmul.bf16.vlgmr.msrb.gmra.mxu2 %v1088_v39 }
 0x241   :  { %1124 = vmatmul.bf16.vlgmr.msrb.gmra.mxu3 %v1088_v39  ;;  %1137 = vmatmul.bf16.vlgmr.msra.gmra.mxu0 %v1088_v39 }
 0x242   :  { %1536 = vmatpush.bf16.msrb.mxu1 %v5324_v61  ;;  %1549 = vmatpush.bf16.msrb.mxu2 %v5326_v12 }
 0x243   :  { %1562 = vmatpush.bf16.msrb.mxu3 %v5328_v13  ;;  %1575 = vmatpush.bf16.msra.mxu0 %v5330_v14 }
 0x246   :  { %1537 = vmatpush.bf16.msrb.mxu1 %v5336_v18  ;;  %1550 = vmatpush.bf16.msrb.mxu2 %v5338_v22 }
 0x247   :  { %1563 = vmatpush.bf16.msrb.mxu3 %v5340_v23  ;;  %1576 = vmatpush.bf16.msra.mxu0 %v5343_v26 }
 0x24a   :  { %1538 = vmatpush.bf16.msrb.mxu1 %v5347_v30  ;;  %1551 = vmatpush.bf16.msrb.mxu2 %v5350_v34 }
 0x24b   :  { %1564 = vmatpush.bf16.msrb.mxu3 %v5352_v35  ;;  %1577 = vmatpush.bf16.msra.mxu0 %v5354_v38 }
 0x24e   :  { %1539 = vmatpush.bf16.msrb.mxu1 %v5360_v42  ;;  %1552 = vmatpush.bf16.msrb.mxu2 %v5362_v46 }
 0x24f   :  { %1565 = vmatpush.bf16.msrb.mxu3 %v5364_v47  ;;  %1578 = vmatpush.bf16.msra.mxu0 %v5367_v50 }
 0x252   :  { %1540 = vmatpush.bf16.msrb.mxu1 %v5372_v54  ;;  %1553 = vmatpush.bf16.msrb.mxu2 %v5374_v58 }
 0x253   :  { %1566 = vmatpush.bf16.msrb.mxu3 %v5376_v59  ;;  %1579 = vmatpush.bf16.msra.mxu0 %v5379_v10 }
 0x256   :  { %1541 = vmatpush.bf16.msrb.mxu1 %v5383_v17  ;;  %1554 = vmatpush.bf16.msrb.mxu2 %v5385_v19 }
 0x257   :  { %1567 = vmatpush.bf16.msrb.mxu3 %v5388_v25  ;;  %1580 = vmatpush.bf16.msra.mxu0 %v5390_v31 }
 0x25a   :  { %1542 = vmatpush.bf16.msrb.mxu1 %v5393_v37  ;;  %1555 = vmatpush.bf16.msrb.mxu2 %v5397_v43 }
 0x25b   :  { %1568 = vmatpush.bf16.msrb.mxu3 %v5399_v44  ;;  %1581 = vmatpush.bf16.msra.mxu0 %v6891_v55 }
 0x25e   :  { %1543 = vmatpush.bf16.msrb.mxu1 %v6892_v1  ;;  %1556 = vmatpush.bf16.msrb.mxu2 %v6893_v0 }
 0x25f   :  { %1569 = vmatpush.bf16.msrb.mxu3 %v6894_v57  ;;  %1582 = vmatpush.bf16.msra.mxu0 %v6895_v9 }
 0x2bd   :  { %v1099_v40 = vpop.f32.mrf.mxu1 }
 0x2be   :  { %v1146_v63 = vrot.slane %v1099_v40, 6  ;;  %v1150_v56 = vrot.slane %v1099_v40, 7  ;;  %v1138_v62 = vpop.f32.mrf.mxu0 }
 0x2bf   :  { %v1149_v36 = vrot.slane %v1138_v62, 6  ;;  %v1153_v24 = vrot.slane %v1138_v62, 7 }
 0x2c0   :  { %v1162_v48 = vadd.f32 %v1146_v63, %v6896_v53  ;;  %v1166_v60 = vadd.f32 %v1150_v56, %v6897_v52 }
 0x2c1   :  { %v1165_v11 = vadd.f32 %v1149_v36, %v6898_v7  ;;  %v1169_v8 = vadd.f32 %v1153_v24, %v6899_v21 }
 0x2c2   :  { %v3864_v20 = vmul.f32 -1.442695, %v1162_v48  ;;  %v3865_v2 = vmul.f32 -1.442695, %v1166_v60 }
 0x2c3   :  { %v3868_v28 = vmul.f32 -1.442695, %v1165_v11  ;;  %v3869_v15 = vmul.f32 -1.442695, %v1169_v8  ;;  %v1112_v33 = vpop.f32.mrf.mxu2 }
 0x2c4   :  { %4593 = vpow2.f32 %v3864_v20  ;;  %v1147_v27 = vrot.slane %v1112_v33, 6  ;;  %v1151_v29 = vrot.slane %v1112_v33, 7  ;;  %v1125_v4 = vpop.f32.mrf.mxu3 }
 0x2c5   :  { %4595 = vpow2.f32 %v3865_v2  ;;  %v1101_v45 = vpop.f32.mrf.mxu1  ;;  %v1152_v33 = vrot.slane %v1125_v4, 7 }
 0x2c6   :  { %4597 = vpow2.f32 %v3868_v28  ;;  %v1163_v5 = vadd.f32 %v1147_v27, %v6900_v41  ;;  %v1167_v16 = vadd.f32 %v1151_v29, %v6901_v3  ;;  %v1140_v39 = vpop.f32.mrf.mxu0  ;;  %v1148_v28 = vrot.slane %v1125_v4, 6  ;;  %v6903_v4 = vld [vmem:[#allocation47_spill] sm:$0xff] }
 0x2c7   :  { %4599 = vpow2.f32 %v3869_v15 }
 0x2c8   :  { %v3866_v40 = vmul.f32 -1.442695, %v1163_v5  ;;  %v3867_v63 = vmul.f32 -1.442695, %v1167_v16  ;;  %v6902_v16 = vld [vmem:[#allocation46_spill] sm:$0xff] }
 0x2c9   :  { %v1164_v39 = vadd.f32 %v1148_v28, %v6902_v16  ;;  %v1288_v16 = vrot.slane %v5755_v51, 7 }
 0x2ca   :  { %v4594_v56 = vpop.eup %4593  ;;  %4601 = vpow2.f32 %v3866_v40 }
 0x2cb   :  { %v4596_v62 = vpop.eup %4595  ;;  %v1176_v36 = vadd.f32 1.0, %v4594_v56  ;;  %4603 = vpow2.f32 %v3867_v63  ;;  %v1114_v24 = vpop.f32.mrf.mxu2  ;;  %v1168_v56 = vadd.f32 %v1152_v33, %v6903_v4 }
 0x2cc   :  { %v4598_v48 = vpop.eup %4597  ;;  %v5815_v60 = vadd.f32 1.0, %v4596_v62  ;;  %v1127_v11 = vpop.f32.mrf.mxu3 }
 0x2cd   :  { %v4600_v8 = vpop.eup %4599  ;;  %4605 = vrcp.f32 %v1176_v36  ;;  %v5817_v20 = vadd.f32 1.0, %v4598_v48  ;;  %v1187_v24 = vand.u32 2147483647, %v1176_v36  ;;  %vm1183_vm7 = vweird.f32 %v1176_v36 }
 0x2ce   :  { %4607 = vrcp.f32 %v5815_v60  ;;  %v5820_v2 = vadd.f32 1.0, %v4600_v8  ;;  %v1189_v8 = vand.u32 2147483648, %v1176_v36  ;;  %vm1198_vm9 = vweird.f32 %v5815_v60 }
 0x2cf   :  { %4609 = vrcp.f32 %v5817_v20  ;;  %vm5848_vm8 = vcmp.eq.f32.partialorder %v1187_v24, 8.507059e+37  ;;  %v1202_v24 = vand.u32 2147483647, %v5815_v60  ;;  %v1204_v7 = vand.u32 2147483648, %v5815_v60 }
 0x2d0   :  { %v4602_v15 = vpop.eup %4601  ;;  %4611 = vrcp.f32 %v5820_v2 }
 0x2d1   :  { %v4604_v27 = vpop.eup %4603  ;;  %v5823_v29 = vadd.f32 1.0, %v4602_v15  ;;  %vm1203_vm3 = vcmp.eq.f32.partialorder %v1202_v24, 8.507059e+37 }
 0x2d2   :  { %v5826_v45 = vadd.f32 1.0, %v4604_v27 }
 0x2d3   :  { %v5828_v5 = vpop.eup %4605  ;;  %4613 = vrcp.f32 %v5823_v29  ;;  %vm1221_vm13 = vweird.f32 %v5823_v29 }
 0x2d4   :  { %v5832_v40 = vpop.eup %4607  ;;  %v1179_v63 = vmul.f32 %v5828_v5, %v1176_v36  ;;  %4615 = vrcp.f32 %v5826_v45  ;;  %vm1184_vm10 = vweird.f32 %v5828_v5  ;;  %v1242_v9 = vand.u32 2147483648, %v5826_v45 }
 0x2d5   :  { %v1194_v62 = vmul.f32 %v5832_v40, %v5815_v60  ;;  %v5839_v48 = vpop.eup %4609  ;;  %4617 = vtanh.f32 %v1164_v39  ;;  %vm1199_vm12 = vweird.f32 %v5832_v40  ;;  %vm5870_vm15 = vmor %vm1183_vm7, %vm1184_vm10  ;;  %v1225_v36 = vand.u32 2147483647, %v5823_v29 }
 0x2d6   :  { %v1180_v11 = vsub.f32 1.0, %v1179_v63  ;;  %v5842_v28 = vpop.eup %4611  ;;  %4619 = vtanh.f32 %v1168_v56  ;;  %v1257_v4 = vmul.f32 %v5839_v48, %v5817_v20  ;;  %v1190_v56 = vor.u32 1.1754944e-38, %v1189_v8  ;;  %vm5881_vm1 = vmor %vm1198_vm9, %vm1199_vm12 }
 0x2d7   :  { %v1195_v27 = vsub.f32 1.0, %v1194_v62  ;;  %v1227_v8 = vand.u32 2147483648, %v5823_v29  ;;  %v1240_v1 = vand.u32 2147483647, %v5826_v45  ;;  %vm1236_vm5 = vweird.f32 %v5826_v45 }
 0x2d8   :  { %v1181_v3 = vmul.f32 %v5828_v5, %v1180_v11  ;;  %v1258_v52 = vsub.f32 1.0, %v1257_v4  ;;  %v1243_v44 = vor.u32 1.1754944e-38, %v1242_v9  ;;  %vm1226_vm7 = vcmp.eq.f32.partialorder %v1225_v36, 8.507059e+37 }
 0x2d9   :  { %v4614_v33 = vpop.eup %4613  ;;  %v1196_v63 = vmul.f32 %v5832_v40, %v1195_v27  ;;  %v1272_v27 = vmul.f32 %v5842_v28, %v5820_v2  ;;  %v1228_v60 = vor.u32 1.1754944e-38, %v1227_v8  ;;  %vm1241_vm9 = vcmp.eq.f32.partialorder %v1240_v1, 8.507059e+37 }
 0x2da   :  { %v4616_v39 = vpop.eup %4615  ;;  %v1217_v62 = vmul.f32 %v4614_v33, %v5823_v29  ;;  %v1182_v51 = vadd.f32 %v5828_v5, %v1181_v3  ;;  %vm1222_vm14 = vweird.f32 %v4614_v33  ;;  %vm1277_vm10 = vweird.f32 %v5842_v28 }
 0x2db   :  { %v1232_v11 = vmul.f32 %v4616_v39, %v5826_v45  ;;  %v1197_v15 = vadd.f32 %v5832_v40, %v1196_v63  ;;  %v4618_v3 = vpop.eup %4617  ;;  %vm1237_vm2 = vweird.f32 %v4616_v39  ;;  %v1273_v63 = vsub.f32 1.0, %v1272_v27  ;;  %vm1223_vm4 = vmor %vm1221_vm13, %vm1222_vm14 }
 0x2dc   :  { %v1218_v21 = vsub.f32 1.0, %v1217_v62  ;;  %v4620_v57 = vpop.eup %4619  ;;  %v1186_v0 = vsel %vm5870_vm15, %v5828_v5, %v1182_v51  ;;  %v1205_v5 = vor.u32 1.1754944e-38, %v1204_v7  ;;  %vm1238_vm6 = vmor %vm1236_vm5, %vm1237_vm2  ;;  %v6910_v45 = vrot.slane %v5750_v32, 7 }
 0x2dd   :  { %v1233_v53 = vsub.f32 1.0, %v1232_v11  ;;  %v1274_v29 = vmul.f32 %v5842_v28, %v1273_v63  ;;  %vm1261_vm12 = vweird.f32 %v5817_v20  ;;  %v1282_v32 = vand.u32 2147483648, %v5820_v2 }
 0x2de   :  { %v1219_v62 = vmul.f32 %v4614_v33, %v1218_v21  ;;  %v1201_v21 = vsel %vm5881_vm1, %v5832_v40, %v1197_v15  ;;  %v1259_v15 = vmul.f32 %v5839_v48, %v1258_v52  ;;  %v1265_v1 = vand.u32 2147483647, %v5817_v20 }
 0x2df   :  { %v1234_v11 = vmul.f32 %v4616_v39, %v1233_v53  ;;  %v1191_v53 = vsel %vm5848_vm8, %v1190_v56, %v1186_v0  ;;  %v1206_v4 = vsel %vm1203_vm3, %v1205_v5, %v1201_v21  ;;  %vm1262_vm8 = vweird.f32 %v5839_v48  ;;  %v6911_v5 = vld [vmem:[#allocation48_spill] sm:$0xff] }
 0x2e0   :  { %v1220_v51 = vadd.f32 %v4614_v33, %v1219_v62  ;;  %v1294_v62 = vmul.f32 %v4618_v3, %v1191_v53  ;;  %v1295_v0 = vmul.f32 %v4620_v57, %v1206_v4  ;;  %v1260_v52 = vadd.f32 %v5839_v48, %v1259_v15  ;;  %vm1263_vm13 = vmor %vm1261_vm12, %vm1262_vm8 }
 0x2e1   :  { %v1235_v55 = vadd.f32 %v4616_v39, %v1234_v11  ;;  %vm1276_vm15 = vweird.f32 %v5820_v2  ;;  %v1280_v57 = vand.u32 2147483647, %v5820_v2  ;;  %v1283_v3 = vor.u32 1.1754944e-38, %v1282_v32 }
 0x2e2   :  { %v1224_v40 = vsel %vm1223_vm4, %v4614_v33, %v1220_v51  ;;  %vm1278_vm14 = vmor %vm1276_vm15, %vm1277_vm10  ;;  %vm1266_vm1 = vcmp.eq.f32.partialorder %v1265_v1, 8.507059e+37  ;;  %vm2419_vm3 = vcmask 1041408   ;;  %v2417_v51 = vsel %vm190_vm0, %v6911_v5, %v5770_v49  ;;  %v6914_v49 = vld [vmem:[#allocation33_spill] sm:$0xff] }
 0x2e3   :  { %v1229_v24 = vsel %vm1226_vm7, %v1228_v60, %v1224_v40  ;;  %v1239_v7 = vsel %vm1238_vm6, %v4616_v39, %v1235_v55  ;;  %v1267_v55 = vand.u32 2147483648, %v5817_v20  ;;  %vm1281_vm2 = vcmp.eq.f32.partialorder %v1280_v57, 8.507059e+37  ;;  %v6912_v60 = vld [vmem:[#allocation49_spill] sm:$0xff] }
 0x2e4   :  { %v1244_v27 = vsel %vm1241_vm9, %v1243_v44, %v1239_v7  ;;  %v1292_v8 = vmul.f32 %v1288_v16, %v1229_v24  ;;  %v1275_v44 = vadd.f32 %v5842_v28, %v1274_v29  ;;  %v1264_v16 = vsel %vm1263_vm13, %v5839_v48, %v1260_v52 }
 0x2e5   :  { %v1293_v41 = vmul.f32 %v6910_v45, %v1244_v27  ;;  %v1268_v33 = vor.u32 1.1754944e-38, %v1267_v55  ;;  %v2418_v48 = vsel %vm190_vm0, %v6912_v60, %v5768_v6  ;;  %v6913_v6 = vld [vmem:[#allocation32_spill] sm:$0xff]  ;;  %v6916_v45 = vld [vmem:[#allocation35_spill] sm:$0xff] }
 0x2e6   :  { %v5899_v56 = vadd.f32 %v1294_v62, %v1292_v8  ;;  %v1279_v39 = vsel %vm1278_vm14, %v5842_v28, %v1275_v44  ;;  %v6915_v62 = vld [vmem:[#allocation34_spill] sm:$0xff] }
 0x2e7   :  { %v5902_v9 = vadd.f32 %v1295_v0, %v1293_v41  ;;  %v1269_v11 = vsel %vm1266_vm1, %v1268_v33, %v1264_v16  ;;  %v1284_v63 = vsel %vm1281_vm2, %v1283_v3, %v1279_v39  ;;  %v6917_v41 = vld [vmem:[#allocation36_spill] sm:$0xff]  ;;  %v6918_v0 = vld [vmem:[#allocation37_spill] sm:$0xff]  ;;  %v6920_v39 = vld [vmem:[#allocation42_spill] sm:$0xff] }
 0x2e8   :  { %4621 = vtanh.f32 %v5899_v56  ;;  %v6919_v16 = vld [vmem:[#allocation40_spill] sm:$0xff] }
 0x2e9   :  { %4623 = vtanh.f32 %v5902_v9 }
 0x2ee   :  { %v4622_v36 = vpop.eup %4621 }
 0x2ef   :  { %v4624_v21 = vpop.eup %4623  ;;  %v1300_v20 = vmul.f32 %v4622_v36, %v1269_v11  ;;  %v6921_v36 = vld [vmem:[#allocation41_spill] sm:$0xff] }
 0x2f0   :  { %v1301_v2 = vmul.f32 %v4624_v21, %v1284_v63  ;;  %v6922_v21 = vld [vmem:[#allocation43_spill] sm:$0xff] }
 0x2f1   :  { %v1302_v53 = vpack.c.bf16 %v1300_v20, %v1300_v20  ;;  %v5923_v28 = vsel %vm2419_vm3, %v2417_v51, %v1300_v20 }
 0x2f2   :  { %v1303_v4 = vpack.c.bf16 %v1301_v2, %v1301_v2  ;;  %v5925_v40 = vsel %vm2419_vm3, %v2418_v48, %v1301_v2 }
 0x2f3   :  { %v1306_v15 = vunpack.c.l.b16 %v1302_v53 }
 0x2f4   :  { %v1307_v24 = vunpack.c.l.b16 %v1303_v4 }
 0x2f5   :  { %v1308_v7 = vrot.slane %v1306_v15, 2 }
 0x2f6   :  { %v1309_v29 = vrot.slane %v1307_v24, 1  ;;  %v6923_v24 = vld [vmem:[#allocation44_spill] sm:$0xff] }
 0x2f8   :  { %v1310_v27 = vsel %vm868_vm11, %v1309_v29, %v1308_v7  ;;  %v6924_v29 = vld [vmem:[#allocation45_spill] sm:$0xff] }
 0x2f9   :  { %v1311_v8 = vpack.c.b16 %v1310_v27, %v1310_v27 }
 0x2fb   :  { %1321 = vmatmul.bf16.vlgmr.msra.gmra.mxu1 %v1311_v8  ;;  %1334 = vmatmul.bf16.vlgmr.msra.gmra.mxu2 %v1311_v8 }
 0x2fc   :  { %1347 = vmatmul.bf16.vlgmr.msra.gmra.mxu3 %v1311_v8  ;;  %1360 = vmatmul.bf16.vlgmr.msrb.gmra.mxu0 %v1311_v8 }
 0x2fd   :  { %1759 = vmatpush.bf16.msra.mxu1 %v5324_v61  ;;  %1772 = vmatpush.bf16.msra.mxu2 %v5326_v12 }
 0x2fe   :  { %1785 = vmatpush.bf16.msra.mxu3 %v5328_v13  ;;  %1798 = vmatpush.bf16.msrb.mxu0 %v5330_v14 }
 0x301   :  { %1760 = vmatpush.bf16.msra.mxu1 %v5336_v18  ;;  %1773 = vmatpush.bf16.msra.mxu2 %v5338_v22 }
 0x302   :  { %1786 = vmatpush.bf16.msra.mxu3 %v5340_v23  ;;  %1799 = vmatpush.bf16.msrb.mxu0 %v5343_v26 }
 0x305   :  { %1761 = vmatpush.bf16.msra.mxu1 %v5347_v30  ;;  %1774 = vmatpush.bf16.msra.mxu2 %v5350_v34 }
 0x306   :  { %1787 = vmatpush.bf16.msra.mxu3 %v5352_v35  ;;  %1800 = vmatpush.bf16.msrb.mxu0 %v5354_v38 }
 0x309   :  { %1762 = vmatpush.bf16.msra.mxu1 %v5360_v42  ;;  %1775 = vmatpush.bf16.msra.mxu2 %v5362_v46 }
 0x30a   :  { %1788 = vmatpush.bf16.msra.mxu3 %v5364_v47  ;;  %1801 = vmatpush.bf16.msrb.mxu0 %v5367_v50 }
 0x30d   :  { %1763 = vmatpush.bf16.msra.mxu1 %v5372_v54  ;;  %1776 = vmatpush.bf16.msra.mxu2 %v5374_v58 }
 0x30e   :  { %1789 = vmatpush.bf16.msra.mxu3 %v5376_v59  ;;  %1802 = vmatpush.bf16.msrb.mxu0 %v5379_v10 }
 0x311   :  { %1764 = vmatpush.bf16.msra.mxu1 %v5383_v17  ;;  %1777 = vmatpush.bf16.msra.mxu2 %v5385_v19 }
 0x312   :  { %1790 = vmatpush.bf16.msra.mxu3 %v5388_v25  ;;  %1803 = vmatpush.bf16.msrb.mxu0 %v5390_v31 }
 0x315   :  { %1765 = vmatpush.bf16.msra.mxu1 %v5393_v37  ;;  %1778 = vmatpush.bf16.msra.mxu2 %v5397_v43 }
 0x316   :  { %1791 = vmatpush.bf16.msra.mxu3 %v6913_v6  ;;  %1804 = vmatpush.bf16.msrb.mxu0 %v6914_v49 }
 0x319   :  { %1766 = vmatpush.bf16.msra.mxu1 %v6915_v62  ;;  %1779 = vmatpush.bf16.msra.mxu2 %v6916_v45 }
 0x31a   :  { %1792 = vmatpush.bf16.msra.mxu3 %v6917_v41  ;;  %1805 = vmatpush.bf16.msrb.mxu0 %v6918_v0 }
 0x378   :  { %v1322_v52 = vpop.f32.mrf.mxu1 }
 0x379   :  { %v1369_v55 = vrot.slane %v1322_v52, 5  ;;  %v1373_v44 = vrot.slane %v1322_v52, 6  ;;  %v1361_v32 = vpop.f32.mrf.mxu0 }
 0x37a   :  { %v1372_v1 = vrot.slane %v1361_v32, 5  ;;  %v1376_v57 = vrot.slane %v1361_v32, 6 }
 0x37b   :  { %v1385_v33 = vadd.f32 %v1369_v55, %v6919_v16  ;;  %v1389_v3 = vadd.f32 %v1373_v44, %v6920_v39 }
 0x37c   :  { %v1388_v11 = vadd.f32 %v1372_v1, %v6921_v36  ;;  %v1392_v63 = vadd.f32 %v1376_v57, %v6922_v21 }
 0x37d   :  { %v3870_v20 = vmul.f32 -1.442695, %v1385_v33  ;;  %v3871_v5 = vmul.f32 -1.442695, %v1389_v3 }
 0x37e   :  { %v3874_v51 = vmul.f32 -1.442695, %v1388_v11  ;;  %v3875_v2 = vmul.f32 -1.442695, %v1392_v63  ;;  %v1335_v60 = vpop.f32.mrf.mxu2 }
 0x37f   :  { %4625 = vpow2.f32 %v3870_v20  ;;  %v1370_v48 = vrot.slane %v1335_v60, 5  ;;  %v1374_v53 = vrot.slane %v1335_v60, 6  ;;  %v1348_v4 = vpop.f32.mrf.mxu3 }
 0x380   :  { %4627 = vpow2.f32 %v3871_v5  ;;  %v1324_v15 = vpop.f32.mrf.mxu1  ;;  %v1375_v60 = vrot.slane %v1348_v4, 6 }
 0x381   :  { %4629 = vpow2.f32 %v3874_v51  ;;  %v1386_v7 = vadd.f32 %v1370_v48, %v6923_v24  ;;  %v1390_v27 = vadd.f32 %v1374_v53, %v6924_v29  ;;  %v1363_v8 = vpop.f32.mrf.mxu0  ;;  %v1371_v51 = vrot.slane %v1348_v4, 5  ;;  %v6926_v4 = vld [vmem:[#allocation47_spill] sm:$0xff] }
 0x382   :  { %4631 = vpow2.f32 %v3875_v2 }
 0x383   :  { %v3872_v52 = vmul.f32 -1.442695, %v1386_v7  ;;  %v3873_v55 = vmul.f32 -1.442695, %v1390_v27  ;;  %v6925_v27 = vld [vmem:[#allocation46_spill] sm:$0xff] }
 0x384   :  { %v1387_v8 = vadd.f32 %v1371_v51, %v6925_v27  ;;  %v1512_v27 = vrot.slane %v5902_v9, 7 }
 0x385   :  { %v4626_v44 = vpop.eup %4625  ;;  %4633 = vpow2.f32 %v3872_v52 }
 0x386   :  { %v4628_v32 = vpop.eup %4627  ;;  %v1399_v1 = vadd.f32 1.0, %v4626_v44  ;;  %4635 = vpow2.f32 %v3873_v55  ;;  %v1337_v57 = vpop.f32.mrf.mxu2  ;;  %v1391_v44 = vadd.f32 %v1375_v60, %v6926_v4 }
 0x387   :  { %v4630_v33 = vpop.eup %4629  ;;  %v5966_v3 = vadd.f32 1.0, %v4628_v32  ;;  %v1350_v11 = vpop.f32.mrf.mxu3 }
 0x388   :  { %v4632_v63 = vpop.eup %4631  ;;  %4637 = vrcp.f32 %v1399_v1  ;;  %v5968_v20 = vadd.f32 1.0, %v4630_v33  ;;  %v1410_v57 = vand.u32 2147483647, %v1399_v1  ;;  %vm1406_vm0 = vweird.f32 %v1399_v1 }
 0x389   :  { %4639 = vrcp.f32 %v5966_v3  ;;  %v5971_v5 = vadd.f32 1.0, %v4632_v63  ;;  %v1412_v63 = vand.u32 2147483648, %v1399_v1  ;;  %vm1421_vm5 = vweird.f32 %v5966_v3 }
 0x38a   :  { %4641 = vrcp.f32 %v5968_v20  ;;  %vm5999_vm4 = vcmp.eq.f32.partialorder %v1410_v57, 8.507059e+37  ;;  %v1425_v57 = vand.u32 2147483647, %v5966_v3  ;;  %v1427_v36 = vand.u32 2147483648, %v5966_v3 }
 0x38b   :  { %v4634_v2 = vpop.eup %4633  ;;  %4643 = vrcp.f32 %v5971_v5 }
 0x38c   :  { %v4636_v48 = vpop.eup %4635  ;;  %v5974_v53 = vadd.f32 1.0, %v4634_v2  ;;  %vm1426_vm15 = vcmp.eq.f32.partialorder %v1425_v57, 8.507059e+37 }
 0x38d   :  { %v5977_v15 = vadd.f32 1.0, %v4636_v48 }
 0x38e   :  { %v5979_v7 = vpop.eup %4637  ;;  %4645 = vrcp.f32 %v5974_v53  ;;  %vm1444_vm9 = vweird.f32 %v5974_v53 }
 0x38f   :  { %v5983_v52 = vpop.eup %4639  ;;  %v1402_v55 = vmul.f32 %v5979_v7, %v1399_v1  ;;  %4647 = vrcp.f32 %v5977_v15  ;;  %vm1407_vm6 = vweird.f32 %v5979_v7  ;;  %v1465_v0 = vand.u32 2147483648, %v5977_v15 }
 0x390   :  { %v1417_v32 = vmul.f32 %v5983_v52, %v5966_v3  ;;  %v5990_v33 = vpop.eup %4641  ;;  %4649 = vtanh.f32 %v1387_v8  ;;  %vm1422_vm7 = vweird.f32 %v5983_v52  ;;  %vm6021_vm8 = vmor %vm1406_vm0, %vm1407_vm6  ;;  %v1448_v1 = vand.u32 2147483647, %v5974_v53 }
 0x391   :  { %v1403_v11 = vsub.f32 1.0, %v1402_v55  ;;  %v5993_v51 = vpop.eup %4643  ;;  %4651 = vtanh.f32 %v1391_v44  ;;  %v1480_v4 = vmul.f32 %v5990_v33, %v5968_v20  ;;  %v1413_v44 = vor.u32 1.1754944e-38, %v1412_v63  ;;  %vm6032_vm12 = vmor %vm1421_vm5, %vm1422_vm7 }
 0x392   :  { %v1418_v48 = vsub.f32 1.0, %v1417_v32  ;;  %v1450_v63 = vand.u32 2147483648, %v5974_v53  ;;  %v1463_v62 = vand.u32 2147483647, %v5977_v15  ;;  %vm1459_vm1 = vweird.f32 %v5977_v15 }
 0x393   :  { %v1404_v29 = vmul.f32 %v5979_v7, %v1403_v11  ;;  %v1481_v39 = vsub.f32 1.0, %v1480_v4  ;;  %v1466_v6 = vor.u32 1.1754944e-38, %v1465_v0  ;;  %vm1449_vm3 = vcmp.eq.f32.partialorder %v1448_v1, 8.507059e+37 }
 0x394   :  { %v4646_v60 = vpop.eup %4645  ;;  %v1419_v55 = vmul.f32 %v5983_v52, %v1418_v48  ;;  %v1495_v48 = vmul.f32 %v5993_v51, %v5971_v5  ;;  %v1451_v3 = vor.u32 1.1754944e-38, %v1450_v63  ;;  %vm1464_vm0 = vcmp.eq.f32.partialorder %v1463_v62, 8.507059e+37 }
 0x395   :  { %v4648_v8 = vpop.eup %4647  ;;  %v1440_v32 = vmul.f32 %v4646_v60, %v5974_v53  ;;  %v1405_v9 = vadd.f32 %v5979_v7, %v1404_v29  ;;  %vm1445_vm10 = vweird.f32 %v4646_v60  ;;  %v6933_v63 = vrot.slane %v5899_v56, 7 }
 0x396   :  { %v1455_v11 = vmul.f32 %v4648_v8, %v5977_v15  ;;  %v1420_v2 = vadd.f32 %v5983_v52, %v1419_v55  ;;  %v4650_v29 = vpop.eup %4649  ;;  %vm1460_vm13 = vweird.f32 %v4648_v8  ;;  %v1496_v55 = vsub.f32 1.0, %v1495_v48  ;;  %vm1446_vm14 = vmor %vm1444_vm9, %vm1445_vm10 }
 0x397   :  { %v1441_v21 = vsub.f32 1.0, %v1440_v32  ;;  %v4652_v41 = vpop.eup %4651  ;;  %v1409_v45 = vsel %vm6021_vm8, %v5979_v7, %v1405_v9  ;;  %v1428_v7 = vor.u32 1.1754944e-38, %v1427_v36  ;;  %vm1461_vm2 = vmor %vm1459_vm1, %vm1460_vm13  ;;  %vm1500_vm5 = vweird.f32 %v5993_v51 }
 0x398   :  { %v1456_v16 = vsub.f32 1.0, %v1455_v11  ;;  %v1497_v53 = vmul.f32 %v5993_v51, %v1496_v55  ;;  %vm1484_vm6 = vweird.f32 %v5968_v20  ;;  %v1488_v62 = vand.u32 2147483647, %v5968_v20 }
 0x399   :  { %v1442_v32 = vmul.f32 %v4646_v60, %v1441_v21  ;;  %v1424_v21 = vsel %vm6032_vm12, %v5983_v52, %v1420_v2  ;;  %v1482_v2 = vmul.f32 %v5990_v33, %v1481_v39  ;;  %vm1499_vm9 = vweird.f32 %v5971_v5 }
 0x39a   :  { %v1457_v11 = vmul.f32 %v4648_v8, %v1456_v16  ;;  %v1414_v16 = vsel %vm5999_vm4, %v1413_v44, %v1409_v45  ;;  %v1429_v4 = vsel %vm1426_vm15, %v1428_v7, %v1424_v21  ;;  %vm1485_vm4 = vweird.f32 %v5990_v33  ;;  %vm1501_vm8 = vmor %vm1499_vm9, %vm1500_vm5 }
 0x39b   :  { %v1443_v9 = vadd.f32 %v4646_v60, %v1442_v32  ;;  %v1517_v32 = vmul.f32 %v4650_v29, %v1414_v16  ;;  %v1518_v45 = vmul.f32 %v4652_v41, %v1429_v4  ;;  %v1483_v39 = vadd.f32 %v5990_v33, %v1482_v2  ;;  %vm1486_vm7 = vmor %vm1484_vm6, %vm1485_vm4 }
 0x39c   :  { %v1458_v49 = vadd.f32 %v4648_v8, %v1457_v11  ;;  %v1498_v56 = vadd.f32 %v5993_v51, %v1497_v53  ;;  %v1503_v41 = vand.u32 2147483647, %v5971_v5  ;;  %vm1489_vm10 = vcmp.eq.f32.partialorder %v1488_v62, 8.507059e+37  ;;  %v6937_v53 = vld [vmem:[#allocation35_spill] sm:$0xff]  ;;  %v6941_v62 = vld [vmem:[#allocation42_spill] sm:$0xff] }
 0x39d   :  { %v1447_v52 = vsel %vm1446_vm14, %v4646_v60, %v1443_v9  ;;  %vm2422_vm13 = vcmask 1042432  }
 0x39e   :  { %v1452_v57 = vsel %vm1449_vm3, %v1451_v3, %v1447_v52  ;;  %v1462_v36 = vsel %vm1461_vm2, %v4648_v8, %v1458_v49  ;;  %v1490_v49 = vand.u32 2147483648, %v5968_v20  ;;  %v1502_v8 = vsel %vm1501_vm8, %v5993_v51, %v1498_v56  ;;  %v6940_v56 = vld [vmem:[#allocation40_spill] sm:$0xff] }
 0x39f   :  { %v1467_v48 = vsel %vm1464_vm0, %v1466_v6, %v1462_v36  ;;  %v1515_v15 = vmul.f32 %v6933_v63, %v1452_v57  ;;  %v1505_v6 = vand.u32 2147483648, %v5971_v5  ;;  %vm1504_vm12 = vcmp.eq.f32.partialorder %v1503_v41, 8.507059e+37  ;;  %v6936_v36 = vld [vmem:[#allocation34_spill] sm:$0xff]  ;;  %v6939_v63 = vld [vmem:[#allocation37_spill] sm:$0xff] }
 0x3a0   :  { %v1516_v24 = vmul.f32 %v1512_v27, %v1467_v48  ;;  %v1487_v27 = vsel %vm1486_vm7, %v5990_v33, %v1483_v39  ;;  %v1491_v60 = vor.u32 1.1754944e-38, %v1490_v49  ;;  %v6938_v48 = vld [vmem:[#allocation36_spill] sm:$0xff] }
 0x3a1   :  { %v6050_v44 = vadd.f32 %v1517_v32, %v1515_v15  ;;  %v1506_v29 = vor.u32 1.1754944e-38, %v1505_v6 }
 0x3a2   :  { %v6053_v0 = vadd.f32 %v1518_v45, %v1516_v24  ;;  %v1492_v11 = vsel %vm1489_vm10, %v1491_v60, %v1487_v27  ;;  %v6942_v27 = vld [vmem:[#allocation41_spill] sm:$0xff] }
 0x3a3   :  { %4653 = vtanh.f32 %v6050_v44  ;;  %v1507_v55 = vsel %vm1504_vm12, %v1506_v29, %v1502_v8  ;;  %v6943_v8 = vld [vmem:[#allocation43_spill] sm:$0xff] }
 0x3a4   :  { %4655 = vtanh.f32 %v6053_v0 }
 0x3a9   :  { %v4654_v1 = vpop.eup %4653 }
 0x3aa   :  { %v4656_v21 = vpop.eup %4655  ;;  %v1523_v20 = vmul.f32 %v4654_v1, %v1492_v11 }
 0x3ab   :  { %v1524_v7 = vmul.f32 %v4656_v21, %v1507_v55 }
 0x3ac   :  { %v1525_v9 = vpack.c.bf16 %v1523_v20, %v1523_v20  ;;  %v6069_v3 = vsel %vm2422_vm13, %v5923_v28, %v1523_v20  ;;  %v6934_v28 = vld [vmem:[#allocation32_spill] sm:$0xff] }
 0x3ad   :  { %v1526_v5 = vpack.c.bf16 %v1524_v7, %v1524_v7  ;;  %v6072_v33 = vsel %vm2422_vm13, %v5925_v40, %v1524_v7  ;;  %v6935_v40 = vld [vmem:[#allocation33_spill] sm:$0xff] }
 0x3ae   :  { %v1529_v16 = vunpack.c.l.b16 %v1525_v9 }
 0x3af   :  { %v1530_v51 = vunpack.c.l.b16 %v1526_v5 }
 0x3b0   :  { %v1531_v4 = vrot.slane %v1529_v16, 3 }
 0x3b1   :  { %v1532_v52 = vrot.slane %v1530_v51, 2  ;;  %v6944_v51 = vld [vmem:[#allocation44_spill] sm:$0xff] }
 0x3b3   :  { %v1533_v2 = vsel %vm868_vm11, %v1532_v52, %v1531_v4  ;;  %v6945_v52 = vld [vmem:[#allocation45_spill] sm:$0xff] }
 0x3b4   :  { %v1534_v57 = vpack.c.b16 %v1533_v2, %v1533_v2 }
 0x3b6   :  { %1544 = vmatmul.bf16.vlgmr.msrb.gmra.mxu1 %v1534_v57  ;;  %1557 = vmatmul.bf16.vlgmr.msrb.gmra.mxu2 %v1534_v57 }
 0x3b7   :  { %1570 = vmatmul.bf16.vlgmr.msrb.gmra.mxu3 %v1534_v57  ;;  %1583 = vmatmul.bf16.vlgmr.msra.gmra.mxu0 %v1534_v57 }
 0x3b8   :  { %1982 = vmatpush.bf16.msrb.mxu1 %v5324_v61  ;;  %1995 = vmatpush.bf16.msrb.mxu2 %v5326_v12 }
 0x3b9   :  { %2008 = vmatpush.bf16.msrb.mxu3 %v5328_v13  ;;  %2021 = vmatpush.bf16.msra.mxu0 %v5330_v14 }
 0x3bc   :  { %1983 = vmatpush.bf16.msrb.mxu1 %v5336_v18  ;;  %1996 = vmatpush.bf16.msrb.mxu2 %v5338_v22 }
 0x3bd   :  { %2009 = vmatpush.bf16.msrb.mxu3 %v5340_v23  ;;  %2022 = vmatpush.bf16.msra.mxu0 %v5343_v26 }
 0x3c0   :  { %1984 = vmatpush.bf16.msrb.mxu1 %v5347_v30  ;;  %1997 = vmatpush.bf16.msrb.mxu2 %v5350_v34 }
 0x3c1   :  { %2010 = vmatpush.bf16.msrb.mxu3 %v5352_v35  ;;  %2023 = vmatpush.bf16.msra.mxu0 %v5354_v38 }
 0x3c4   :  { %1985 = vmatpush.bf16.msrb.mxu1 %v5360_v42  ;;  %1998 = vmatpush.bf16.msrb.mxu2 %v5362_v46 }
 0x3c5   :  { %2011 = vmatpush.bf16.msrb.mxu3 %v5364_v47  ;;  %2024 = vmatpush.bf16.msra.mxu0 %v5367_v50 }
 0x3c8   :  { %1986 = vmatpush.bf16.msrb.mxu1 %v5372_v54  ;;  %1999 = vmatpush.bf16.msrb.mxu2 %v5374_v58 }
 0x3c9   :  { %2012 = vmatpush.bf16.msrb.mxu3 %v5376_v59  ;;  %2025 = vmatpush.bf16.msra.mxu0 %v5379_v10 }
 0x3cc   :  { %1987 = vmatpush.bf16.msrb.mxu1 %v5383_v17  ;;  %2000 = vmatpush.bf16.msrb.mxu2 %v5385_v19 }
 0x3cd   :  { %2013 = vmatpush.bf16.msrb.mxu3 %v5388_v25  ;;  %2026 = vmatpush.bf16.msra.mxu0 %v5390_v31 }
 0x3d0   :  { %1988 = vmatpush.bf16.msrb.mxu1 %v5393_v37  ;;  %2001 = vmatpush.bf16.msrb.mxu2 %v5397_v43 }
 0x3d1   :  { %2014 = vmatpush.bf16.msrb.mxu3 %v6934_v28  ;;  %2027 = vmatpush.bf16.msra.mxu0 %v6935_v40 }
 0x3d4   :  { %1989 = vmatpush.bf16.msrb.mxu1 %v6936_v36  ;;  %2002 = vmatpush.bf16.msrb.mxu2 %v6937_v53 }
 0x3d5   :  { %2015 = vmatpush.bf16.msrb.mxu3 %v6938_v48  ;;  %2028 = vmatpush.bf16.msra.mxu0 %v6939_v63 }
 0x433   :  { %v1545_v15 = vpop.f32.mrf.mxu1 }
 0x434   :  { %v1592_v32 = vrot.slane %v1545_v15, 4  ;;  %v1596_v24 = vrot.slane %v1545_v15, 5  ;;  %v1584_v45 = vpop.f32.mrf.mxu0 }
 0x435   :  { %v1595_v39 = vrot.slane %v1584_v45, 4  ;;  %v1599_v49 = vrot.slane %v1584_v45, 5 }
 0x436   :  { %v1608_v6 = vadd.f32 %v1592_v32, %v6940_v56  ;;  %v1612_v41 = vadd.f32 %v1596_v24, %v6941_v62 }
 0x437   :  { %v1611_v60 = vadd.f32 %v1595_v39, %v6942_v27  ;;  %v1615_v29 = vadd.f32 %v1599_v49, %v6943_v8 }
 0x438   :  { %v3876_v1 = vmul.f32 -1.442695, %v1608_v6  ;;  %v3877_v11 = vmul.f32 -1.442695, %v1612_v41 }
 0x439   :  { %v3880_v21 = vmul.f32 -1.442695, %v1611_v60  ;;  %v3881_v55 = vmul.f32 -1.442695, %v1615_v29  ;;  %v1558_v20 = vpop.f32.mrf.mxu2 }
 0x43a   :  { %4657 = vpow2.f32 %v3876_v1  ;;  %v1593_v7 = vrot.slane %v1558_v20, 4  ;;  %v1597_v9 = vrot.slane %v1558_v20, 5  ;;  %v1571_v5 = vpop.f32.mrf.mxu3 }
 0x43b   :  { %4659 = vpow2.f32 %v3877_v11  ;;  %v1547_v16 = vpop.f32.mrf.mxu1  ;;  %v1598_v20 = vrot.slane %v1571_v5, 5 }
 0x43c   :  { %4661 = vpow2.f32 %v3880_v21  ;;  %v1609_v4 = vadd.f32 %v1593_v7, %v6944_v51  ;;  %v1613_v2 = vadd.f32 %v1597_v9, %v6945_v52  ;;  %v1586_v57 = vpop.f32.mrf.mxu0  ;;  %v1594_v21 = vrot.slane %v1571_v5, 4  ;;  %v6947_v5 = vld [vmem:[#allocation47_spill] sm:$0xff] }
 0x43d   :  { %4663 = vpow2.f32 %v3881_v55 }
 0x43e   :  { %v3878_v15 = vmul.f32 -1.442695, %v1609_v4  ;;  %v3879_v32 = vmul.f32 -1.442695, %v1613_v2  ;;  %v6946_v2 = vld [vmem:[#allocation46_spill] sm:$0xff] }
 0x43f   :  { %v1610_v57 = vadd.f32 %v1594_v21, %v6946_v2  ;;  %v1735_v2 = vrot.slane %v6053_v0, 7 }
 0x440   :  { %v4658_v24 = vpop.eup %4657  ;;  %4665 = vpow2.f32 %v3878_v15 }
 0x441   :  { %v4660_v45 = vpop.eup %4659  ;;  %v1622_v39 = vadd.f32 1.0, %v4658_v24  ;;  %4667 = vpow2.f32 %v3879_v32  ;;  %v1560_v49 = vpop.f32.mrf.mxu2  ;;  %v1614_v24 = vadd.f32 %v1598_v20, %v6947_v5 }
 0x442   :  { %v4662_v6 = vpop.eup %4661  ;;  %v6113_v41 = vadd.f32 1.0, %v4660_v45  ;;  %v1573_v60 = vpop.f32.mrf.mxu3 }
 0x443   :  { %v4664_v29 = vpop.eup %4663  ;;  %4669 = vrcp.f32 %v1622_v39  ;;  %v6115_v1 = vadd.f32 1.0, %v4662_v6  ;;  %v1633_v49 = vand.u32 2147483647, %v1622_v39  ;;  %vm1629_vm15 = vweird.f32 %v1622_v39 }
 0x444   :  { %4671 = vrcp.f32 %v6113_v41  ;;  %v6118_v11 = vadd.f32 1.0, %v4664_v29  ;;  %v1635_v29 = vand.u32 2147483648, %v1622_v39  ;;  %vm1644_vm1 = vweird.f32 %v6113_v41 }
 0x445   :  { %4673 = vrcp.f32 %v6115_v1  ;;  %vm6146_vm14 = vcmp.eq.f32.partialorder %v1633_v49, 8.507059e+37  ;;  %v1648_v49 = vand.u32 2147483647, %v6113_v41  ;;  %v1650_v27 = vand.u32 2147483648, %v6113_v41 }
 0x446   :  { %v4666_v55 = vpop.eup %4665  ;;  %4675 = vrcp.f32 %v6118_v11 }
 0x447   :  { %v4668_v7 = vpop.eup %4667  ;;  %v6121_v9 = vadd.f32 1.0, %v4666_v55  ;;  %vm1649_vm9 = vcmp.eq.f32.partialorder %v1648_v49, 8.507059e+37 }
 0x448   :  { %v6124_v16 = vadd.f32 1.0, %v4668_v7 }
 0x449   :  { %v6126_v4 = vpop.eup %4669  ;;  %4677 = vrcp.f32 %v6121_v9  ;;  %vm1667_vm0 = vweird.f32 %v6121_v9 }
 0x44a   :  { %v6130_v15 = vpop.eup %4671  ;;  %v1625_v32 = vmul.f32 %v6126_v4, %v1622_v39  ;;  %4679 = vrcp.f32 %v6124_v16  ;;  %vm1630_vm2 = vweird.f32 %v6126_v4  ;;  %v1688_v63 = vand.u32 2147483648, %v6124_v16 }
 0x44b   :  { %v1640_v45 = vmul.f32 %v6130_v15, %v6113_v41  ;;  %v6137_v6 = vpop.eup %4673  ;;  %4681 = vtanh.f32 %v1610_v57  ;;  %vm1645_vm3 = vweird.f32 %v6130_v15  ;;  %vm6168_vm4 = vmor %vm1629_vm15, %vm1630_vm2  ;;  %v1671_v39 = vand.u32 2147483647, %v6121_v9 }
 0x44c   :  { %v1626_v60 = vsub.f32 1.0, %v1625_v32  ;;  %v6140_v21 = vpop.eup %4675  ;;  %4683 = vtanh.f32 %v1614_v24  ;;  %v1703_v5 = vmul.f32 %v6137_v6, %v6115_v1  ;;  %v1636_v24 = vor.u32 1.1754944e-38, %v1635_v29  ;;  %vm6179_vm6 = vmor %vm1644_vm1, %vm1645_vm3 }
 0x44d   :  { %v1641_v7 = vsub.f32 1.0, %v1640_v45  ;;  %v1673_v29 = vand.u32 2147483648, %v6121_v9  ;;  %v1686_v36 = vand.u32 2147483647, %v6124_v16  ;;  %vm1682_vm10 = vweird.f32 %v6124_v16 }
 0x44e   :  { %v1627_v52 = vmul.f32 %v6126_v4, %v1626_v60  ;;  %v1704_v62 = vsub.f32 1.0, %v1703_v5  ;;  %v1689_v28 = vor.u32 1.1754944e-38, %v1688_v63  ;;  %vm1672_vm13 = vcmp.eq.f32.partialorder %v1671_v39, 8.507059e+37 }
 0x44f   :  { %v4678_v20 = vpop.eup %4677  ;;  %v1642_v32 = vmul.f32 %v6130_v15, %v1641_v7  ;;  %v1718_v7 = vmul.f32 %v6140_v21, %v6118_v11  ;;  %v1674_v41 = vor.u32 1.1754944e-38, %v1673_v29  ;;  %vm1687_vm15 = vcmp.eq.f32.partialorder %v1686_v36, 8.507059e+37 }
 0x450   :  { %v4680_v57 = vpop.eup %4679  ;;  %v1663_v45 = vmul.f32 %v4678_v20, %v6121_v9  ;;  %v1628_v0 = vadd.f32 %v6126_v4, %v1627_v52  ;;  %vm1668_vm5 = vweird.f32 %v4678_v20  ;;  %v6954_v29 = vrot.slane %v6050_v44, 7 }
 0x451   :  { %v1678_v60 = vmul.f32 %v4680_v57, %v6124_v16  ;;  %v1643_v55 = vadd.f32 %v6130_v15, %v1642_v32  ;;  %v4682_v52 = vpop.eup %4681  ;;  %vm1683_vm7 = vweird.f32 %v4680_v57  ;;  %v1719_v32 = vsub.f32 1.0, %v1718_v7  ;;  %vm1669_vm8 = vmor %vm1667_vm0, %vm1668_vm5 }
 0x452   :  { %v1664_v8 = vsub.f32 1.0, %v1663_v45  ;;  %v4684_v48 = vpop.eup %4683  ;;  %v1632_v53 = vsel %vm6168_vm4, %v6126_v4, %v1628_v0  ;;  %v1651_v4 = vor.u32 1.1754944e-38, %v1650_v27  ;;  %vm1684_vm12 = vmor %vm1682_vm10, %vm1683_vm7  ;;  %vm1723_vm1 = vweird.f32 %v6140_v21 }
 0x453   :  { %v1679_v56 = vsub.f32 1.0, %v1678_v60  ;;  %v1720_v9 = vmul.f32 %v6140_v21, %v1719_v32  ;;  %vm1707_vm2 = vweird.f32 %v6115_v1  ;;  %v1711_v36 = vand.u32 2147483647, %v6115_v1 }
 0x454   :  { %v1665_v45 = vmul.f32 %v4678_v20, %v1664_v8  ;;  %v1647_v8 = vsel %vm6179_vm6, %v6130_v15, %v1643_v55  ;;  %v1705_v55 = vmul.f32 %v6137_v6, %v1704_v62  ;;  %vm1722_vm0 = vweird.f32 %v6118_v11 }
 0x455   :  { %v1680_v60 = vmul.f32 %v4680_v57, %v1679_v56  ;;  %v1637_v56 = vsel %vm6146_vm14, %v1636_v24, %v1632_v53  ;;  %v1652_v5 = vsel %vm1649_vm9, %v1651_v4, %v1647_v8  ;;  %vm1708_vm14 = vweird.f32 %v6137_v6  ;;  %vm1724_vm4 = vmor %vm1722_vm0, %vm1723_vm1 }
 0x456   :  { %v1666_v0 = vadd.f32 %v4678_v20, %v1665_v45  ;;  %v1740_v45 = vmul.f32 %v4682_v52, %v1637_v56  ;;  %v1741_v53 = vmul.f32 %v4684_v48, %v1652_v5  ;;  %v1706_v62 = vadd.f32 %v6137_v6, %v1705_v55  ;;  %vm1709_vm3 = vmor %vm1707_vm2, %vm1708_vm14 }
 0x457   :  { %v1681_v40 = vadd.f32 %v4680_v57, %v1680_v60  ;;  %v1721_v44 = vadd.f32 %v6140_v21, %v1720_v9  ;;  %v1726_v48 = vand.u32 2147483647, %v6118_v11  ;;  %vm1712_vm5 = vcmp.eq.f32.partialorder %v1711_v36, 8.507059e+37  ;;  %v6965_v9 = vld [vmem:[#allocation44_spill] sm:$0xff] }
 0x458   :  { %v1670_v15 = vsel %vm1669_vm8, %v4678_v20, %v1666_v0  ;;  %vm2425_vm7 = vcmask 1043456  }
 0x459   :  { %v1675_v49 = vsel %vm1672_vm13, %v1674_v41, %v1670_v15  ;;  %v1685_v27 = vsel %vm1684_vm12, %v4680_v57, %v1681_v40  ;;  %v1713_v40 = vand.u32 2147483648, %v6115_v1  ;;  %v1725_v57 = vsel %vm1724_vm4, %v6140_v21, %v1721_v44 }
 0x45a   :  { %v1690_v7 = vsel %vm1687_vm15, %v1689_v28, %v1685_v27  ;;  %v1738_v16 = vmul.f32 %v6954_v29, %v1675_v49  ;;  %v1728_v28 = vand.u32 2147483648, %v6118_v11  ;;  %vm1727_vm6 = vcmp.eq.f32.partialorder %v1726_v48, 8.507059e+37  ;;  %v6966_v29 = vld [vmem:[#allocation45_spill] sm:$0xff] }
 0x45b   :  { %v1739_v51 = vmul.f32 %v1735_v2, %v1690_v7  ;;  %v1710_v2 = vsel %vm1709_vm3, %v6137_v6, %v1706_v62  ;;  %v1714_v20 = vor.u32 1.1754944e-38, %v1713_v40 }
 0x45c   :  { %v6197_v24 = vadd.f32 %v1740_v45, %v1738_v16  ;;  %v1729_v52 = vor.u32 1.1754944e-38, %v1728_v28 }
 0x45d   :  { %v6200_v63 = vadd.f32 %v1741_v53, %v1739_v51  ;;  %v1715_v60 = vsel %vm1712_vm5, %v1714_v20, %v1710_v2 }
 0x45e   :  { %4685 = vtanh.f32 %v6197_v24  ;;  %v1730_v32 = vsel %vm1727_vm6, %v1729_v52, %v1725_v57 }
 0x45f   :  { %4687 = vtanh.f32 %v6200_v63 }
 0x464   :  { %v4686_v39 = vpop.eup %4685 }
 0x465   :  { %v4688_v8 = vpop.eup %4687  ;;  %v1746_v1 = vmul.f32 %v4686_v39, %v1715_v60 }
 0x466   :  { %v1747_v4 = vmul.f32 %v4688_v8, %v1730_v32 }
 0x467   :  { %v1748_v0 = vpack.c.bf16 %v1746_v1, %v1746_v1  ;;  %v6216_v41 = vsel %vm2425_vm7, %v6069_v3, %v1746_v1 }
 0x468   :  { %v1749_v11 = vpack.c.bf16 %v1747_v4, %v1747_v4  ;;  %v6219_v6 = vsel %vm2425_vm7, %v6072_v33, %v1747_v4 }
 0x469   :  { %v1752_v56 = vunpack.c.l.b16 %v1748_v0 }
 0x46a   :  { %v1753_v21 = vunpack.c.l.b16 %v1749_v11  ;;  %v6967_v11 = vld [vmem:[#allocation46_spill] sm:$0xff] }
 0x46b   :  { %v1754_v5 = vrot.slane %v1752_v56, 4 }
 0x46c   :  { %v1755_v15 = vrot.slane %v1753_v21, 3 }
 0x46e   :  { %v1756_v55 = vsel %vm868_vm11, %v1755_v15, %v1754_v5  ;;  %v6968_v15 = vld [vmem:[#allocation47_spill] sm:$0xff] }
 0x46f   :  { %v1757_v49 = vpack.c.b16 %v1756_v55, %v1756_v55 }
 0x471   :  { %1767 = vmatmul.bf16.vlgmr.msra.gmra.mxu1 %v1757_v49  ;;  %1780 = vmatmul.bf16.vlgmr.msra.gmra.mxu2 %v1757_v49 }
 0x472   :  { %1793 = vmatmul.bf16.vlgmr.msra.gmra.mxu3 %v1757_v49  ;;  %1806 = vmatmul.bf16.vlgmr.msrb.gmra.mxu0 %v1757_v49 }
 0x473   :  { %2205 = vmatpush.bf16.msra.mxu1 %v5324_v61  ;;  %2218 = vmatpush.bf16.msra.mxu2 %v5326_v12  ;;  %v6955_v61 = vld [vmem:[#allocation32_spill] sm:$0xff]  ;;  %v6956_v12 = vld [vmem:[#allocation33_spill] sm:$0xff] }
 0x474   :  { %2231 = vmatpush.bf16.msra.mxu3 %v5328_v13  ;;  %2244 = vmatpush.bf16.msrb.mxu0 %v5330_v14  ;;  %v6957_v13 = vld [vmem:[#allocation34_spill] sm:$0xff]  ;;  %v6958_v14 = vld [vmem:[#allocation35_spill] sm:$0xff] }
 0x477   :  { %2206 = vmatpush.bf16.msra.mxu1 %v5336_v18  ;;  %2219 = vmatpush.bf16.msra.mxu2 %v5338_v22  ;;  %v6959_v18 = vld [vmem:[#allocation36_spill] sm:$0xff]  ;;  %v6960_v22 = vld [vmem:[#allocation37_spill] sm:$0xff] }
 0x478   :  { %2232 = vmatpush.bf16.msra.mxu3 %v5340_v23  ;;  %2245 = vmatpush.bf16.msrb.mxu0 %v5343_v26 }
 0x47b   :  { %2207 = vmatpush.bf16.msra.mxu1 %v5347_v30  ;;  %2220 = vmatpush.bf16.msra.mxu2 %v5350_v34 }
 0x47c   :  { %2233 = vmatpush.bf16.msra.mxu3 %v5352_v35  ;;  %2246 = vmatpush.bf16.msrb.mxu0 %v5354_v38 }
 0x47f   :  { %2208 = vmatpush.bf16.msra.mxu1 %v5360_v42  ;;  %2221 = vmatpush.bf16.msra.mxu2 %v5362_v46  ;;  %v6961_v42 = vld [vmem:[#allocation40_spill] sm:$0xff] }
 0x480   :  { %2234 = vmatpush.bf16.msra.mxu3 %v5364_v47  ;;  %2247 = vmatpush.bf16.msrb.mxu0 %v5367_v50  ;;  %v6962_v47 = vld [vmem:[#allocation42_spill] sm:$0xff] }
 0x483   :  { %2209 = vmatpush.bf16.msra.mxu1 %v5372_v54  ;;  %2222 = vmatpush.bf16.msra.mxu2 %v5374_v58  ;;  %v6963_v54 = vld [vmem:[#allocation41_spill] sm:$0xff] }
 0x484   :  { %2235 = vmatpush.bf16.msra.mxu3 %v5376_v59  ;;  %2248 = vmatpush.bf16.msrb.mxu0 %v5379_v10  ;;  %v6964_v59 = vld [vmem:[#allocation43_spill] sm:$0xff] }
 0x487   :  { %2210 = vmatpush.bf16.msra.mxu1 %v5383_v17  ;;  %2223 = vmatpush.bf16.msra.mxu2 %v5385_v19 }
 0x488   :  { %2236 = vmatpush.bf16.msra.mxu3 %v5388_v25  ;;  %2249 = vmatpush.bf16.msrb.mxu0 %v5390_v31 }
 0x48b   :  { %2211 = vmatpush.bf16.msra.mxu1 %v5393_v37  ;;  %2224 = vmatpush.bf16.msra.mxu2 %v5397_v43 }
 0x48c   :  { %2237 = vmatpush.bf16.msra.mxu3 %v6955_v61  ;;  %2250 = vmatpush.bf16.msrb.mxu0 %v6956_v12 }
 0x48f   :  { %2212 = vmatpush.bf16.msra.mxu1 %v6957_v13  ;;  %2225 = vmatpush.bf16.msra.mxu2 %v6958_v14 }
 0x490   :  { %2238 = vmatpush.bf16.msra.mxu3 %v6959_v18  ;;  %2251 = vmatpush.bf16.msrb.mxu0 %v6960_v22  ;;  %v1957_v18 = vrot.slane %v6197_v24, 7 }
 0x4ee   :  { %v1768_v23 = vpop.f32.mrf.mxu1 }
 0x4ef   :  { %v1815_v26 = vrot.slane %v1768_v23, 3  ;;  %v1819_v30 = vrot.slane %v1768_v23, 4  ;;  %v1807_v34 = vpop.f32.mrf.mxu0 }
 0x4f0   :  { %v1818_v35 = vrot.slane %v1807_v34, 3  ;;  %v1822_v38 = vrot.slane %v1807_v34, 4 }
 0x4f1   :  { %v1831_v46 = vadd.f32 %v1815_v26, %v6961_v42  ;;  %v1835_v50 = vadd.f32 %v1819_v30, %v6962_v47  ;;  %v1958_v26 = vrot.slane %v6200_v63, 7 }
 0x4f2   :  { %v1834_v58 = vadd.f32 %v1818_v35, %v6963_v54  ;;  %v1838_v10 = vadd.f32 %v1822_v38, %v6964_v59 }
 0x4f3   :  { %v3882_v17 = vmul.f32 -1.442695, %v1831_v46  ;;  %v3883_v19 = vmul.f32 -1.442695, %v1835_v50 }
 0x4f4   :  { %v3886_v25 = vmul.f32 -1.442695, %v1834_v58  ;;  %v3887_v31 = vmul.f32 -1.442695, %v1838_v10  ;;  %v1781_v37 = vpop.f32.mrf.mxu2 }
 0x4f5   :  { %4689 = vpow2.f32 %v3882_v17  ;;  %v1816_v43 = vrot.slane %v1781_v37, 3  ;;  %v1820_v3 = vrot.slane %v1781_v37, 4  ;;  %v1794_v33 = vpop.f32.mrf.mxu3 }
 0x4f6   :  { %4691 = vpow2.f32 %v3883_v19  ;;  %v1770_v27 = vpop.f32.mrf.mxu1  ;;  %v1817_v39 = vrot.slane %v1794_v33, 3  ;;  %v1821_v8 = vrot.slane %v1794_v33, 4 }
 0x4f7   :  { %4693 = vpow2.f32 %v3886_v25  ;;  %v1832_v7 = vadd.f32 %v1816_v43, %v6965_v9  ;;  %v1836_v16 = vadd.f32 %v1820_v3, %v6966_v29  ;;  %v1809_v45 = vpop.f32.mrf.mxu0 }
 0x4f8   :  { %4695 = vpow2.f32 %v3887_v31  ;;  %v1833_v56 = vadd.f32 %v1817_v39, %v6967_v11  ;;  %v1837_v55 = vadd.f32 %v1821_v8, %v6968_v15 }
 0x4f9   :  { %v3884_v51 = vmul.f32 -1.442695, %v1832_v7  ;;  %v3885_v53 = vmul.f32 -1.442695, %v1836_v16 }
 0x4fb   :  { %v4690_v62 = vpop.eup %4689  ;;  %4697 = vpow2.f32 %v3884_v51 }
 0x4fc   :  { %v4692_v40 = vpop.eup %4691  ;;  %v1845_v44 = vadd.f32 1.0, %v4690_v62  ;;  %4699 = vpow2.f32 %v3885_v53  ;;  %v1783_v28 = vpop.f32.mrf.mxu2 }
 0x4fd   :  { %v4694_v36 = vpop.eup %4693  ;;  %v6260_v48 = vadd.f32 1.0, %v4692_v40  ;;  %v1796_v2 = vpop.f32.mrf.mxu3 }
 0x4fe   :  { %v4696_v20 = vpop.eup %4695  ;;  %4701 = vrcp.f32 %v1845_v44  ;;  %v6262_v57 = vadd.f32 1.0, %v4694_v36  ;;  %v1856_v61 = vand.u32 2147483647, %v1845_v44  ;;  %v1858_v14 = vand.u32 2147483648, %v1845_v44 }
 0x4ff   :  { %4703 = vrcp.f32 %v6260_v48  ;;  %v6265_v52 = vadd.f32 1.0, %v4696_v20  ;;  %vm1852_vm9 = vweird.f32 %v1845_v44  ;;  %vm1867_vm10 = vweird.f32 %v6260_v48 }
 0x500   :  { %4705 = vrcp.f32 %v6262_v57  ;;  %vm6293_vm8 = vcmp.eq.f32.partialorder %v1856_v61, 8.507059e+37  ;;  %v1859_v10 = vor.u32 1.1754944e-38, %v1858_v14  ;;  %v1871_v25 = vand.u32 2147483647, %v6260_v48 }
 0x501   :  { %v4698_v60 = vpop.eup %4697  ;;  %4707 = vrcp.f32 %v6265_v52  ;;  %v1873_v43 = vand.u32 2147483648, %v6260_v48  ;;  %v1936_v38 = vand.u32 2147483648, %v6262_v57 }
 0x502   :  { %v4700_v32 = vpop.eup %4699  ;;  %v6268_v1 = vadd.f32 1.0, %v4698_v60  ;;  %vm1872_vm0 = vcmp.eq.f32.partialorder %v1871_v25, 8.507059e+37 }
 0x503   :  { %v6271_v4 = vadd.f32 1.0, %v4700_v32  ;;  %v1874_v39 = vor.u32 1.1754944e-38, %v1873_v43 }
 0x504   :  { %v6273_v0 = vpop.eup %4701  ;;  %4709 = vrcp.f32 %v6268_v1  ;;  %vm1890_vm15 = vweird.f32 %v6268_v1  ;;  %v1896_v27 = vand.u32 2147483648, %v6268_v1 }
 0x505   :  { %v6277_v21 = vpop.eup %4703  ;;  %v1848_v5 = vmul.f32 %v6273_v0, %v1845_v44  ;;  %4711 = vrcp.f32 %v6271_v4  ;;  %vm1853_vm12 = vweird.f32 %v6273_v0  ;;  %v1911_v16 = vand.u32 2147483648, %v6271_v4 }
 0x506   :  { %v1863_v49 = vmul.f32 %v6277_v21, %v6260_v48  ;;  %v6284_v12 = vpop.eup %4705  ;;  %4713 = vtanh.f32 %v1833_v56  ;;  %vm1868_vm13 = vweird.f32 %v6277_v21  ;;  %vm6315_vm14 = vmor %vm1852_vm9, %vm1853_vm12  ;;  %v1894_v44 = vand.u32 2147483647, %v6268_v1 }
 0x507   :  { %v1849_v13 = vsub.f32 1.0, %v1848_v5  ;;  %v6287_v23 = vpop.eup %4707  ;;  %4715 = vtanh.f32 %v1837_v55  ;;  %v1926_v35 = vmul.f32 %v6284_v12, %v6262_v57  ;;  %vm6326_vm2 = vmor %vm1867_vm10, %vm1868_vm13  ;;  %v1909_v2 = vand.u32 2147483647, %v6271_v4 }
 0x508   :  { %v1864_v22 = vsub.f32 1.0, %v1863_v49  ;;  %v1941_v31 = vmul.f32 %v6287_v23, %v6265_v52  ;;  %v1897_v48 = vor.u32 1.1754944e-38, %v1896_v27  ;;  %vm1905_vm5 = vweird.f32 %v6271_v4 }
 0x509   :  { %v1850_v30 = vmul.f32 %v6273_v0, %v1849_v13  ;;  %v1927_v33 = vsub.f32 1.0, %v1926_v35  ;;  %vm1895_vm7 = vcmp.eq.f32.partialorder %v1894_v44, 8.507059e+37  ;;  %vm1910_vm9 = vcmp.eq.f32.partialorder %v1909_v2, 8.507059e+37 }
 0x50a   :  { %v4710_v34 = vpop.eup %4709  ;;  %v1865_v46 = vmul.f32 %v6277_v21, %v1864_v22  ;;  %v1942_v20 = vsub.f32 1.0, %v1941_v31  ;;  %vm1946_vm10 = vweird.f32 %v6287_v23  ;;  %vm1930_vm12 = vweird.f32 %v6262_v57 }
 0x50b   :  { %v4712_v50 = vpop.eup %4711  ;;  %v1886_v58 = vmul.f32 %v4710_v34, %v6268_v1  ;;  %v1851_v63 = vadd.f32 %v6273_v0, %v1850_v30  ;;  %vm1891_vm1 = vweird.f32 %v4710_v34  ;;  %v1928_v5 = vmul.f32 %v6284_v12, %v1927_v33 }
 0x50c   :  { %v1901_v17 = vmul.f32 %v4712_v50, %v6271_v4  ;;  %v1866_v19 = vadd.f32 %v6277_v21, %v1865_v46  ;;  %v4714_v3 = vpop.eup %4713  ;;  %vm1906_vm3 = vweird.f32 %v4712_v50  ;;  %vm1892_vm4 = vmor %vm1890_vm15, %vm1891_vm1  ;;  %v1943_v1 = vmul.f32 %v6287_v23, %v1942_v20 }
 0x50d   :  { %v1887_v37 = vsub.f32 1.0, %v1886_v58  ;;  %v4716_v51 = vpop.eup %4715  ;;  %v1855_v62 = vsel %vm6315_vm14, %v6273_v0, %v1851_v63  ;;  %vm1907_vm6 = vmor %vm1905_vm5, %vm1906_vm3  ;;  %v1912_v0 = vor.u32 1.1754944e-38, %v1911_v16  ;;  %v1929_v35 = vadd.f32 %v6284_v12, %v1928_v5 }
 0x50e   :  { %v1902_v7 = vsub.f32 1.0, %v1901_v17  ;;  %v1870_v36 = vsel %vm6326_vm2, %v6277_v21, %v1866_v19  ;;  %v1860_v8 = vsel %vm6293_vm8, %v1859_v10, %v1855_v62  ;;  %vm1931_vm8 = vweird.f32 %v6284_v12 }
 0x50f   :  { %v1888_v53 = vmul.f32 %v4710_v34, %v1887_v37  ;;  %v1875_v56 = vsel %vm1872_vm0, %v1874_v39, %v1870_v36  ;;  %v1963_v13 = vmul.f32 %v4714_v3, %v1860_v8  ;;  %v1944_v24 = vadd.f32 %v6287_v23, %v1943_v1  ;;  %vm1932_vm13 = vmor %vm1930_vm12, %vm1931_vm8 }
 0x510   :  { %v1903_v28 = vmul.f32 %v4712_v50, %v1902_v7  ;;  %v1964_v22 = vmul.f32 %v4716_v51, %v1875_v56  ;;  %vm1945_vm15 = vweird.f32 %v6265_v52  ;;  %v1949_v46 = vand.u32 2147483647, %v6265_v52 }
 0x511   :  { %v1889_v60 = vadd.f32 %v4710_v34, %v1888_v53  ;;  %vm1947_vm14 = vmor %vm1945_vm15, %vm1946_vm10  ;;  %v1937_v58 = vor.u32 1.1754944e-38, %v1936_v38  ;;  %vm2428_vm3 = vcmask 1044480  }
 0x512   :  { %v1904_v32 = vadd.f32 %v4712_v50, %v1903_v28  ;;  %v1948_v63 = vsel %vm1947_vm14, %v6287_v23, %v1944_v24  ;;  %vm1950_vm2 = vcmp.eq.f32.partialorder %v1949_v46, 8.507059e+37 }
 0x513   :  { %v1893_v21 = vsel %vm1892_vm4, %v4710_v34, %v1889_v60 }
 0x514   :  { %v1898_v55 = vsel %vm1895_vm7, %v1897_v48, %v1893_v21  ;;  %v1908_v49 = vsel %vm1907_vm6, %v4712_v50, %v1904_v32  ;;  %v1933_v50 = vsel %vm1932_vm13, %v6284_v12, %v1929_v35 }
 0x515   :  { %v1913_v61 = vsel %vm1910_vm9, %v1912_v0, %v1908_v49  ;;  %v1961_v4 = vmul.f32 %v1957_v18, %v1898_v55  ;;  %v1951_v18 = vand.u32 2147483648, %v6265_v52 }
 0x516   :  { %v1962_v14 = vmul.f32 %v1958_v26, %v1913_v61  ;;  %v1934_v26 = vand.u32 2147483647, %v6262_v57 }
 0x517   :  { %v6344_v30 = vadd.f32 %v1963_v13, %v1961_v4  ;;  %v1952_v10 = vor.u32 1.1754944e-38, %v1951_v18 }
 0x518   :  { %v6347_v34 = vadd.f32 %v1964_v22, %v1962_v14  ;;  %vm1935_vm1 = vcmp.eq.f32.partialorder %v1934_v26, 8.507059e+37 }
 0x519   :  { %4717 = vtanh.f32 %v6344_v30  ;;  %v1938_v19 = vsel %vm1935_vm1, %v1937_v58, %v1933_v50  ;;  %v1953_v31 = vsel %vm1950_vm2, %v1952_v10, %v1948_v63 }
 0x51a   :  { %4719 = vtanh.f32 %v6347_v34 }
 0x51f   :  { %v4718_v17 = vpop.eup %4717 }
 0x520   :  { %v4720_v25 = vpop.eup %4719  ;;  %v1969_v57 = vmul.f32 %v4718_v17, %v1938_v19 }
 0x521   :  { %v1970_v37 = vmul.f32 %v4720_v25, %v1953_v31 }
 0x522   :  { %v1971_v43 = vpack.c.bf16 %v1969_v57, %v1969_v57  ;;  %v6363_v3 = vsel %vm2428_vm3, %v6216_v41, %v1969_v57 }
 0x523   :  { %v1972_v52 = vpack.c.bf16 %v1970_v37, %v1970_v37  ;;  %v6366_v12 = vsel %vm2428_vm3, %v6219_v6, %v1970_v37 }
 0x524   :  { %v1975_v33 = vunpack.c.l.b16 %v1971_v43 }
 0x525   :  { %v1976_v23 = vunpack.c.l.b16 %v1972_v52 }
 0x526   :  { %v1977_v27 = vrot.slane %v1975_v33, 5 }
 0x527   :  { %v1978_v7 = vrot.slane %v1976_v23, 4 }
 0x529   :  { %v1979_v16 = vsel %vm868_vm11, %v1978_v7, %v1977_v27 }
 0x52a   :  { %v1980_v45 = vpack.c.b16 %v1979_v16, %v1979_v16  ;;  %v2180_v16 = vrot.slane %v6344_v30, 7 }
 0x52c   :  { %1990 = vmatmul.bf16.vlgmr.msrb.gmra.mxu1 %v1980_v45  ;;  %2003 = vmatmul.bf16.vlgmr.msrb.gmra.mxu2 %v1980_v45 }
 0x52d   :  { %2016 = vmatmul.bf16.vlgmr.msrb.gmra.mxu3 %v1980_v45  ;;  %2029 = vmatmul.bf16.vlgmr.msra.gmra.mxu0 %v1980_v45 }
 0x5a9   :  { %v1991_v51 = vpop.f32.mrf.mxu1 }
 0x5aa   :  { %v2038_v53 = vrot.slane %v1991_v51, 2  ;;  %v2042_v62 = vrot.slane %v1991_v51, 3  ;;  %v2030_v41 = vpop.f32.mrf.mxu0 }
 0x5ab   :  { %v2041_v40 = vrot.slane %v2030_v41, 2  ;;  %v2045_v44 = vrot.slane %v2030_v41, 3 }
 0x5ac   :  { %v2054_v6 = vadd.f32 %v2038_v53, %v6961_v42  ;;  %v2058_v28 = vadd.f32 %v2042_v62, %v6962_v47  ;;  %v2181_v53 = vrot.slane %v6347_v34, 7 }
 0x5ad   :  { %v2057_v36 = vadd.f32 %v2041_v40, %v6963_v54  ;;  %v2061_v2 = vadd.f32 %v2045_v44, %v6964_v59 }
 0x5ae   :  { %v3888_v20 = vmul.f32 -1.442695, %v2054_v6  ;;  %v3889_v39 = vmul.f32 -1.442695, %v2058_v28 }
 0x5af   :  { %v3892_v60 = vmul.f32 -1.442695, %v2057_v36  ;;  %v3893_v48 = vmul.f32 -1.442695, %v2061_v2  ;;  %v2004_v8 = vpop.f32.mrf.mxu2 }
 0x5b0   :  { %4721 = vpow2.f32 %v3888_v20  ;;  %v2039_v32 = vrot.slane %v2004_v8, 2  ;;  %v2043_v0 = vrot.slane %v2004_v8, 3  ;;  %v2017_v56 = vpop.f32.mrf.mxu3 }
 0x5b1   :  { %4723 = vpow2.f32 %v3889_v39  ;;  %v1993_v21 = vpop.f32.mrf.mxu1  ;;  %v2040_v50 = vrot.slane %v2017_v56, 2  ;;  %v2044_v63 = vrot.slane %v2017_v56, 3 }
 0x5b2   :  { %4725 = vpow2.f32 %v3892_v60  ;;  %v2055_v5 = vadd.f32 %v2039_v32, %v6965_v9  ;;  %v2059_v55 = vadd.f32 %v2043_v0, %v6966_v29  ;;  %v2032_v49 = vpop.f32.mrf.mxu0 }
 0x5b3   :  { %4727 = vpow2.f32 %v3893_v48  ;;  %v2056_v31 = vadd.f32 %v2040_v50, %v6967_v11  ;;  %v2060_v43 = vadd.f32 %v2044_v63, %v6968_v15 }
 0x5b4   :  { %v3890_v1 = vmul.f32 -1.442695, %v2055_v5  ;;  %v3891_v61 = vmul.f32 -1.442695, %v2059_v55 }
 0x5b6   :  { %v4722_v4 = vpop.eup %4721  ;;  %4729 = vpow2.f32 %v3890_v1 }
 0x5b7   :  { %v4724_v13 = vpop.eup %4723  ;;  %v2068_v14 = vadd.f32 1.0, %v4722_v4  ;;  %4731 = vpow2.f32 %v3891_v61  ;;  %v2006_v22 = vpop.f32.mrf.mxu2 }
 0x5b8   :  { %v4726_v35 = vpop.eup %4725  ;;  %v6375_v38 = vadd.f32 1.0, %v4724_v13  ;;  %v2019_v24 = vpop.f32.mrf.mxu3  ;;  %v3960_v13 = vld [vmem:[#allocation14 + $0x78] sm:$0xf0] }
 0x5b9   :  { %v4728_v18 = vpop.eup %4727  ;;  %4733 = vrcp.f32 %v2068_v14  ;;  %v6377_v26 = vadd.f32 1.0, %v4726_v35  ;;  %v2079_v33 = vand.u32 2147483647, %v2068_v14  ;;  %v2081_v7 = vand.u32 2147483648, %v2068_v14 }
 0x5ba   :  { %4735 = vrcp.f32 %v6375_v38  ;;  %v6380_v46 = vadd.f32 1.0, %v4728_v18  ;;  %vm2075_vm0 = vweird.f32 %v2068_v14  ;;  %vm2090_vm5 = vweird.f32 %v6375_v38 }
 0x5bb   :  { %4737 = vrcp.f32 %v6377_v26  ;;  %vm6408_vm4 = vcmp.eq.f32.partialorder %v2079_v33, 8.507059e+37  ;;  %v2082_v2 = vor.u32 1.1754944e-38, %v2081_v7  ;;  %v2094_v60 = vand.u32 2147483647, %v6375_v38 }
 0x5bc   :  { %v4730_v58 = vpop.eup %4729  ;;  %4739 = vrcp.f32 %v6380_v46  ;;  %v2096_v32 = vand.u32 2147483648, %v6375_v38  ;;  %v2159_v44 = vand.u32 2147483648, %v6377_v26 }
 0x5bd   :  { %v4732_v10 = vpop.eup %4731  ;;  %v6383_v17 = vadd.f32 1.0, %v4730_v58  ;;  %vm2095_vm15 = vcmp.eq.f32.partialorder %v2094_v60, 8.507059e+37 }
 0x5be   :  { %v6386_v19 = vadd.f32 1.0, %v4732_v10  ;;  %v2097_v50 = vor.u32 1.1754944e-38, %v2096_v32 }
 0x5bf   :  { %v6388_v25 = vpop.eup %4733  ;;  %4741 = vrcp.f32 %v6383_v17  ;;  %vm2113_vm9 = vweird.f32 %v6383_v17  ;;  %v2119_v21 = vand.u32 2147483648, %v6383_v17 }
 0x5c0   :  { %v6392_v57 = vpop.eup %4735  ;;  %v2071_v37 = vmul.f32 %v6388_v25, %v2068_v14  ;;  %4743 = vrcp.f32 %v6386_v19  ;;  %vm2076_vm6 = vweird.f32 %v6388_v25  ;;  %v2134_v55 = vand.u32 2147483648, %v6386_v19 }
 0x5c1   :  { %v2086_v52 = vmul.f32 %v6392_v57, %v6375_v38  ;;  %v6399_v23 = vpop.eup %4737  ;;  %4745 = vtanh.f32 %v2056_v31  ;;  %vm2091_vm7 = vweird.f32 %v6392_v57  ;;  %vm6430_vm8 = vmor %vm2075_vm0, %vm2076_vm6  ;;  %v2117_v14 = vand.u32 2147483647, %v6383_v17 }
 0x5c2   :  { %v2072_v27 = vsub.f32 1.0, %v2071_v37  ;;  %v6402_v51 = vpop.eup %4739  ;;  %4747 = vtanh.f32 %v2060_v43  ;;  %v2149_v40 = vmul.f32 %v6399_v23, %v6377_v26  ;;  %vm6441_vm12 = vmor %vm2090_vm5, %vm2091_vm7  ;;  %v2132_v24 = vand.u32 2147483647, %v6386_v19 }
 0x5c3   :  { %v2087_v45 = vsub.f32 1.0, %v2086_v52  ;;  %v2164_v48 = vmul.f32 %v6402_v51, %v6380_v46  ;;  %v2120_v38 = vor.u32 1.1754944e-38, %v2119_v21  ;;  %vm2128_vm1 = vweird.f32 %v6386_v19 }
 0x5c4   :  { %v2073_v62 = vmul.f32 %v6388_v25, %v2072_v27  ;;  %v2150_v56 = vsub.f32 1.0, %v2149_v40  ;;  %vm2118_vm3 = vcmp.eq.f32.partialorder %v2117_v14, 8.507059e+37  ;;  %vm2133_vm0 = vcmp.eq.f32.partialorder %v2132_v24, 8.507059e+37 }
 0x5c5   :  { %v4742_v41 = vpop.eup %4741  ;;  %v2088_v6 = vmul.f32 %v6392_v57, %v2087_v45  ;;  %v2165_v18 = vsub.f32 1.0, %v2164_v48  ;;  %vm2169_vm5 = vweird.f32 %v6402_v51  ;;  %vm2153_vm6 = vweird.f32 %v6377_v26 }
 0x5c6   :  { %v4744_v28 = vpop.eup %4743  ;;  %v2109_v36 = vmul.f32 %v4742_v41, %v6383_v17  ;;  %v2074_v34 = vadd.f32 %v6388_v25, %v2073_v62  ;;  %vm2114_vm10 = vweird.f32 %v4742_v41  ;;  %v2151_v37 = vmul.f32 %v6399_v23, %v2150_v56 }
 0x5c7   :  { %v2124_v20 = vmul.f32 %v4744_v28, %v6386_v19  ;;  %v2089_v39 = vadd.f32 %v6392_v57, %v2088_v6  ;;  %v4746_v0 = vpop.eup %4745  ;;  %vm2129_vm13 = vweird.f32 %v4744_v28  ;;  %vm2115_vm14 = vmor %vm2113_vm9, %vm2114_vm10  ;;  %v2166_v17 = vmul.f32 %v6402_v51, %v2165_v18 }
 0x5c8   :  { %v2110_v8 = vsub.f32 1.0, %v2109_v36  ;;  %v4748_v1 = vpop.eup %4747  ;;  %v2078_v4 = vsel %vm6430_vm8, %v6388_v25, %v2074_v34  ;;  %vm2130_vm2 = vmor %vm2128_vm1, %vm2129_vm13  ;;  %v2135_v25 = vor.u32 1.1754944e-38, %v2134_v55  ;;  %v2152_v40 = vadd.f32 %v6399_v23, %v2151_v37 }
 0x5c9   :  { %v2125_v5 = vsub.f32 1.0, %v2124_v20  ;;  %v2093_v35 = vsel %vm6441_vm12, %v6392_v57, %v2089_v39  ;;  %v2083_v63 = vsel %vm6408_vm4, %v2082_v2, %v2078_v4  ;;  %vm2154_vm4 = vweird.f32 %v6399_v23  ;;  %v4367_v4 = vld [vmem:[#allocation14 + $0x74] sm:$0xf] }
 0x5ca   :  { %v2111_v61 = vmul.f32 %v4742_v41, %v2110_v8  ;;  %v2098_v31 = vsel %vm2095_vm15, %v2097_v50, %v2093_v35  ;;  %v2186_v27 = vmul.f32 %v4746_v0, %v2083_v63  ;;  %v2167_v30 = vadd.f32 %v6402_v51, %v2166_v17  ;;  %vm2155_vm7 = vmor %vm2153_vm6, %vm2154_vm4 }
 0x5cb   :  { %v2126_v22 = vmul.f32 %v4744_v28, %v2125_v5  ;;  %v2187_v45 = vmul.f32 %v4748_v1, %v2098_v31  ;;  %vm2168_vm9 = vweird.f32 %v6380_v46  ;;  %v2172_v6 = vand.u32 2147483647, %v6380_v46  ;;  %v3958_v1 = vld [vmem:[#allocation14 + $0x70] sm:$0xf]  ;;  %v4365_v31 = vld [vmem:[#allocation14 + $0x64] sm:$0xf] }
 0x5cc   :  { %v2112_v58 = vadd.f32 %v4742_v41, %v2111_v61  ;;  %vm2170_vm8 = vmor %vm2168_vm9, %vm2169_vm5  ;;  %v2160_v36 = vor.u32 1.1754944e-38, %v2159_v44  ;;  %vm2431_vm13 = vcmask 1045504   ;;  %v4368_v61 = vld [vmem:[#allocation14 + $0x74] sm:$0xf0] }
 0x5cd   :  { %v2127_v10 = vadd.f32 %v4744_v28, %v2126_v22  ;;  %v2171_v34 = vsel %vm2170_vm8, %v6402_v51, %v2167_v30  ;;  %vm2173_vm12 = vcmp.eq.f32.partialorder %v2172_v6, 8.507059e+37  ;;  %v3963_v22 = vor.u32 %v4367_v4, %v3960_v13  ;;  %v4364_v44 = vld [vmem:[#allocation14 + $0x54] sm:$0xf0]  ;;  %v4363_v30 = vld [vmem:[#allocation14 + $0x54] sm:$0xf] }
 0x5ce   :  { %v2116_v57 = vsel %vm2115_vm14, %v4742_v41, %v2112_v58  ;;  %v3950_v58 = vld [vmem:[#allocation14 + $0x60] sm:$0xf]  ;;  %v4359_v4 = vld [vmem:[#allocation14 + $0x34] sm:$0xf] }
 0x5cf   :  { %v2121_v43 = vsel %vm2118_vm3, %v2120_v38, %v2116_v57  ;;  %v2131_v52 = vsel %vm2130_vm2, %v4744_v28, %v2127_v10  ;;  %v2156_v28 = vsel %vm2155_vm7, %v6399_v23, %v2152_v40  ;;  %2554 = vmatpush.bf16.msrb.mxu2 %v3963_v22  ;;  %v4366_v38 = vld [vmem:[#allocation14 + $0x64] sm:$0xf0]  ;;  %v3952_v57 = vld [vmem:[#allocation14 + $0x68] sm:$0xf0]  ;;  %v3918_v22 = vld [vmem:[#allocation14 + $0x20] sm:$0xf] }
 0x5d0   :  { %v2136_v33 = vsel %vm2133_vm0, %v2135_v25, %v2131_v52  ;;  %v2184_v19 = vmul.f32 %v2180_v16, %v2121_v43  ;;  %v2174_v16 = vand.u32 2147483648, %v6380_v46  ;;  %v3951_v25 = vor.u32 %v4366_v38, %v3950_v58  ;;  %v3910_v58 = vld [vmem:[#allocation14 + $0x10] sm:$0xf]  ;;  %v4356_v38 = vld [vmem:[#allocation14 + $0x14] sm:$0xf0] }
 0x5d1   :  { %v2185_v7 = vmul.f32 %v2181_v53, %v2136_v33  ;;  %v2157_v53 = vand.u32 2147483647, %v6377_v26  ;;  %v3955_v52 = vor.u32 %v4365_v31, %v3952_v57 }
 0x5d2   :  { %v6459_v62 = vadd.f32 %v2186_v27, %v2184_v19  ;;  %v2175_v2 = vor.u32 1.1754944e-38, %v2174_v16 }
 0x5d3   :  { %v6462_v41 = vadd.f32 %v2187_v45, %v2185_v7  ;;  %vm2158_vm10 = vcmp.eq.f32.partialorder %v2157_v53, 8.507059e+37  ;;  %2555 = vmatpush.bf16.msrb.mxu2 %v3955_v52  ;;  %v3942_v45 = vld [vmem:[#allocation14 + $0x50] sm:$0xf] }
 0x5d4   :  { %4749 = vtanh.f32 %v6459_v62  ;;  %v2161_v39 = vsel %vm2158_vm10, %v2160_v36, %v2156_v28  ;;  %v2176_v48 = vsel %vm2173_vm12, %v2175_v2, %v2171_v34  ;;  %v3943_v16 = vor.u32 %v4364_v44, %v3942_v45  ;;  %v3934_v34 = vld [vmem:[#allocation14 + $0x40] sm:$0xf]  ;;  %v4362_v2 = vld [vmem:[#allocation14 + $0x44] sm:$0xf0]  ;;  %v3912_v45 = vld [vmem:[#allocation14 + $0x18] sm:$0xf0] }
 0x5d5   :  { %4751 = vtanh.f32 %v6462_v41  ;;  %v2403_v44 = vrot.slane %v6459_v62, 7 }
 0x5da   :  { %v4750_v20 = vpop.eup %4749 }
 0x5db   :  { %v4752_v60 = vpop.eup %4751  ;;  %v2192_v26 = vmul.f32 %v4750_v20, %v2161_v39  ;;  %v4361_v20 = vld [vmem:[#allocation14 + $0x44] sm:$0xf] }
 0x5dc   :  { %v2193_v8 = vmul.f32 %v4752_v60, %v2176_v48  ;;  %v3935_v48 = vor.u32 %v4362_v2, %v3934_v34  ;;  %v4353_v2 = vld [vmem:[#allocation14 + $0x4] sm:$0xf] }
 0x5dd   :  { %v2194_v32 = vpack.c.bf16 %v2192_v26, %v2192_v26  ;;  %v6478_v0 = vsel %vm2431_vm13, %v6363_v3, %v2192_v26  ;;  %v3959_v3 = vor.u32 %v4368_v61, %v3958_v1  ;;  %v3936_v26 = vld [vmem:[#allocation14 + $0x48] sm:$0xf0] }
 0x5de   :  { %v2195_v46 = vpack.c.bf16 %v2193_v8, %v2193_v8  ;;  %v6481_v23 = vsel %vm2431_vm13, %v6366_v12, %v2193_v8  ;;  %v3939_v8 = vor.u32 %v4361_v20, %v3936_v26  ;;  %v3904_v20 = vld [vmem:[#allocation14 + $0x8] sm:$0xf0] }
 0x5df   :  { %v2198_v56 = vunpack.c.l.b16 %v2194_v32  ;;  %2540 = vmatpush.bf16.msrb.mxu1 %v3959_v3  ;;  %v3928_v3 = vld [vmem:[#allocation14 + $0x38] sm:$0xf0] }
 0x5e0   :  { %v2199_v51 = vunpack.c.l.b16 %v2195_v46 }
 0x5e1   :  { %v2200_v21 = vrot.slane %v2198_v56, 6 }
 0x5e2   :  { %v2201_v5 = vrot.slane %v2199_v51, 5  ;;  %v4360_v51 = vld [vmem:[#allocation14 + $0x34] sm:$0xf0] }
 0x5e3   :  { %2541 = vmatpush.bf16.msrb.mxu1 %v3951_v25  ;;  %v3931_v25 = vor.u32 %v4359_v4, %v3928_v3  ;;  %v2454_v4 = vld [vmem:[%s6792_s13] sm:$0x3]  ;;  %s6637_s13 = smov 0  }
 0x5e4   :  { %v2202_v55 = vsel %vm868_vm11, %v2201_v5, %v2200_v21 }
 0x5e5   :  { %v2203_v49 = vpack.c.b16 %v2202_v55, %v2202_v55 }
 0x5e7   :  { %2213 = vmatmul.bf16.vlgmr.msra.gmra.mxu1 %v2203_v49  ;;  %2226 = vmatmul.bf16.vlgmr.msra.gmra.mxu2 %v2203_v49 }
 0x5e8   :  { %2239 = vmatmul.bf16.vlgmr.msra.gmra.mxu3 %v2203_v49  ;;  %2252 = vmatmul.bf16.vlgmr.msrb.gmra.mxu0 %v2203_v49 }
 0x5e9   :  { %2542 = vmatpush.bf16.msrb.mxu1 %v3943_v16  ;;  %v2404_v16 = vrot.slane %v6462_v41, 7 }
 0x5ed   :  { %2543 = vmatpush.bf16.msrb.mxu1 %v3935_v48 }
 0x664   :  { %v2214_v14 = vpop.f32.mrf.mxu1 }
 0x665   :  { %v2261_v12 = vrot.slane %v2214_v14, 1  ;;  %v2265_v35 = vrot.slane %v2214_v14, 2  ;;  %v2253_v24 = vpop.f32.mrf.mxu0 }
 0x666   :  { %v2264_v18 = vrot.slane %v2253_v24, 1  ;;  %v2268_v50 = vrot.slane %v2253_v24, 2  ;;  %v4357_v24 = vld [vmem:[#allocation14 + $0x24] sm:$0xf] }
 0x667   :  { %v2277_v63 = vadd.f32 %v2261_v12, %v6961_v42  ;;  %v2281_v10 = vadd.f32 %v2265_v35, %v6962_v47  ;;  %v4358_v12 = vld [vmem:[#allocation14 + $0x24] sm:$0xf0] }
 0x668   :  { %v2280_v37 = vadd.f32 %v2264_v18, %v6963_v54  ;;  %v2284_v43 = vadd.f32 %v2268_v50, %v6964_v59  ;;  %v3944_v59 = vld [vmem:[#allocation14 + $0x58] sm:$0xf0]  ;;  %v3920_v50 = vld [vmem:[#allocation14 + $0x28] sm:$0xf0]  ;;  %v3919_v31 = vor.u32 %v4358_v12, %v3918_v22 }
 0x669   :  { %v3894_v17 = vmul.f32 -1.442695, %v2277_v63  ;;  %v3895_v33 = vmul.f32 -1.442695, %v2281_v10  ;;  %v3947_v36 = vor.u32 %v4363_v30, %v3944_v59 }
 0x66a   :  { %v3898_v19 = vmul.f32 -1.442695, %v2280_v37  ;;  %v3899_v27 = vmul.f32 -1.442695, %v2284_v43  ;;  %v2227_v7 = vpop.f32.mrf.mxu2 }
 0x66b   :  { %4753 = vpow2.f32 %v3894_v17  ;;  %v2262_v42 = vrot.slane %v2227_v7, 1  ;;  %v2266_v40 = vrot.slane %v2227_v7, 2  ;;  %v6488_v47 = vpop.f32.mrf.mxu3  ;;  %2556 = vmatpush.bf16.msrb.mxu2 %v3947_v36  ;;  %v3923_v17 = vor.u32 %v4357_v24, %v3920_v50 }
 0x66c   :  { %4755 = vpow2.f32 %v3895_v33  ;;  %v2216_v54 = vpop.f32.mrf.mxu1  ;;  %v2263_v14 = vrot.slane %v6488_v47, 1  ;;  %v2267_v35 = vrot.slane %v6488_v47, 2  ;;  %v3911_v33 = vor.u32 %v4356_v38, %v3910_v58  ;;  %v4354_v47 = vld [vmem:[#allocation14 + $0x4] sm:$0xf0] }
 0x66d   :  { %4757 = vpow2.f32 %v3898_v19  ;;  %v2278_v53 = vadd.f32 %v2262_v42, %v6965_v9  ;;  %v2282_v6 = vadd.f32 %v2266_v40, %v6966_v29  ;;  %v2255_v28 = vpop.f32.mrf.mxu0  ;;  %v3926_v29 = vld [vmem:[#allocation14 + $0x30] sm:$0xf]  ;;  %v3902_v40 = vld [vmem:[#allocation14] sm:$0xf]  ;;  %v6626_v38 = vmov 0.0  }
 0x66e   :  { %4759 = vpow2.f32 %v3899_v27  ;;  %v3927_v49 = vor.u32 %v4360_v51, %v3926_v29  ;;  %v2279_v37 = vadd.f32 %v2263_v14, %v6967_v11  ;;  %v2283_v52 = vadd.f32 %v2267_v35, %v6968_v15  ;;  %v4355_v11 = vld [vmem:[#allocation14 + $0x14] sm:$0xf] }
 0x66f   :  { %v3896_v39 = vmul.f32 -1.442695, %v2278_v53  ;;  %v3897_v60 = vmul.f32 -1.442695, %v2282_v6  ;;  %2557 = vmatpush.bf16.msrb.mxu2 %v3939_v8  ;;  %v3915_v53 = vor.u32 %v4355_v11, %v3912_v45  ;;  %v3903_v34 = vor.u32 %v4354_v47, %v3902_v40 }
 0x670   :  { %2544 = vmatpush.bf16.msrb.mxu1 %v3927_v49 }
 0x671   :  { %v4754_v32 = vpop.eup %4753  ;;  %4761 = vpow2.f32 %v3896_v39 }
 0x672   :  { %v4756_v46 = vpop.eup %4755  ;;  %v6492_v56 = vadd.f32 1.0, %v4754_v32  ;;  %4763 = vpow2.f32 %v3897_v60  ;;  %v2229_v9 = vpop.f32.mrf.mxu2 }
 0x673   :  { %v4758_v21 = vpop.eup %4757  ;;  %v6494_v5 = vadd.f32 1.0, %v4756_v46  ;;  %v2242_v55 = vpop.f32.mrf.mxu3  ;;  %2558 = vmatpush.bf16.msrb.mxu2 %v3931_v25 }
 0x674   :  { %v4760_v1 = vpop.eup %4759  ;;  %4765 = vrcp.f32 %v6492_v56  ;;  %v6497_v61 = vadd.f32 1.0, %v4758_v21  ;;  %2545 = vmatpush.bf16.msrb.mxu1 %v3919_v31  ;;  %v2302_v7 = vand.u32 2147483647, %v6492_v56  ;;  %v2304_v15 = vand.u32 2147483648, %v6492_v56 }
 0x675   :  { %4767 = vrcp.f32 %v6494_v5  ;;  %v6500_v13 = vadd.f32 1.0, %v4760_v1  ;;  %vm2298_vm15 = vweird.f32 %v6492_v56  ;;  %v2317_v36 = vand.u32 2147483647, %v6494_v5 }
 0x676   :  { %4769 = vrcp.f32 %v6497_v61  ;;  %vm6533_vm14 = vcmp.eq.f32.partialorder %v2302_v7, 8.507059e+37  ;;  %v2305_v48 = vor.u32 1.1754944e-38, %v2304_v15  ;;  %vm2313_vm1 = vweird.f32 %v6494_v5 }
 0x677   :  { %v4762_v18 = vpop.eup %4761  ;;  %4771 = vrcp.f32 %v6500_v13  ;;  %2559 = vmatpush.bf16.msrb.mxu2 %v3923_v17  ;;  %v3907_v21 = vor.u32 %v4353_v2, %v3904_v20  ;;  %vm6549_vm0 = vcmp.eq.f32.partialorder %v2317_v36, 8.507059e+37  ;;  %v2319_v3 = vand.u32 2147483648, %v6494_v5 }
 0x678   :  { %v4764_v63 = vpop.eup %4763  ;;  %v6505_v10 = vadd.f32 1.0, %v4762_v18  ;;  %2546 = vmatpush.bf16.msrb.mxu1 %v3911_v33  ;;  %v2382_v36 = vand.u32 2147483648, %v6497_v61  ;;  %v2395_v2 = vand.u32 2147483647, %v6500_v13 }
 0x679   :  { %v6508_v57 = vadd.f32 1.0, %v4764_v63 }
 0x67a   :  { %v6511_v43 = vpop.eup %4765  ;;  %4773 = vrcp.f32 %v6505_v10  ;;  %v2342_v22 = vand.u32 2147483648, %v6505_v10  ;;  %v2340_v18 = vand.u32 2147483647, %v6505_v10  ;;  %vm2336_vm9 = vweird.f32 %v6505_v10 }
 0x67b   :  { %v6515_v19 = vpop.eup %4767  ;;  %v2294_v27 = vmul.f32 %v6511_v43, %v6492_v56  ;;  %4775 = vrcp.f32 %v6508_v57  ;;  %vm2299_vm2 = vweird.f32 %v6511_v43  ;;  %2560 = vmatpush.bf16.msrb.mxu2 %v3915_v53  ;;  %v2357_v35 = vand.u32 2147483648, %v6508_v57 }
 0x67c   :  { %v2309_v42 = vmul.f32 %v6515_v19, %v6494_v5  ;;  %4777 = vtanh.f32 %v2279_v37  ;;  %v6525_v54 = vpop.eup %4769  ;;  %vm2314_vm3 = vweird.f32 %v6515_v19  ;;  %2547 = vmatpush.bf16.msrb.mxu1 %v3903_v34  ;;  %vm6560_vm4 = vmor %vm2298_vm15, %vm2299_vm2  ;;  %v2355_v56 = vand.u32 2147483647, %v6508_v57 }
 0x67d   :  { %v2295_v30 = vsub.f32 1.0, %v2294_v27  ;;  %4779 = vtanh.f32 %v2283_v52  ;;  %v6528_v6 = vpop.eup %4771  ;;  %v2372_v32 = vmul.f32 %v6525_v54, %v6497_v61  ;;  %vm6572_vm6 = vmor %vm2313_vm1, %vm2314_vm3  ;;  %v2343_v5 = vor.u32 1.1754944e-38, %v2342_v22 }
 0x67e   :  { %v2310_v59 = vsub.f32 1.0, %v2309_v42  ;;  %v2387_v49 = vmul.f32 %v6528_v6, %v6500_v13  ;;  %vm2351_vm10 = vweird.f32 %v6508_v57  ;;  %v2358_v27 = vor.u32 1.1754944e-38, %v2357_v35 }
 0x67f   :  { %v2296_v28 = vmul.f32 %v6511_v43, %v2295_v30  ;;  %v2373_v63 = vsub.f32 1.0, %v2372_v32  ;;  %2561 = vmatpush.bf16.msrb.mxu2 %v3907_v21  ;;  %vm2341_vm13 = vcmp.eq.f32.partialorder %v2340_v18, 8.507059e+37  ;;  %vm2356_vm15 = vcmp.eq.f32.partialorder %v2355_v56, 8.507059e+37 }
 0x680   :  { %v4774_v39 = vpop.eup %4773  ;;  %v2311_v26 = vmul.f32 %v6515_v19, %v2310_v59  ;;  %v2388_v37 = vsub.f32 1.0, %v2387_v49  ;;  %vm2377_vm1 = vweird.f32 %v6525_v54  ;;  %vm2392_vm2 = vweird.f32 %v6528_v6 }
 0x681   :  { %v4776_v8 = vpop.eup %4775  ;;  %v2332_v46 = vmul.f32 %v4774_v39, %v6505_v10  ;;  %v2297_v9 = vadd.f32 %v6511_v43, %v2296_v28  ;;  %vm2337_vm5 = vweird.f32 %v4774_v39  ;;  %v2374_v11 = vmul.f32 %v6525_v54, %v2373_v63  ;;  %v6989_v63 = vld [vmem:[#allocation31_spill] sm:$0xff] }
 0x682   :  { %v2347_v29 = vmul.f32 %v4776_v8, %v6508_v57  ;;  %v2312_v51 = vadd.f32 %v6515_v19, %v2311_v26  ;;  %v4778_v55 = vpop.eup %4777  ;;  %vm2352_vm7 = vweird.f32 %v4776_v8  ;;  %vm2338_vm8 = vmor %vm2336_vm9, %vm2337_vm5  ;;  %v2389_v42 = vmul.f32 %v6528_v6, %v2388_v37 }
 0x683   :  { %v2333_v1 = vsub.f32 1.0, %v2332_v46  ;;  %v4780_v14 = vpop.eup %4779  ;;  %v2301_v58 = vsel %vm6560_vm4, %v6511_v43, %v2297_v9  ;;  %v2320_v43 = vor.u32 1.1754944e-38, %v2319_v3  ;;  %vm2353_vm12 = vmor %vm2351_vm10, %vm2352_vm7  ;;  %v2375_v28 = vadd.f32 %v6525_v54, %v2374_v11 }
 0x684   :  { %v2348_v12 = vsub.f32 1.0, %v2347_v29  ;;  %v2316_v31 = vsel %vm6572_vm6, %v6515_v19, %v2312_v51  ;;  %v2306_v17 = vsel %vm6533_vm14, %v2305_v48, %v2301_v58  ;;  %vm2376_vm14 = vweird.f32 %v6497_v61 }
 0x685   :  { %v2334_v50 = vmul.f32 %v4774_v39, %v2333_v1  ;;  %v2321_v7 = vsel %vm6549_vm0, %v2320_v43, %v2316_v31  ;;  %v2409_v40 = vmul.f32 %v4778_v55, %v2306_v17  ;;  %v2390_v62 = vadd.f32 %v6528_v6, %v2389_v42  ;;  %vm2378_vm0 = vmor %vm2376_vm14, %vm2377_vm1 }
 0x686   :  { %v2349_v25 = vmul.f32 %v4776_v8, %v2348_v12  ;;  %v2410_v30 = vmul.f32 %v4780_v14, %v2321_v7  ;;  %vm2391_vm3 = vweird.f32 %v6500_v13  ;;  %v2383_v60 = vor.u32 1.1754944e-38, %v2382_v36 }
 0x687   :  { %v2335_v52 = vadd.f32 %v4774_v39, %v2334_v50  ;;  %vm2393_vm4 = vmor %vm2391_vm3, %vm2392_vm2  ;;  %vm2396_vm6 = vcmp.eq.f32.partialorder %v2395_v2, 8.507059e+37  ;;  %vm2434_vm7 = vcmask 1046528   ;;  %v2456_v3 = vperm.slane %v2454_v4, 0 }
 0x688   :  { %v2350_v33 = vadd.f32 %v4776_v8, %v2349_v25  ;;  %v2394_v48 = vsel %vm2393_vm4, %v6528_v6, %v2390_v62  ;;  %v2598_v6 = vlaneseq  ;;  %v2457_v22 = vperm.slane %v2454_v4, 1 }
 0x689   :  { %v2339_v19 = vsel %vm2338_vm8, %v4774_v39, %v2335_v52  ;;  %v2379_v39 = vsel %vm2378_vm0, %v6525_v54, %v2375_v28  ;;  %v6624_v58 = vmov 0   ;;  %v6628_v56 = vmov 0.0  }
 0x68a   :  { %v2344_v10 = vsel %vm2341_vm13, %v2343_v5, %v2339_v19  ;;  %v2354_v45 = vsel %vm2353_vm12, %v4776_v8, %v2350_v33  ;;  %v6611_v1 = vand.u32 127, %v2598_v6 }
 0x68b   :  { %v2359_v15 = vsel %vm2356_vm15, %v2358_v27, %v2354_v45  ;;  %v2407_v57 = vmul.f32 %v2403_v44, %v2344_v10  ;;  %v2380_v44 = vand.u32 2147483647, %v6497_v61 }
 0x68c   :  { %v2408_v47 = vmul.f32 %v2404_v16, %v2359_v15  ;;  %v2397_v16 = vand.u32 2147483648, %v6500_v13 }
 0x68d   :  { %v2411_v59 = vadd.f32 %v2409_v40, %v2407_v57  ;;  %vm2381_vm5 = vcmp.eq.f32.partialorder %v2380_v44, 8.507059e+37 }
 0x68e   :  { %v2412_v53 = vadd.f32 %v2410_v30, %v2408_v47  ;;  %v2398_v26 = vor.u32 1.1754944e-38, %v2397_v16  ;;  %v2384_v32 = vsel %vm2381_vm5, %v2383_v60, %v2379_v39 }
 0x68f   :  { %4781 = vtanh.f32 %v2411_v59  ;;  %v2608_v34 = vrot.slane %v2411_v59, 7 }
 0x690   :  { %4783 = vtanh.f32 %v2412_v53  ;;  %v2609_v41 = vrot.slane %v2412_v53, 6  ;;  %v2399_v9 = vsel %vm2396_vm6, %v2398_v26, %v2394_v48 }
 0x692   :  { %v2610_v20 = vsel %vm868_vm11, %v2609_v41, %v2608_v34  }
 0x695   :  { %v4782_v8 = vpop.eup %4781 }
 0x696   :  { %v4784_v46 = vpop.eup %4783  ;;  %v2415_v61 = vmul.f32 %v4782_v8, %v2384_v32 }
 0x697   :  { %v2416_v29 = vmul.f32 %v4784_v46, %v2399_v9 }
 0x698   :  { %v2435_v13 = vsel %vm2434_vm7, %v6478_v0, %v2415_v61  ;;  %v2602_v51 = vrot.slane %v2415_v61, 7 }
 0x699   :  { %v2436_v21 = vsel %vm2434_vm7, %v6481_v23, %v2416_v29  ;;  %v2603_v54 = vrot.slane %v2416_v29, 6 }
 0x69a   :  { %v2437_v55 = vpack.c.bf16 %v2436_v21, %v2435_v13 }
 0x69b   :  { %v2604_v49 = vsel %vm868_vm11, %v2603_v54, %v2602_v51  }
 0x69c   :  { %2548 = vmatmul.bf16.vlgmr.msrb.gmra.mxu1 %v2437_v55  ;;  %2562 = vmatmul.bf16.vlgmr.msrb.gmra.mxu2 %v2437_v55 }
 0x719   :  { %v2549_v14 = vpop.f32.mrf.mxu1 }
 0x71a   :  { %v6616_v0 = vadd.f32 %v2549_v14, %v2456_v3 }
 0x71f   :  { %v2563_v23 = vpop.f32.mrf.mxu2 }
 0x720   :  { %v6618_v12 = vadd.f32 %v2563_v23, %v2457_v22 }
 0x721   :  { %v2551_v35 = vpop.f32.mrf.mxu1 }
 0x722   :  { %v6620_v24 = vadd.f32 %v2551_v35, %v2456_v3 }
 0x727   :  { %v2565_v18 = vpop.f32.mrf.mxu2 }
 0x728   :  { %v6622_v50 = vadd.f32 %v2565_v18, %v2457_v22 }
 0x729 LB: > { %v4078_v25 = vld [vmem:[#allocation8 + $0xe0] sm:$0xf]  ;;  %v4399_v31 = vld [vmem:[#allocation8 + $0xec] sm:$0xf0]  ;;  %v4397_v37 = vld [vmem:[#allocation8 + $0xe4] sm:$0xf]  ;;  %s5136_s13 = sphi %s6637_s13, %s2617_s13   ;;  %v5132_v49 = vphi %v2604_v49, %v6694_v49   ;;  %v5128_v20 = vphi %v2610_v20, %v6691_v20   ;;  %v5124_v63 = vphi %v6989_v63, %v3528_v63   ;;  %v5120_v56 = vphi %v6628_v56, %v3490_v56   ;;  %v5116_v38 = vphi %v6626_v38, %v7007_v38   ;;  %v5112_v58 = vphi %v6624_v58, %v7006_v58  }
 0x72a   : > { %v4079_v43 = vor.u32 %v4399_v31, %v4078_v25  ;;  %v4080_v52 = vld [vmem:[#allocation8 + $0xf0] sm:$0xf0]  ;;  %v4429_v5 = vld [vmem:[#allocation8 + $0x1e4] sm:$0xf]  ;;  %v4206_v7 = vld [vmem:[#allocation8 + $0x1e0] sm:$0xf] }
 0x72b   : > { %v4208_v17 = vld [vmem:[#allocation8 + $0x1f0] sm:$0xf0]  ;;  %v4083_v33 = vor.u32 %v4397_v37, %v4080_v52  ;;  %v4431_v19 = vld [vmem:[#allocation8 + $0x1ec] sm:$0xf0]  ;;  %v4062_v11 = vld [vmem:[#allocation8 + $0xc0] sm:$0xf] }
 0x72c   : > { %v4211_v27 = vor.u32 %v4429_v5, %v4208_v17  ;;  %3010 = vmatpush.bf16.msra.mxu0 %v4079_v43  ;;  %v4207_v10 = vor.u32 %v4431_v19, %v4206_v7  ;;  %v4395_v45 = vld [vmem:[#allocation8 + $0xcc] sm:$0xf0]  ;;  %v4393_v42 = vld [vmem:[#allocation8 + $0xc4] sm:$0xf]  ;;  %v4064_v15 = vld [vmem:[#allocation8 + $0xd0] sm:$0xf0] }
 0x72d   : > { %3036 = vmatpush.bf16.msra.mxu2 %v4083_v33  ;;  %v4063_v57 = vor.u32 %v4395_v45, %v4062_v11  ;;  %v4067_v40 = vor.u32 %v4393_v42, %v4064_v15  ;;  %v4425_v47 = vld [vmem:[#allocation8 + $0x1c4] sm:$0xf]  ;;  %v4192_v30 = vld [vmem:[#allocation8 + $0x1d0] sm:$0xf0]  ;;  %v4190_v59 = vld [vmem:[#allocation8 + $0x1c0] sm:$0xf] }
 0x72e   : > { %3049 = vmatpush.bf16.msra.mxu3 %v4211_v27  ;;  %3023 = vmatpush.bf16.msra.mxu1 %v4207_v10  ;;  %v4195_v53 = vor.u32 %v4425_v47, %v4192_v30  ;;  %v4427_v28 = vld [vmem:[#allocation8 + $0x1cc] sm:$0xf0]  ;;  %v4046_v36 = vld [vmem:[#allocation8 + $0xa0] sm:$0xf]  ;;  %v4389_v41 = vld [vmem:[#allocation8 + $0xa4] sm:$0xf] }
 0x72f   : > { %v4391_v34 = vld [vmem:[#allocation8 + $0xac] sm:$0xf0]  ;;  %v4191_v62 = vor.u32 %v4427_v28, %v4190_v59  ;;  %v4048_v44 = vld [vmem:[#allocation8 + $0xb0] sm:$0xf0]  ;;  %v4421_v16 = vld [vmem:[#allocation8 + $0x1a4] sm:$0xf] }
 0x730   : > { %3011 = vmatpush.bf16.msra.mxu0 %v4063_v57  ;;  %v4047_v2 = vor.u32 %v4391_v34, %v4046_v36  ;;  %v4176_v39 = vld [vmem:[#allocation8 + $0x1b0] sm:$0xf0]  ;;  %v4174_v60 = vld [vmem:[#allocation8 + $0x1a0] sm:$0xf]  ;;  %v4423_v48 = vld [vmem:[#allocation8 + $0x1ac] sm:$0xf0]  ;;  %v4051_v26 = vor.u32 %v4389_v41, %v4048_v44 }
 0x731   : > { %3037 = vmatpush.bf16.msra.mxu2 %v4067_v40  ;;  %v4179_v8 = vor.u32 %v4421_v16, %v4176_v39  ;;  %v4030_v32 = vld [vmem:[#allocation8 + $0x80] sm:$0xf]  ;;  %v4387_v46 = vld [vmem:[#allocation8 + $0x8c] sm:$0xf0]  ;;  %v4385_v9 = vld [vmem:[#allocation8 + $0x84] sm:$0xf]  ;;  %v4175_v61 = vor.u32 %v4423_v48, %v4174_v60 }
 0x732   : > { %3050 = vmatpush.bf16.msra.mxu3 %v4195_v53  ;;  %3024 = vmatpush.bf16.msra.mxu1 %v4191_v62  ;;  %v4032_v29 = vld [vmem:[#allocation8 + $0x90] sm:$0xf0]  ;;  %v4417_v13 = vld [vmem:[#allocation8 + $0x184] sm:$0xf]  ;;  %v4158_v21 = vld [vmem:[#allocation8 + $0x180] sm:$0xf]  ;;  %v4031_v55 = vor.u32 %v4387_v46, %v4030_v32 }
 0x733   : > { %v4160_v51 = vld [vmem:[#allocation8 + $0x190] sm:$0xf0]  ;;  %v4419_v54 = vld [vmem:[#allocation8 + $0x18c] sm:$0xf0]  ;;  %v4035_v4 = vor.u32 %v4385_v9, %v4032_v29  ;;  %v4014_v14 = vld [vmem:[#allocation8 + $0x60] sm:$0xf] }
 0x734   : > { %3012 = vmatpush.bf16.msra.mxu0 %v4047_v2  ;;  %v4163_v3 = vor.u32 %v4417_v13, %v4160_v51  ;;  %v4383_v22 = vld [vmem:[#allocation8 + $0x6c] sm:$0xf0]  ;;  %v4381_v23 = vld [vmem:[#allocation8 + $0x64] sm:$0xf]  ;;  %v4159_v35 = vor.u32 %v4419_v54, %v4158_v21  ;;  %v4016_v18 = vld [vmem:[#allocation8 + $0x70] sm:$0xf0] }
 0x735   : > { %3038 = vmatpush.bf16.msra.mxu2 %v4051_v26  ;;  %v4413_v25 = vld [vmem:[#allocation8 + $0x164] sm:$0xf]  ;;  %v4144_v31 = vld [vmem:[#allocation8 + $0x170] sm:$0xf0]  ;;  %v4142_v37 = vld [vmem:[#allocation8 + $0x160] sm:$0xf]  ;;  %v4015_v52 = vor.u32 %v4383_v22, %v4014_v14  ;;  %v4019_v5 = vor.u32 %v4381_v23, %v4016_v18 }
 0x736   : > { %3051 = vmatpush.bf16.msra.mxu3 %v4179_v8  ;;  %3025 = vmatpush.bf16.msra.mxu1 %v4175_v61  ;;  %v4415_v43 = vld [vmem:[#allocation8 + $0x16c] sm:$0xf0]  ;;  %v4147_v17 = vor.u32 %v4413_v25, %v4144_v31  ;;  %v3998_v33 = vld [vmem:[#allocation8 + $0x40] sm:$0xf]  ;;  %v4377_v7 = vld [vmem:[#allocation8 + $0x44] sm:$0xf] }
 0x737   : > { %v4379_v27 = vld [vmem:[#allocation8 + $0x4c] sm:$0xf0]  ;;  %v4143_v19 = vor.u32 %v4415_v43, %v4142_v37  ;;  %v4000_v11 = vld [vmem:[#allocation8 + $0x50] sm:$0xf0]  ;;  %v4409_v10 = vld [vmem:[#allocation8 + $0x144] sm:$0xf] }
 0x738   : > { %3013 = vmatpush.bf16.msra.mxu0 %v4031_v55  ;;  %v4128_v45 = vld [vmem:[#allocation8 + $0x150] sm:$0xf0]  ;;  %v4126_v42 = vld [vmem:[#allocation8 + $0x140] sm:$0xf]  ;;  %v4411_v15 = vld [vmem:[#allocation8 + $0x14c] sm:$0xf0]  ;;  %v3999_v57 = vor.u32 %v4379_v27, %v3998_v33  ;;  %v4003_v40 = vor.u32 %v4377_v7, %v4000_v11  ;;  %v6662_v33 = vpack.c.bf16 %v5124_v63, %v5124_v63  ;;  %v6666_v11 = vpack.c.bf16 %v5132_v49, %v5132_v49 }
 0x739   : > { %3039 = vmatpush.bf16.msra.mxu2 %v4035_v4  ;;  %v4131_v47 = vor.u32 %v4409_v10, %v4128_v45  ;;  %v3982_v30 = vld [vmem:[#allocation8 + $0x20] sm:$0xf]  ;;  %v4375_v59 = vld [vmem:[#allocation8 + $0x2c] sm:$0xf0]  ;;  %v4373_v53 = vld [vmem:[#allocation8 + $0x24] sm:$0xf]  ;;  %v4127_v28 = vor.u32 %v4411_v15, %v4126_v42 }
 0x73a   : > { %3052 = vmatpush.bf16.msra.mxu3 %v4163_v3  ;;  %3026 = vmatpush.bf16.msra.mxu1 %v4159_v35  ;;  %v3984_v36 = vld [vmem:[#allocation8 + $0x30] sm:$0xf0]  ;;  %v4405_v34 = vld [vmem:[#allocation8 + $0x124] sm:$0xf]  ;;  %v4110_v41 = vld [vmem:[#allocation8 + $0x120] sm:$0xf]  ;;  %v3983_v16 = vor.u32 %v4375_v59, %v3982_v30 }
 0x73b   : > { %v4112_v62 = vld [vmem:[#allocation8 + $0x130] sm:$0xf0]  ;;  %v4407_v44 = vld [vmem:[#allocation8 + $0x12c] sm:$0xf0]  ;;  %v3966_v2 = vld [vmem:[#allocation8] sm:$0xf]  ;;  %v3987_v60 = vor.u32 %v4373_v53, %v3984_v36 }
 0x73c   : > { %3014 = vmatpush.bf16.msra.mxu0 %v4015_v52  ;;  %v4371_v39 = vld [vmem:[#allocation8 + $0xc] sm:$0xf0]  ;;  %v4115_v48 = vor.u32 %v4405_v34, %v4112_v62  ;;  %v4369_v26 = vld [vmem:[#allocation8 + $0x4] sm:$0xf]  ;;  %v3968_v8 = vld [vmem:[#allocation8 + $0x10] sm:$0xf0]  ;;  %v4111_v46 = vor.u32 %v4407_v44, %v4110_v41 }
 0x73d   : > { %3040 = vmatpush.bf16.msra.mxu2 %v4019_v5  ;;  %v4401_v32 = vld [vmem:[#allocation8 + $0x104] sm:$0xf]  ;;  %v4096_v9 = vld [vmem:[#allocation8 + $0x110] sm:$0xf0]  ;;  %v4086_v61 = vld [vmem:[#allocation8 + $0xe8] sm:$0xf]  ;;  %v3967_v54 = vor.u32 %v4371_v39, %v3966_v2  ;;  %v3971_v14 = vor.u32 %v4369_v26, %v3968_v8 }
 0x73e   : > { %3053 = vmatpush.bf16.msra.mxu3 %v4147_v17  ;;  %3027 = vmatpush.bf16.msra.mxu1 %v4143_v19  ;;  %v4400_v29 = vld [vmem:[#allocation8 + $0xf4] sm:$0xf0]  ;;  %v4398_v13 = vld [vmem:[#allocation8 + $0xec] sm:$0xf]  ;;  %v4088_v51 = vld [vmem:[#allocation8 + $0xf8] sm:$0xf0]  ;;  %v4099_v22 = vor.u32 %v4401_v32, %v4096_v9 }
 0x73f   : > { %v4430_v21 = vld [vmem:[#allocation8 + $0x1ec] sm:$0xf]  ;;  %v4216_v55 = vld [vmem:[#allocation8 + $0x1f8] sm:$0xf0]  ;;  %v4094_v4 = vld [vmem:[#allocation8 + $0x100] sm:$0xf]  ;;  %v4087_v18 = vor.u32 %v4400_v29, %v4086_v61  ;;  %v4091_v25 = vor.u32 %v4398_v13, %v4088_v51 }
 0x740   : > { %3015 = vmatpush.bf16.msra.mxu0 %v3999_v57  ;;  %v4403_v3 = vld [vmem:[#allocation8 + $0x10c] sm:$0xf0]  ;;  %v4214_v23 = vld [vmem:[#allocation8 + $0x1e8] sm:$0xf]  ;;  %v4432_v35 = vld [vmem:[#allocation8 + $0x1f4] sm:$0xf0]  ;;  %v4219_v37 = vor.u32 %v4430_v21, %v4216_v55 }
 0x741   : > { %3041 = vmatpush.bf16.msra.mxu2 %v4003_v40  ;;  %v4070_v31 = vld [vmem:[#allocation8 + $0xc8] sm:$0xf]  ;;  %v4095_v43 = vor.u32 %v4403_v3, %v4094_v4  ;;  %v4396_v52 = vld [vmem:[#allocation8 + $0xd4] sm:$0xf0]  ;;  %v4394_v5 = vld [vmem:[#allocation8 + $0xcc] sm:$0xf]  ;;  %v4215_v27 = vor.u32 %v4432_v35, %v4214_v23 }
 0x742   : > { %3054 = vmatpush.bf16.msra.mxu3 %v4131_v47  ;;  %3028 = vmatpush.bf16.msra.mxu1 %v4127_v28  ;;  %v4072_v17 = vld [vmem:[#allocation8 + $0xd8] sm:$0xf0]  ;;  %v4426_v7 = vld [vmem:[#allocation8 + $0x1cc] sm:$0xf]  ;;  %v4198_v10 = vld [vmem:[#allocation8 + $0x1c8] sm:$0xf]  ;;  %v4071_v42 = vor.u32 %v4396_v52, %v4070_v31 }
 0x743   : > { %v4200_v19 = vld [vmem:[#allocation8 + $0x1d8] sm:$0xf0]  ;;  %v4428_v45 = vld [vmem:[#allocation8 + $0x1d4] sm:$0xf0]  ;;  %v4075_v15 = vor.u32 %v4394_v5, %v4072_v17  ;;  %v4054_v57 = vld [vmem:[#allocation8 + $0xa8] sm:$0xf] }
 0x744   : > { %3016 = vmatpush.bf16.msra.mxu0 %v3983_v16  ;;  %v4203_v63 = vor.u32 %v4426_v7, %v4200_v19  ;;  %v4392_v40 = vld [vmem:[#allocation8 + $0xb4] sm:$0xf0]  ;;  %v4390_v47 = vld [vmem:[#allocation8 + $0xac] sm:$0xf]  ;;  %v4056_v30 = vld [vmem:[#allocation8 + $0xb8] sm:$0xf0]  ;;  %v4199_v59 = vor.u32 %v4428_v45, %v4198_v10 }
 0x745   : > { %3042 = vmatpush.bf16.msra.mxu2 %v3987_v60  ;;  %v4422_v53 = vld [vmem:[#allocation8 + $0x1ac] sm:$0xf]  ;;  %v4184_v49 = vld [vmem:[#allocation8 + $0x1b8] sm:$0xf0]  ;;  %v4182_v28 = vld [vmem:[#allocation8 + $0x1a8] sm:$0xf]  ;;  %v4055_v34 = vor.u32 %v4392_v40, %v4054_v57  ;;  %v4059_v62 = vor.u32 %v4390_v47, %v4056_v30 }
 0x746   : > { %3055 = vmatpush.bf16.msra.mxu3 %v4115_v48  ;;  %3029 = vmatpush.bf16.msra.mxu1 %v4111_v46  ;;  %v4424_v36 = vld [vmem:[#allocation8 + $0x1b4] sm:$0xf0]  ;;  %v4038_v41 = vld [vmem:[#allocation8 + $0x88] sm:$0xf]  ;;  %v4187_v44 = vor.u32 %v4422_v53, %v4184_v49  ;;  %v4386_v2 = vld [vmem:[#allocation8 + $0x8c] sm:$0xf] }
 0x747   : > { %v4388_v16 = vld [vmem:[#allocation8 + $0x94] sm:$0xf0]  ;;  %v4040_v39 = vld [vmem:[#allocation8 + $0x98] sm:$0xf0]  ;;  %v4183_v60 = vor.u32 %v4424_v36, %v4182_v28  ;;  %v4418_v48 = vld [vmem:[#allocation8 + $0x18c] sm:$0xf] }
 0x748   : > { %3017 = vmatpush.bf16.msra.mxu0 %v3967_v54  ;;  %v4168_v26 = vld [vmem:[#allocation8 + $0x198] sm:$0xf0]  ;;  %v4166_v8 = vld [vmem:[#allocation8 + $0x188] sm:$0xf]  ;;  %v4420_v32 = vld [vmem:[#allocation8 + $0x194] sm:$0xf0]  ;;  %v4039_v46 = vor.u32 %v4388_v16, %v4038_v41  ;;  %v4043_v9 = vor.u32 %v4386_v2, %v4040_v39 }
 0x749   : > { %3043 = vmatpush.bf16.msra.mxu2 %v3971_v14  ;;  %v4022_v61 = vld [vmem:[#allocation8 + $0x68] sm:$0xf]  ;;  %v4171_v29 = vor.u32 %v4418_v48, %v4168_v26  ;;  %v4384_v13 = vld [vmem:[#allocation8 + $0x74] sm:$0xf0]  ;;  %v4382_v51 = vld [vmem:[#allocation8 + $0x6c] sm:$0xf]  ;;  %v4167_v54 = vor.u32 %v4420_v32, %v4166_v8 }
 0x74a   : > { %3056 = vmatpush.bf16.msra.mxu3 %v4099_v22  ;;  %3030 = vmatpush.bf16.msra.mxu1 %v4095_v43  ;;  %v4024_v21 = vld [vmem:[#allocation8 + $0x78] sm:$0xf0]  ;;  %v4414_v55 = vld [vmem:[#allocation8 + $0x16c] sm:$0xf]  ;;  %v4150_v3 = vld [vmem:[#allocation8 + $0x168] sm:$0xf]  ;;  %v4023_v22 = vor.u32 %v4384_v13, %v4022_v61 }
 0x74b   : > { %3018 = vmatmul.bf16.vlgmr.msra.gmra.mxu0 %v6662_v33  ;;  %v4152_v4 = vld [vmem:[#allocation8 + $0x178] sm:$0xf0]  ;;  %v4416_v14 = vld [vmem:[#allocation8 + $0x174] sm:$0xf0]  ;;  %v4027_v23 = vor.u32 %v4382_v51, %v4024_v21  ;;  %v4006_v35 = vld [vmem:[#allocation8 + $0x48] sm:$0xf] }
 0x74c   : > { %3062 = vmatpush.bf16.msrb.mxu0 %v4087_v18  ;;  %3044 = vmatmul.bf16.vlgmr.msra.gmra.mxu2 %v6662_v33  ;;  %v4155_v18 = vor.u32 %v4414_v55, %v4152_v4  ;;  %v4378_v31 = vld [vmem:[#allocation8 + $0x4c] sm:$0xf]  ;;  %v4151_v43 = vor.u32 %v4416_v14, %v4150_v3  ;;  %v4136_v5 = vld [vmem:[#allocation8 + $0x158] sm:$0xf0]  ;;  %v4134_v17 = vld [vmem:[#allocation8 + $0x148] sm:$0xf] }
 0x74d   : > { %3088 = vmatpush.bf16.msrb.mxu2 %v4091_v25  ;;  %3057 = vmatmul.bf16.vlgmr.msra.gmra.mxu3 %v6666_v11  ;;  %v4380_v25 = vld [vmem:[#allocation8 + $0x54] sm:$0xf0]  ;;  %v4410_v52 = vld [vmem:[#allocation8 + $0x14c] sm:$0xf]  ;;  %v3990_v10 = vld [vmem:[#allocation8 + $0x28] sm:$0xf] }
 0x74e   : > { %3101 = vmatpush.bf16.msrb.mxu3 %v4219_v37  ;;  %3075 = vmatpush.bf16.msrb.mxu1 %v4215_v27  ;;  %v4008_v37 = vld [vmem:[#allocation8 + $0x58] sm:$0xf0]  ;;  %v4412_v27 = vld [vmem:[#allocation8 + $0x154] sm:$0xf0]  ;;  %v4007_v7 = vor.u32 %v4380_v25, %v4006_v35  ;;  %v4139_v45 = vor.u32 %v4410_v52, %v4136_v5  ;;  %v4406_v40 = vld [vmem:[#allocation8 + $0x12c] sm:$0xf] }
 0x74f   : > { %3031 = vmatmul.bf16.vlgmr.msra.gmra.mxu1 %v6666_v11  ;;  %v4011_v19 = vor.u32 %v4378_v31, %v4008_v37  ;;  %v3992_v57 = vld [vmem:[#allocation8 + $0x38] sm:$0xf0]  ;;  %v4118_v30 = vld [vmem:[#allocation8 + $0x128] sm:$0xf]  ;;  %v4402_v16 = vld [vmem:[#allocation8 + $0x10c] sm:$0xf] }
 0x750   : > { %3063 = vmatpush.bf16.msrb.mxu0 %v4071_v42  ;;  %v4376_v42 = vld [vmem:[#allocation8 + $0x34] sm:$0xf0]  ;;  %v4120_v47 = vld [vmem:[#allocation8 + $0x138] sm:$0xf0]  ;;  %v3974_v28 = vld [vmem:[#allocation8 + $0x8] sm:$0xf] }
 0x751   : > { %3089 = vmatpush.bf16.msrb.mxu2 %v4075_v15  ;;  %v4374_v15 = vld [vmem:[#allocation8 + $0x2c] sm:$0xf]  ;;  %v3991_v53 = vor.u32 %v4376_v42, %v3990_v10  ;;  %v4123_v36 = vor.u32 %v4406_v40, %v4120_v47  ;;  %v3976_v41 = vld [vmem:[#allocation8 + $0x18] sm:$0xf0]  ;;  %v4102_v39 = vld [vmem:[#allocation8 + $0x108] sm:$0xf] }
 0x752   : > { %3102 = vmatpush.bf16.msrb.mxu3 %v4203_v63  ;;  %3076 = vmatpush.bf16.msrb.mxu1 %v4199_v59  ;;  %v4135_v63 = vor.u32 %v4412_v27, %v4134_v17  ;;  %v4408_v59 = vld [vmem:[#allocation8 + $0x134] sm:$0xf0]  ;;  %v3995_v49 = vor.u32 %v4374_v15, %v3992_v57  ;;  %v4104_v2 = vld [vmem:[#allocation8 + $0x118] sm:$0xf0]  ;;  %v4438_v37 = vld [vmem:[#allocation10 + $0x28] sm:$0xff]  ;;  %vm3271_vm5 = vcmp.gt.f32.partialorder %v5120_v56, 0.0 }
 0x753   : > { %v4107_v8 = vor.u32 %v4402_v16, %v4104_v2  ;;  %v4440_v14 = vld [vmem:[#allocation10 + $0x38] sm:$0xff]  ;;  %v4437_v17 = vld [vmem:[#allocation10 + $0x20] sm:$0xff]  ;;  %v4434_v42 = vld [vmem:[#allocation10 + $0x8] sm:$0xff]  ;;  %vm3279_vm6 = vcmask 58368   ;;  %s4287_s8 = sshll.u32 %s5136_s13, 1  ;;  %s7001_s1 = sld [smem:[#allocation51_spill]] }
 0x754   : > { %3064 = vmatpush.bf16.msrb.mxu0 %v4055_v34  ;;  %v4372_v34 = vld [vmem:[#allocation8 + $0x14] sm:$0xf0]  ;;  %v4433_v40 = vld [vmem:[#allocation10] sm:$0xff] }
 0x755   : > { %3090 = vmatpush.bf16.msrb.mxu2 %v4059_v62  ;;  %v4370_v62 = vld [vmem:[#allocation8 + $0xc] sm:$0xf]  ;;  %v3975_v48 = vor.u32 %v4372_v34, %v3974_v28  ;;  %v4436_v27 = vld [vmem:[#allocation10 + $0x18] sm:$0xff] }
 0x756   : > { %3103 = vmatpush.bf16.msrb.mxu3 %v4187_v44  ;;  %3077 = vmatpush.bf16.msrb.mxu1 %v4183_v60  ;;  %v4119_v44 = vor.u32 %v4408_v59, %v4118_v30  ;;  %v4404_v60 = vld [vmem:[#allocation8 + $0x114] sm:$0xf0]  ;;  %v3979_v26 = vor.u32 %v4370_v62, %v3976_v41 }
 0x757   : > { %v4103_v32 = vor.u32 %v4404_v60, %v4102_v39 }
 0x758   : > { %3065 = vmatpush.bf16.msrb.mxu0 %v4039_v46 }
 0x759   : > { %3091 = vmatpush.bf16.msrb.mxu2 %v4043_v9  ;;  %v6990_v9 = vld [vmem:[#allocation26_spill] sm:$0xff]  ;;  %s3459_s2 = scalar_lea.vmem %s7001_s1, %s4287_s8 }
 0x75a   : > { %3104 = vmatpush.bf16.msrb.mxu3 %v4171_v29  ;;  %3078 = vmatpush.bf16.msrb.mxu1 %v4167_v54  ;;  %v6991_v61 = vperm.slane %v6990_v9, 0  ;;  %v6992_v55 = vperm.slane %v6990_v9, 1  ;;  %v6993_v59 = vperm.slane %v6990_v9, 2 }
 0x75c   : > { %3066 = vmatpush.bf16.msrb.mxu0 %v4023_v22 }
 0x75d   : > { %3092 = vmatpush.bf16.msrb.mxu2 %v4027_v23 }
 0x75e   : > { %3105 = vmatpush.bf16.msrb.mxu3 %v4155_v18  ;;  %3079 = vmatpush.bf16.msrb.mxu1 %v4151_v43 }
 0x760   : > { %3067 = vmatpush.bf16.msrb.mxu0 %v4007_v7 }
 0x761   : > { %3093 = vmatpush.bf16.msrb.mxu2 %v4011_v19  ;;  %v4435_v19 = vld [vmem:[#allocation10 + $0x10] sm:$0xff] }
 0x762   : > { %3106 = vmatpush.bf16.msrb.mxu3 %v4139_v45  ;;  %3080 = vmatpush.bf16.msrb.mxu1 %v4135_v63 }
 0x764   : > { %3068 = vmatpush.bf16.msrb.mxu0 %v3991_v53 }
 0x765   : > { %3094 = vmatpush.bf16.msrb.mxu2 %v3995_v49  ;;  %v6994_v49 = vperm.slane %v6990_v9, 3 }
 0x766   : > { %3107 = vmatpush.bf16.msrb.mxu3 %v4123_v36  ;;  %3081 = vmatpush.bf16.msrb.mxu1 %v4119_v44 }
 0x768   : > { %3069 = vmatpush.bf16.msrb.mxu0 %v3975_v48 }
 0x769   : > { %3095 = vmatpush.bf16.msrb.mxu2 %v3979_v26 }
 0x76a   : > { %3108 = vmatpush.bf16.msrb.mxu3 %v4107_v8  ;;  %3082 = vmatpush.bf16.msrb.mxu1 %v4103_v32 }
 0x76b   : > { %3070 = vmatmul.bf16.vlgmr.msrb.gmra.mxu0 %v6662_v33 }
 0x76c   : > { %3096 = vmatmul.bf16.vlgmr.msrb.gmra.mxu2 %v6662_v33  ;;  %3242 = vmatpush.bf16.msra.mxu0 %v4440_v14 }
 0x76d   : > { %3109 = vmatmul.bf16.vlgmr.msrb.gmra.mxu3 %v6666_v11  ;;  %3083 = vmatmul.bf16.vlgmr.msrb.gmra.mxu1 %v6666_v11  ;;  %v4439_v11 = vld [vmem:[#allocation10 + $0x30] sm:$0xff] }
 0x770   : > { %3243 = vmatpush.bf16.msra.mxu0 %v4439_v11 }
 0x774   : > { %3244 = vmatpush.bf16.msra.mxu0 %v4438_v37 }
 0x778   : > { %3245 = vmatpush.bf16.msra.mxu0 %v4437_v17 }
 0x77c   : > { %3246 = vmatpush.bf16.msra.mxu0 %v4436_v27 }
 0x780   : > { %3247 = vmatpush.bf16.msra.mxu0 %v4435_v19 }
 0x784   : > { %3248 = vmatpush.bf16.msra.mxu0 %v4434_v42  ;;  %v6997_v42 = vld [vmem:[#allocation27_spill] sm:$0xff] }
 0x788   : > { %3249 = vmatpush.bf16.msra.mxu0 %v4433_v40 }
 0x7c8   : > { %v3019_v46 = vpop.f32.mrf.mxu0 }
 0x7c9   : > { %v3020_v29 = vadd.f32 %v3019_v46, %v6991_v61 }
 0x7cc   : > { %v3032_v13 = vpop.f32.mrf.mxu1 }
 0x7cd   : > { %v3033_v51 = vadd.f32 %v3032_v13, %v3020_v29 }
 0x7cf   : > { %v3045_v21 = vpop.f32.mrf.mxu2  ;;  %v4220_v54 = vmul.f32 -1.442695, %v3033_v51 }
 0x7d0   : > { %v3046_v4 = vadd.f32 %v3045_v21, %v6992_v55  ;;  %v3058_v3 = vpop.f32.mrf.mxu3  ;;  %v3021_v33 = vpop.f32.mrf.mxu0 }
 0x7d1   : > { %4792 = vpow2.f32 %v4220_v54 }
 0x7d2   : > { %v3059_v22 = vadd.f32 %v3058_v3, %v3046_v4 }
 0x7d4   : > { %v4221_v23 = vmul.f32 -1.442695, %v3059_v22  ;;  %v3034_v35 = vpop.f32.mrf.mxu1 }
 0x7d6   : > { %4794 = vpow2.f32 %v4221_v23 }
 0x7d7   : > { %v3047_v18 = vpop.f32.mrf.mxu2  ;;  %v4793_v25 = vpop.eup %4792 }
 0x7d8   : > { %v3060_v31 = vpop.f32.mrf.mxu3  ;;  %v3117_v43 = vadd.f32 1.0, %v4793_v25 }
 0x7da   : > { %4796 = vrcp.f32 %v3117_v43  ;;  %vm3123_vm9 = vweird.f32 %v3117_v43  ;;  %v3129_v48 = vand.u32 2147483648, %v3117_v43  ;;  %v3127_v8 = vand.u32 2147483647, %v3117_v43 }
 0x7dc   : > { %v4795_v52 = vpop.eup %4794  ;;  %v3130_v21 = vor.u32 1.1754944e-38, %v3129_v48  ;;  %vm3128_vm14 = vcmp.eq.f32.partialorder %v3127_v8, 8.507059e+37 }
 0x7dd   : > { %v3136_v5 = vadd.f32 1.0, %v4795_v52 }
 0x7df   : > { %4798 = vrcp.f32 %v3136_v5  ;;  %vm3142_vm10 = vweird.f32 %v3136_v5  ;;  %v3148_v46 = vand.u32 2147483648, %v3136_v5  ;;  %v3146_v51 = vand.u32 2147483647, %v3136_v5 }
 0x7e0   : > { %v4797_v7 = vpop.eup %4796 }
 0x7e1   : > { %v3119_v15 = vmul.f32 %v4797_v7, %v3117_v43  ;;  %vm3124_vm8 = vweird.f32 %v4797_v7  ;;  %v3149_v4 = vor.u32 1.1754944e-38, %v3148_v46  ;;  %vm3147_vm1 = vcmp.eq.f32.partialorder %v3146_v51, 8.507059e+37 }
 0x7e2   : > { %vm6684_vm13 = vmor %vm3123_vm9, %vm3124_vm8 }
 0x7e3   : > { %v3120_v47 = vsub.f32 1.0, %v3119_v15 }
 0x7e5   : > { %v4799_v45 = vpop.eup %4798  ;;  %v3121_v44 = vmul.f32 %v4797_v7, %v3120_v47 }
 0x7e6   : > { %v3138_v63 = vmul.f32 %v4799_v45, %v3136_v5  ;;  %vm3143_vm12 = vweird.f32 %v4799_v45 }
 0x7e7   : > { %v3122_v26 = vadd.f32 %v4797_v7, %v3121_v44  ;;  %vm3144_vm15 = vmor %vm3142_vm10, %vm3143_vm12 }
 0x7e8   : > { %v3071_v10 = vpop.f32.mrf.mxu0  ;;  %v3139_v34 = vsub.f32 1.0, %v3138_v63 }
 0x7e9   : > { %v3072_v53 = vadd.f32 %v3071_v10, %v6993_v59  ;;  %v3126_v54 = vsel %vm6684_vm13, %v4797_v7, %v3122_v26 }
 0x7ea   : > { %v3084_v57 = vpop.f32.mrf.mxu1  ;;  %v3140_v60 = vmul.f32 %v4799_v45, %v3139_v34  ;;  %v3131_v33 = vsel %vm3128_vm14, %v3130_v21, %v3126_v54 }
 0x7eb   : > { %v3085_v2 = vadd.f32 %v3084_v57, %v3072_v53 }
 0x7ec   : > { %v3141_v13 = vadd.f32 %v4799_v45, %v3140_v60 }
 0x7ee   : > { %v3145_v3 = vsel %vm3144_vm15, %v4799_v45, %v3141_v13  ;;  %v4448_v13 = vld [vmem:[#allocation13 + $0x38] sm:$0xff] }
 0x7ef   : > { %v3097_v30 = vpop.f32.mrf.mxu2  ;;  %v3150_v23 = vsel %vm3147_vm1, %v3149_v4, %v3145_v3  ;;  %3405 = vmatpush.bf16.msra.mxu1 %v4448_v13 }
 0x7f0   : > { %v3098_v28 = vadd.f32 %v3097_v30, %v6994_v49  ;;  %v3110_v36 = vpop.f32.mrf.mxu3  ;;  %v3073_v62 = vpop.f32.mrf.mxu0  ;;  %v3172_v11 = vmul.f32 %v5128_v20, %v3150_v23 }
 0x7f2   : > { %v3111_v41 = vadd.f32 %v3110_v36, %v3098_v28  ;;  %v3086_v16 = vpop.f32.mrf.mxu1  ;;  %v6998_v28 = vld [vmem:[#allocation29_spill] sm:$0xff] }
 0x7f4   : > { %v4222_v39 = vmul.f32 -1.442695, %v3111_v41 }
 0x7f6   : > { %4800 = vpow2.f32 %v4222_v39 }
 0x7f7   : > { %v3099_v32 = vpop.f32.mrf.mxu2  ;;  %4802 = vtanh.f32 %v3085_v2 }
 0x7f8   : > { %v3112_v29 = vpop.f32.mrf.mxu3 }
 0x7f9   : > { %v3306_v29 = vshrl.u32 %v2598_v6, 7 }
 0x7fb   : > { %4785 = vset.pattern.permute.xlu2 %v3306_v29  ;;  %4786 = vset.pattern.permute.xlu0 %v3306_v29 }
 0x7fc   : > { %v4801_v55 = vpop.eup %4800 }
 0x7fd   : > { %v3156_v14 = vadd.f32 1.0, %v4801_v55  ;;  %v4803_v22 = vpop.eup %4802 }
 0x7fe   : > { %v3173_v35 = vmul.f32 %v4803_v22, %v3131_v33 }
 0x7ff   : > { %4804 = vrcp.f32 %v3156_v14  ;;  %v3168_v37 = vand.u32 2147483648, %v3156_v14  ;;  %v3166_v52 = vand.u32 2147483647, %v3156_v14  ;;  %vm3162_vm3 = vweird.f32 %v3156_v14 }
 0x800   : > { %v6691_v20 = vadd.f32 %v3173_v35, %v3172_v11  }
 0x801   : > { %v3169_v17 = vor.u32 1.1754944e-38, %v3168_v37  ;;  %vm3167_vm4 = vcmp.eq.f32.partialorder %v3166_v52, 8.507059e+37  ;;  %v4446_v37 = vld [vmem:[#allocation13 + $0x28] sm:$0xff]  ;;  %v4444_v52 = vld [vmem:[#allocation13 + $0x18] sm:$0xff] }
 0x802   : > { %4806 = vtanh.f32 %v6691_v20 }
 0x805   : > { %v4805_v18 = vpop.eup %4804 }
 0x806   : > { %v3158_v25 = vmul.f32 %v4805_v18, %v3156_v14  ;;  %vm3163_vm2 = vweird.f32 %v4805_v18 }
 0x807   : > { %vm3164_vm0 = vmor %vm3162_vm3, %vm3163_vm2 }
 0x808   : > { %v3159_v31 = vsub.f32 1.0, %v3158_v25  ;;  %v4807_v7 = vpop.eup %4806 }
 0x80a   : > { %v3160_v43 = vmul.f32 %v4805_v18, %v3159_v31  ;;  %v4447_v31 = vld [vmem:[#allocation13 + $0x30] sm:$0xff] }
 0x80b   : > { %3406 = vmatpush.bf16.msra.mxu1 %v4447_v31  ;;  %v3460_v31 = vld [vmem:[%s3459_s2] sm:$0x3] }
 0x80c   : > { %v3161_v5 = vadd.f32 %v4805_v18, %v3160_v43  ;;  %v4445_v43 = vld [vmem:[#allocation13 + $0x20] sm:$0xff] }
 0x80e   : > { %v3165_v27 = vsel %vm3164_vm0, %v4805_v18, %v3161_v5  ;;  %v4443_v5 = vld [vmem:[#allocation13 + $0x10] sm:$0xff] }
 0x80f   : > { %v3170_v19 = vsel %vm3167_vm4, %v3169_v17, %v3165_v27  ;;  %3407 = vmatpush.bf16.msra.mxu1 %v4446_v37  ;;  %v4442_v17 = vld [vmem:[#allocation13 + $0x8] sm:$0xff]  ;;  %v4441_v27 = vld [vmem:[#allocation13] sm:$0xff] }
 0x810   : > { %v6694_v49 = vmul.f32 %v4807_v7, %v3170_v19  }
 0x812   : > { %v3177_v10 = vpack.c.bf16 %v6694_v49, %v6694_v49 }
 0x813   : > { %3408 = vmatpush.bf16.msra.mxu1 %v4445_v43 }
 0x814   : > { %3250 = vmatmul.bf16.vlgmr.msra.gmra.mxu0 %v3177_v10 }
 0x817   : > { %3409 = vmatpush.bf16.msra.mxu1 %v4444_v52 }
 0x81b   : > { %3410 = vmatpush.bf16.msra.mxu1 %v4443_v5 }
 0x81f   : > { %3411 = vmatpush.bf16.msra.mxu1 %v4442_v17 }
 0x823   : > { %3412 = vmatpush.bf16.msra.mxu1 %v4441_v27 }
 0x891   : > { %v3251_v45 = vpop.f32.mrf.mxu0 }
 0x892   : > { %v3252_v15 = vadd.f32 %v6997_v42, %v3251_v45 }
 0x894   : > { %v3256_v57 = vrot.slane %v3252_v15, 1  ;;  %v3257_v63 = vperm.slane %v3252_v15, 0 }
 0x896   : > { %v3258_v40 = vperm.slane %v3256_v57, 0  ;;  %v3261_v47 = vadd.f32 %v3257_v63, %v6616_v0 }
 0x898   : > { %4808 = vtanh.f32 %v3261_v47  ;;  %v3262_v59 = vadd.f32 %v3258_v40, %v6620_v24 }
 0x899   : > { %v3253_v30 = vpop.f32.mrf.mxu0 }
 0x89a   : > { %4810 = vtanh.f32 %v3262_v59 }
 0x89e   : > { %v4809_v53 = vpop.eup %4808 }
 0x89f   : > { %v3265_v36 = vmul.f32 %v4809_v53, %v6998_v28 }
 0x8a0   : > { %v4811_v34 = vpop.eup %4810 }
 0x8a1   : > { %3267 = vadd.xlane.f32.xlu0 %v3265_v36  ;;  %v3266_v62 = vmul.f32 %v4811_v34, %v6998_v28 }
 0x8a9   : > { %3269 = vadd.xlane.f32.xlu0 %v3266_v62 }
 0x914   : > { %v3268_v41 = vpop.xlane.xlu0 %3267 }
 0x915   : > { %v3274_v16 = vperm.slane %v3268_v41, %v6611_v1 }
 0x91c   : > { %v3270_v44 = vpop.xlane.xlu0 %3269 }
 0x91d   : > { %v3275_v2 = vperm.slane %v3270_v44, %v6611_v1 }
 0x91f   : > { %v3276_v39 = vsel %vm868_vm11, %v3275_v2, %v3274_v16 }
 0x920   : > { %v3278_v60 = vsel %vm3271_vm5, -100000.0, %v3276_v39 }
 0x921   : > { %v3280_v48 = vsel %vm3279_vm6, %v3278_v60, -inf }
 0x922   : > { %3281 = vmax.xlane.f32.xlu1 %v3280_v48 }
 0x995   : > { %v3282_v26 = vpop.xlane.xlu1 %3281 }
 0x996   : > { %v3283_v8 = vsub.f32 %v3278_v60, %v3282_v26  ;;  %v6999_v26 = vld [vmem:[#allocation28_spill] sm:$0xff] }
 0x998   : > { %v3284_v32 = vmul.f32 1.442695, %v3283_v8 }
 0x99a   : > { %4812 = vpow2.f32 %v3284_v32 }
 0x9a0   : > { %v4813_v46 = vpop.eup %4812 }
 0x9a1   : > { %v3286_v61 = vsel %vm3279_vm6, %v4813_v46, 0.0 }
 0x9a2   : > { %3287 = vadd.xlane.f32.xlu1 %v3286_v61 }
 0xa15   : > { %v3288_v51 = vpop.xlane.xlu1 %3287 }
 0xa16   : > { %4814 = vrcp.f32 %v3288_v51  ;;  %v3300_v4 = vand.u32 2147483648, %v3288_v51  ;;  %v3298_v14 = vand.u32 2147483647, %v3288_v51  ;;  %vm3294_vm9 = vweird.f32 %v3288_v51 }
 0xa18   : > { %v3301_v33 = vor.u32 1.1754944e-38, %v3300_v4  ;;  %vm3299_vm10 = vcmp.eq.f32.partialorder %v3298_v14, 8.507059e+37 }
 0xa1c   : > { %v4815_v21 = vpop.eup %4814 }
 0xa1d   : > { %v3290_v54 = vmul.f32 %v4815_v21, %v3288_v51  ;;  %vm3295_vm7 = vweird.f32 %v4815_v21 }
 0xa1e   : > { %vm3296_vm8 = vmor %vm3294_vm9, %vm3295_vm7 }
 0xa1f   : > { %v3291_v55 = vsub.f32 1.0, %v3290_v54  ;;  %v7000_v54 = vld [vmem:[#allocation30_spill] sm:$0xff] }
 0xa21   : > { %v3292_v3 = vmul.f32 %v4815_v21, %v3291_v55 }
 0xa23   : > { %v3293_v22 = vadd.f32 %v4815_v21, %v3292_v3 }
 0xa25   : > { %v3297_v23 = vsel %vm3296_vm8, %v4815_v21, %v3293_v22 }
 0xa26   : > { %v3302_v35 = vsel %vm3299_vm10, %v3301_v33, %v3297_v23 }
 0xa27   : > { %v3303_v11 = vmul.f32 %v4813_v46, %v3302_v35 }
 0xa29   : > { %v3304_v18 = vperm.slane %v3303_v11, 0  ;;  %v3311_v25 = vperm.slane %v3303_v11, 1 }
 0xa2b   : > { %3309 = vperm.xlu2 %4785, %v3304_v18  }
 0xa33   : > { %3316 = vperm.xlu2 %4785, %v3311_v25  }
 0xa85   : > { %v3310_v7 = vpop.permute.xlu2 %3309 }
 0xa86   : > { %v3318_v19 = vmul.f32 %v3310_v7, %v6616_v0 }
 0xa88   : > { %v3320_v10 = vrot.slane %v3318_v19, 4 }
 0xa8a   : > { %v3321_v45 = vadd.f32 %v3320_v10, %v3318_v19 }
 0xa8c   : > { %v3322_v42 = vrot.slane %v3321_v45, 2 }
 0xa8d   : > { %v3317_v15 = vpop.permute.xlu2 %3316 }
 0xa8e   : > { %v3323_v57 = vadd.f32 %v3322_v42, %v3321_v45  ;;  %v3319_v63 = vmul.f32 %v3317_v15, %v6620_v24 }
 0xa90   : > { %v3326_v40 = vrot.slane %v3319_v63, 4  ;;  %v3324_v47 = vrot.slane %v3323_v57, 1 }
 0xa92   : > { %v3327_v30 = vadd.f32 %v3326_v40, %v3319_v63  ;;  %v3325_v53 = vadd.f32 %v3324_v47, %v3323_v57 }
 0xa94   : > { %v3328_v59 = vrot.slane %v3327_v30, 2  ;;  %v3332_v62 = vpack.c.bf16 %v3325_v53, %v3325_v53 }
 0xa96   : > { %v3329_v36 = vadd.f32 %v3328_v59, %v3327_v30  ;;  %v3352_v16 = vunpack.c.l.b16 %v3332_v62 }
 0xa98   : > { %v3330_v34 = vrot.slane %v3329_v36, 1 }
 0xa9a   : > { %v3331_v41 = vadd.f32 %v3330_v34, %v3329_v36 }
 0xa9c   : > { %v3333_v44 = vpack.c.bf16 %v3331_v41, %v3331_v41  ;;  %v3519_v41 = vstv %s5136_s13  ;;  %s2617_s13 = sadd.s32 1, %s5136_s13  }
 0xa9d   : > { %vm6738_vm15 = vcmp.eq.s32.totalorder %v6611_v1, %v3519_v41  ;;  %p2614_p0 = scmp.ge.s32.totalorder %s2617_s13, 8  }
 0xa9e   : > { %v3353_v2 = vunpack.c.l.b16 %v3333_v44  ;;  %s3540_s9 = sshll.u32 (%p2614_p0), %s6796_s17, 4  ;;  %s5155_s24 = smov (%p2614_p0), [#allocation16]   ;;  %s3541_s9 = int_to_ptr.hbm [resolvable:$true] %s3540_s9 }
 0xa9f   :  { %s3538_s10 = sshll.u32 (%p2614_p0), %s5155_s24, 4  ;;  %s5156_s12 = smov (%p2614_p0), [#allocation17]   ;;  %s3539_s10 = int_to_ptr.vmem [resolvable:$true] %s3538_s10 }
 0xaa0   : > { %v3354_v39 = vsel %vm868_vm11, %v3353_v2, %v3352_v16  ;;  %s3549_s20 = sshll.u32 (%p2614_p0), %s5156_s12, 4  ;;  %s3551_s6 = sshll.u32 (%p2614_p0), %s6797_s18, 4  ;;  %s3550_s20 = int_to_ptr.vmem [resolvable:$true] %s3549_s20  ;;  %s3552_s6 = int_to_ptr.hbm [resolvable:$true] %s3551_s6 }
 0xaa1   : > { %v3355_v60 = vpack.c.b16 %v3354_v39, %v3354_v39 }
 0xaa3   : > { %3413 = vmatmul.bf16.vlgmr.msra.gmra.mxu1 %v3355_v60 }
 0xb20   : > { %v3414_v48 = vpop.f32.mrf.mxu1 }
 0xb21   : > { %v3415_v8 = vadd.f32 %v6999_v26, %v3414_v48 }
 0xb23   : > { %v3419_v32 = vrot.slane %v3415_v8, 1  ;;  %v3420_v46 = vperm.slane %v3415_v8, 0  ;;  %v5153_v8 = vmov 0  }
 0xb25   : > { %v3421_v61 = vperm.slane %v3419_v32, 0  ;;  %v3424_v29 = vadd.f32 %v3420_v46, %v6618_v12  ;;  %v3523_v32 = vsel %vm6738_vm15, 1, %v5153_v8 }
 0xb27   : > { %v3425_v13 = vadd.f32 %v3421_v61, %v6622_v50  ;;  %4816 = vtanh.f32 %v3424_v29 }
 0xb28   : > { %v3416_v51 = vpop.f32.mrf.mxu1 }
 0xb29   : > { %4818 = vtanh.f32 %v3425_v13  ;;  %v5154_v13 = vmov 0.0  }
 0xb2d   : > { %v4817_v21 = vpop.eup %4816 }
 0xb2e   : > { %v3428_v55 = vmul.f32 %v4817_v21, %v7000_v54 }
 0xb2f   : > { %v4819_v4 = vpop.eup %4818 }
 0xb30   : > { %3430 = vadd.xlane.f32.xlu0 %v3428_v55  ;;  %v3429_v3 = vmul.f32 %v4819_v4, %v7000_v54 }
 0xb32   : > { %3432 = vadd.xlane.f32.xlu1 %v3429_v3 }
 0xba3   : > { %v3431_v14 = vpop.xlane.xlu0 %3430 }
 0xba4   : > { %4820 = vtanh.f32 %v3431_v14 }
 0xba5   : > { %v3433_v22 = vpop.xlane.xlu1 %3432 }
 0xba6   : > { %4822 = vtanh.f32 %v3433_v22 }
 0xbaa   : > { %v4821_v33 = vpop.eup %4820 }
 0xbab   : > { %v3436_v23 = vmul.f32 10.0, %v4821_v33 }
 0xbac   : > { %v4823_v35 = vpop.eup %4822 }
 0xbad   : > { %v3437_v11 = vmul.f32 10.0, %v4823_v35  ;;  %v3440_v18 = vperm.slane %v3436_v23, %v6611_v1 }
 0xbaf   : > { %v3441_v25 = vperm.slane %v3437_v11, %v6611_v1 }
 0xbb1   : > { %v3442_v37 = vsel %vm868_vm11, %v3441_v25, %v3440_v18 }
 0xbb2   : > { %v3444_v43 = vsel %vm3271_vm5, -100000.0, %v3442_v37 }
 0xbb3   : > { %v3445_v52 = vsel %vm3279_vm6, %v3444_v43, -inf  ;;  %v3461_v5 = vadd.f32 %v3460_v31, %v3444_v43  ;;  %v7004_v31 = vld [vmem:[#allocation39_spill] sm:$0xff] }
 0xbb4   : > { %3446 = vmax.xlane.f32.xlu0 %v3445_v52 }
 0xbb5   : > { %v3462_v17 = vsel %vm3271_vm5, -inf, %v3461_v5 }
 0xbb6   : > { %v3463_v27 = vsel %vm3279_vm6, %v3462_v17, -inf }
 0xbb7   : > { %3464 = vmax.xlane.f32.xlu2 %v3463_v27 }
 0xc27   : > { %v3447_v7 = vpop.xlane.xlu0 %3446 }
 0xc28   : > { %v3448_v19 = vsub.f32 %v3444_v43, %v3447_v7 }
 0xc2a   : > { %v3465_v10 = vpop.xlane.xlu2 %3464  ;;  %v3449_v45 = vmul.f32 1.442695, %v3448_v19 }
 0xc2b   : > { %vm3466_vm12 = vcmp.ge.f32.partialorder %v3462_v17, %v3465_v10 }
 0xc2c   : > { %v3467_v42 = vsel %vm3466_vm12, %v6611_v1, 8  ;;  %4824 = vpow2.f32 %v3449_v45 }
 0xc2d   : > { %v3468_v15 = vsel %vm3279_vm6, %v3467_v42, 2147483647 }
 0xc2e   : > { %v3470_v57 = vshra.s32 %v3468_v15, 16  ;;  %v3469_v30 = vand.u32 65535, %v3468_v15 }
 0xc30   : > { %v3472_v63 = vcvt.s32.f32 %v3470_v57  ;;  %v3471_v53 = vcvt.s32.f32 %v3469_v30 }
 0xc32   : > { %3473 = vmin.xlane.f32.xlu1 %v3472_v63  ;;  %v4825_v40 = vpop.eup %4824 }
 0xc33   : > { %v3451_v47 = vsel %vm3279_vm6, %v4825_v40, 0.0 }
 0xc3a   : > { %3452 = vadd.xlane.f32.xlu1 %v3451_v47 }
 0xca5   : > { %v3474_v59 = vpop.xlane.xlu1 %3473 }
 0xca6   : > { %vm3475_vm13 = vcmp.eq.f32.partialorder %v3472_v63, %v3474_v59  ;;  %v3480_v44 = vcvt.f32.s32 %v3474_v59 }
 0xca7   : > { %v3476_v36 = vsel %vm3475_vm13, %v3471_v53, inf }
 0xca8   : > { %3477 = vmin.xlane.f32.xlu0 %v3476_v36  ;;  %v3481_v60 = vshll.u32 %v3480_v44, 16 }
 0xcad   : > { %v3453_v34 = vpop.xlane.xlu1 %3452 }
 0xcae   : > { %4826 = vlog2.f32 %v3453_v34 }
 0xcb4   : > { %v4827_v62 = vpop.eup %4826 }
 0xcb5   : > { %v3455_v16 = vmul.f32 0.6931472, %v4827_v62 }
 0xcb7   : > { %v3456_v48 = vadd.f32 %v3455_v16, %v3447_v7 }
 0xcb9   : > { %v3457_v61 = vsub.f32 %v3444_v43, %v3456_v48  ;;  %v7005_v43 = vld [vmem:[#allocation38_spill] sm:$0xff] }
 0xd1b   : > { %v3478_v39 = vpop.xlane.xlu0 %3477 }
 0xd1c   : > { %v3479_v26 = vcvt.f32.s32 %v3478_v39 }
 0xd1e   : > { %v3482_v46 = vadd.s32 %v3481_v60, %v3479_v26 }
 0xd20   : > { %vm3483_vm14 = vcmp.eq.s32.totalorder %v6611_v1, %v3482_v46  ;;  %v3524_v29 = vmul.u32 %v3523_v32, %v3482_v46 }
 0xd21   : > { %v4288_v51 = vsel %vm3483_vm14, 1.0, %v5154_v13 }
 0xd22   : > { %v3490_v56 = vmax.f32 %v5120_v56, %v4288_v51   ;;  %v3486_v21 = vmul.f32 %v4288_v51, %v3457_v61  ;;  %v3491_v55 = vperm.slane %v4288_v51, 0  ;;  %v3498_v4 = vperm.slane %v4288_v51, 1 }
 0xd23   : > { %v3525_v3 = vadd.s32 %v5112_v58, %v3524_v29  }
 0xd24   : > { %v3487_v14 = vsel %vm3279_vm6, %v3486_v21, 0.0  ;;  %v4787_v22 = vpack.i.bf16 %v3498_v4, %v3491_v55 }
 0xd25   : > { %3488 = vadd.xlane.f32.xlu1 %v3487_v14  ;;  %3532 = vst.msk [vmem:[#allocation17] sm:$0x3] (%p2614_p0), %vm3279_vm6, %v3525_v3 }
 0xd26   : > { %4788 = vperm.xlu0 %4786, %v4787_v22   ;;  %3554 = dma.vmem_to_hbm [thread:$0]  (%p2614_p0), %s3550_s20, 32, %s3552_s6, [#allocation18]  }
 0xd98   : > { %v4789_v33 = vpop.permute.xlu0 %4788  ;;  %v3489_v23 = vpop.xlane.xlu1 %3488 }
 0xd99   : > { %v4791_v35 = vunpack.i.h.bf16 %v4789_v33  ;;  %v4790_v11 = vunpack.i.l.bf16 %v4789_v33  ;;  %v3521_v18 = vsel %vm6738_vm15, %v3489_v23, 0.0 }
 0xd9a   : > { %v3522_v25 = vadd.f32 %v5116_v38, %v3521_v18  }
 0xd9b   : > { %v3506_v37 = vmul.f32 %v4791_v35, %v7004_v31  ;;  %v3505_v52 = vmul.f32 %v4790_v11, %v7005_v43 }
 0xd9c   : > { %v7007_v38 = vmov %v3522_v25  ;;  %3531 = vst.msk [vmem:[#allocation16] sm:$0x3] (%p2614_p0), %vm3279_vm6, %v3522_v25 }
 0xd9d   : > { %v3513_v5 = vrot.slane %v3506_v37, 4  ;;  %v3507_v58 = vrot.slane %v3505_v52, 4  ;;  %3543 = dma.vmem_to_hbm [thread:$0]  (%p2614_p0), %s3539_s10, 32, %s3541_s9, [#allocation4]  }
 0xd9f   : > { %v3514_v17 = vadd.f32 %v3513_v5, %v3506_v37  ;;  %v3508_v27 = vadd.f32 %v3507_v58, %v3505_v52  ;;  %v7006_v58 = vmov %v3525_v3 }
 0xda1   : > { %v3515_v7 = vrot.slane %v3514_v17, 2  ;;  %v3509_v19 = vrot.slane %v3508_v27, 2 }
 0xda3   : > { %v3516_v10 = vadd.f32 %v3515_v7, %v3514_v17  ;;  %v3510_v45 = vadd.f32 %v3509_v19, %v3508_v27 }
 0xda5   : > { %v3517_v42 = vrot.slane %v3516_v10, 1  ;;  %v3511_v15 = vrot.slane %v3510_v45, 1  ;;  %2616 = sbr.rel (!%p2614_p0) target bundleno = 1833 (0x729), region = 136 }
 0xda7   : > { %v3518_v57 = vadd.f32 %v3517_v42, %v3516_v10  ;;  %v3512_v63 = vadd.f32 %v3511_v15, %v3510_v45 }
 0xda9   : > { %v3528_v63 = vsel %vm868_vm11, %v3518_v57, %v3512_v63  }
 0xdaa   :  { %5106 = dma.done.wait [#allocation4], 32  }
 0xdab   :  { %5107 = vsyncadd [#allocation4], 4294967264 }
 0xdac   :  { %5108 = dma.done.wait [#allocation18], 32  }
 0xdad   :  { %5109 = vsyncadd [#allocation18], 4294967264 }
 0xdae   :  { %3563 = vsyncpa [#allocation3], 1 }
 0xdaf   :  { %3564 = vsyncpa [#allocation6], 1 }
 0xdb0   :  { %3565 = vsyncpa [#allocation9], 1 }
 0xdb1   :  { %3566 = vsyncpa [#allocation12], 1 }
 0xdb2   :  { %3567 = vsyncpa [#allocation15], 1 }
 0xdb3   :  { %3568 = vsyncpa [#allocation4], 1 }
 0xdb4   :  { %3569 = vsyncpa [#allocation18], 1 }

</bundles_post_ra>
